<compile_context>
chip_gen: v7x
topology: tpu7x:2x2x1
jax: 0.10.0
libtpu: 0.0.40
codegen_flags: <defaults>
</compile_context>

<pallas_src>
import functools

import numpy as np
import jax
import jax.numpy as jnp
from jax import lax
from jax.experimental import pallas as pl
from jax.experimental.pallas import tpu as pltpu


# ----------------------------------------------------------------------------
# Fused, tiled kernel: conv3d(3x3x3,p=1)+ReLU -> conv3d(3x3x3,p=1)+ReLU on a
# lane-dense (C, TILE) output tile; the halo is taken from neighbour blocks.
# ----------------------------------------------------------------------------
def _convblock_kernel(xl_ref, xc_ref, xr_ref, bl_ref, bc_ref, br_ref,
                      w1_ref, b1_ref, w2_ref, b2_ref,
                      o_ref,
                      chunk_ref, bits_ref, pat_ref, y1_ref,
                      *, cin, cout, tile, halo, h2p, width, hw):
    """
    xl/xc/xr : (cin, tile)  prev / cur / next input blocks (lane-dense f32)
    bl/bc/br : (1, tile)    packed tap-validity bits for the same blocks
    w*_ref   : (cout, 27*C) bf16 weight matrices, column = tap*C + ci
    b*_ref   : (cout, 1)    f32 bias
    o_ref    : (cout, tile) f32 output tile
    chunk_ref: (cin, tile+2*h2p) f32 scratch -- haloed input chunk
    bits_ref : (1, tile+2*h2p) int32 scratch -- haloed validity bits
    pat_ref  : (27*max(cin,cout), patw) bf16 scratch -- im2col patches
    y1_ref   : (cout, patw) f32 scratch -- conv1 result over tile +/- halo
    """
    # ---- assemble the haloed chunk from prev/cur/next tiles (lane aligned) --
    chunk_ref[:, :h2p] = xl_ref[:, tile - h2p:]
    chunk_ref[:, h2p:h2p + tile] = xc_ref[...]
    chunk_ref[:, h2p + tile:] = xr_ref[:, :h2p]
    bits_ref[:, :h2p] = bl_ref[:, tile - h2p:]
    bits_ref[:, h2p:h2p + tile] = bc_ref[...]
    bits_ref[:, h2p + tile:] = br_ref[:, :h2p]

    offs = [kd * hw + kh * width + kw
            for kd in (-1, 0, 1) for kh in (-1, 0, 1) for kw in (-1, 0, 1)]

    def conv(src_ref, c, src_base, bits_base, length, w_ref, b_ref):
        # im2col into the bf16 patch scratch (exact K = 27*c rows, `length` cols).
        mrow = bits_ref[:, bits_base:bits_base + length]             # (1, L) i32
        for t, off in enumerate(offs):
            win = src_ref[:c, src_base + off:src_base + off + length]   # (c, L)
            m = ((mrow >> t) & 1).astype(jnp.float32)                    # {0,1}
            pat_ref[t * c:(t + 1) * c, :length] = (win * m).astype(jnp.bfloat16)
        # One MXU matmul per conv, f32 accumulation.
        y = jnp.dot(w_ref[...], pat_ref[:27 * c, :length],
                    preferred_element_type=jnp.float32)                  # (cout, L)
        return jnp.maximum(y + b_ref[...], 0.0)

    # conv1 over the tile plus a `halo` margin (everything conv2's taps read).
    l1 = tile + 2 * halo
    y1_ref[:, :l1] = conv(chunk_ref, cin, h2p - halo, h2p - halo, l1,
                          w1_ref, b1_ref)
    # conv2 over the tile itself; all its reads stay inside the l1 region.
    o_ref[...] = conv(y1_ref, cout, halo, h2p, tile, w2_ref, b2_ref)


# ----------------------------------------------------------------------------
# Wrapper: layout plumbing (lane-dense flatten, weight packing, packed
# validity bits, tile sizing, final un-flatten).
# ----------------------------------------------------------------------------
def convblock_forward(x, params):
    """x: (N, Cin, D, H, W) float32; params = (w1, b1, w2, b2) PyTorch shapes."""
    w1, b1, w2, b2 = params
    n, cin, d, h, w = x.shape
    cout = w1.shape[0]
    assert w1.shape == (cout, cin, 3, 3, 3), w1.shape
    assert w2.shape == (cout, cout, 3, 3, 3), w2.shape
    assert b1.shape == (cout,) and b2.shape == (cout,)

    R = n * d * h * w
    hw = h * w
    halo = hw + w + 1                            # max |tap offset| in flat coords
    rnd = lambda v, m: -(-v // m) * m
    h2p = rnd(2 * halo, 128)                     # lane-aligned neighbour halo
    # Tile of the flattened spatial axis: multiple of 128, >= h2p (one
    # neighbour block covers the halo), ~2k lanes, >= 2 tiles when possible.
    tile = max(h2p, min(2048, rnd(max(R // 2, 1), 128)))
    ntiles = -(-R // tile)
    r_pad = ntiles * tile
    clen = tile + 2 * h2p
    patw = rnd(tile + 2 * halo, 128)

    # Lane-dense (C, R) activations, zero-padded to r_pad.
    xf = jnp.pad(x.transpose(1, 0, 2, 3, 4).reshape(cin, R).astype(jnp.float32),
                 ((0, 0), (0, r_pad - R)))

    # Packed validity bits (trace-time numpy): bit t of bits[r] == tap t valid.
    rr = np.arange(R, dtype=np.int64)
    dd, hh, ww = (rr // hw) % d, (rr // w) % h, rr % w
    bits_np = np.zeros(R, dtype=np.int64)
    t = 0
    for kd in (-1, 0, 1):
        for kh in (-1, 0, 1):
            for kw in (-1, 0, 1):
                ok = ((dd + kd >= 0) & (dd + kd < d) & (hh + kh >= 0) &
                      (hh + kh < h) & (ww + kw >= 0) & (ww + kw < w))
                bits_np |= ok.astype(np.int64) << t
                t += 1
    bits = jnp.asarray(np.pad(bits_np, (0, r_pad - R)).astype(np.int32)
                       .reshape(1, r_pad))

    # Weights as (Cout, 27*C) bf16 matmul matrices; column index = tap*C + ci.
    k1, k2 = 27 * cin, 27 * cout
    w1m = w1.transpose(0, 2, 3, 4, 1).reshape(cout, k1).astype(jnp.bfloat16)
    w2m = w2.transpose(0, 2, 3, 4, 1).reshape(cout, k2).astype(jnp.bfloat16)
    b1c = b1.reshape(cout, 1).astype(jnp.float32)
    b2c = b2.reshape(cout, 1).astype(jnp.float32)

    prev_map = lambda i: (0, jnp.maximum(i - 1, 0))
    cur_map = lambda i: (0, i)
    next_map = lambda i: (0, jnp.minimum(i + 1, ntiles - 1))
    const_map = lambda i: (0, 0)

    kern = functools.partial(_convblock_kernel, cin=cin, cout=cout, tile=tile,
                             halo=halo, h2p=h2p, width=w, hw=hw)

    # Explicit VMEM budget (double-buffered blocks + scratch) with headroom.
    blk = 2 * (3 * cin * tile * 4 + 3 * tile * 4 + cout * tile * 4 +
               (k1 + k2) * cout * 2 + 2 * cout * 4)
    scr = (cin * clen * 4 + clen * 4 +
           27 * max(cin, cout) * patw * 2 + cout * patw * 4)
    vmem_limit = int(min(max(4 * (blk + scr) + (8 << 20), 16 << 20), 64 << 20))

    out = pl.pallas_call(
        kern,
        out_shape=jax.ShapeDtypeStruct((cout, r_pad), jnp.float32),
        grid=(ntiles,),
        in_specs=[
            pl.BlockSpec((cin, tile), prev_map),
            pl.BlockSpec((cin, tile), cur_map),
            pl.BlockSpec((cin, tile), next_map),
            pl.BlockSpec((1, tile), prev_map),
            pl.BlockSpec((1, tile), cur_map),
            pl.BlockSpec((1, tile), next_map),
            pl.BlockSpec((cout, k1), const_map),
            pl.BlockSpec((cout, 1), const_map),
            pl.BlockSpec((cout, k2), const_map),
            pl.BlockSpec((cout, 1), const_map),
        ],
        out_specs=pl.BlockSpec((cout, tile), cur_map),
        scratch_shapes=[
            pltpu.VMEM((cin, clen), jnp.float32),               # haloed input
            pltpu.VMEM((1, clen), jnp.int32),                   # haloed bits
            pltpu.VMEM((27 * max(cin, cout), patw), jnp.bfloat16),  # im2col
            pltpu.VMEM((cout, patw), jnp.float32),              # conv1 result
        ],
        compiler_params=pltpu.CompilerParams(
            dimension_semantics=("parallel",),
            vmem_limit_bytes=vmem_limit),
    )(xf, xf, xf, bits, bits, bits, w1m, b1c, w2m, b2c)

    # (Cout, r_pad) lane-dense -> PyTorch NCDHW.
    return out[:, :R].reshape(cout, n, d, h, w).transpose(1, 0, 2, 3, 4)


# ----------------------------------------------------------------------------
# Pure-JAX reference (lax.conv) for correctness checking.
# ----------------------------------------------------------------------------
def reference_forward(x, params):
    w1, b1, w2, b2 = params

    def c3(x5, wt, bias):
        y = lax.conv_general_dilated(
            x5, wt, (1, 1, 1), [(1, 1)] * 3,
            dimension_numbers=("NCDHW", "OIDHW", "NCDHW"),
            precision=lax.Precision.HIGHEST) + bias[None, :, None, None, None]
        return jnp.maximum(y, 0.0)

    return c3(c3(x, w1, b1), w2, b2)


if __name__ == "__main__":
    N, Cin, Cout = 2, 4, 2
    D = H = W = 8

    key = jax.random.PRNGKey(0)
    kx, kw1, kb1, kw2, kb2 = jax.random.split(key, 5)
    x = jax.random.normal(kx, (N, Cin, D, H, W), jnp.float32)
    w1 = 0.1 * jax.random.normal(kw1, (Cout, Cin, 3, 3, 3), jnp.float32)
    b1 = 0.1 * jax.random.normal(kb1, (Cout,), jnp.float32)
    w2 = 0.1 * jax.random.normal(kw2, (Cout, Cout, 3, 3, 3), jnp.float32)
    b2 = 0.1 * jax.random.normal(kb2, (Cout,), jnp.float32)
    params = (w1, b1, w2, b2)

    out = jax.jit(convblock_forward)(x, params)
    out = jax.block_until_ready(out)

    ref = reference_forward(x, params)
    assert out.shape == (N, Cout, D, H, W), out.shape
    # Tolerance documents bf16 MXU operands (f32 accumulation) vs. the
    # HIGHEST-precision f32 reference convolution.
    assert jnp.allclose(out, ref, atol=2e-2, rtol=2e-2), \
        float(jnp.max(jnp.abs(out - ref)))

    print("KERNEL_OK")
</pallas_src>

<mosaic_0001>
module attributes {stable_mosaic.version = 11 : i64} {
  func.func @_convblock_kernel(%arg0: i32, %arg1: memref<4x512xf32, #tpu.memory_space<vmem>>, %arg2: memref<4x512xf32, #tpu.memory_space<vmem>>, %arg3: memref<4x512xf32, #tpu.memory_space<vmem>>, %arg4: memref<1x512xi32, #tpu.memory_space<vmem>>, %arg5: memref<1x512xi32, #tpu.memory_space<vmem>>, %arg6: memref<1x512xi32, #tpu.memory_space<vmem>>, %arg7: memref<2x108xbf16, #tpu.memory_space<vmem>>, %arg8: memref<2x1xf32, #tpu.memory_space<vmem>>, %arg9: memref<2x54xbf16, #tpu.memory_space<vmem>>, %arg10: memref<2x1xf32, #tpu.memory_space<vmem>>, %arg11: memref<2x512xf32, #tpu.memory_space<vmem>>, %arg12: memref<4x1024xf32, #tpu.memory_space<vmem>>, %arg13: memref<1x1024xi32, #tpu.memory_space<vmem>>, %arg14: memref<108x768xbf16, #tpu.memory_space<vmem>>, %arg15: memref<2x768xf32, #tpu.memory_space<vmem>>) attributes {dimension_semantics = [#tpu.dimension_semantics<parallel>], iteration_bounds = array<i64: 2>, scalar_prefetch = 0 : i64, scratch_operands = 4 : i64, tpu.core_type = #tpu.core_type<tc>, window_params = [{transform_indices = @transform_0, window_bounds = array<i64: 4, 512>}, {transform_indices = @transform_1, window_bounds = array<i64: 4, 512>}, {transform_indices = @transform_2, window_bounds = array<i64: 4, 512>}, {transform_indices = @transform_3, window_bounds = array<i64: 1, 512>}, {transform_indices = @transform_4, window_bounds = array<i64: 1, 512>}, {transform_indices = @transform_5, window_bounds = array<i64: 1, 512>}, {pipeline_mode = #tpu.pipeline_mode<synchronous>, transform_indices = @transform_6, window_bounds = array<i64: 2, 108>}, {pipeline_mode = #tpu.pipeline_mode<synchronous>, transform_indices = @transform_7, window_bounds = array<i64: 2, 1>}, {pipeline_mode = #tpu.pipeline_mode<synchronous>, transform_indices = @transform_8, window_bounds = array<i64: 2, 54>}, {pipeline_mode = #tpu.pipeline_mode<synchronous>, transform_indices = @transform_9, window_bounds = array<i64: 2, 1>}, {transform_indices = @transform_10, window_bounds = array<i64: 2, 512>}]} {
    %c0 = arith.constant 0 : index
    %c256 = arith.constant 256 : index
    %0 = vector.load %arg1[%c0, %c256] : memref<4x512xf32, #tpu.memory_space<vmem>>, vector<4x256xf32>
    %c0_0 = arith.constant 0 : index
    %c0_1 = arith.constant 0 : index
    %1 = vector.load %arg12[%c0_0, %c0_1] : memref<4x1024xf32, #tpu.memory_space<vmem>>, vector<4x256xf32>
    tpu.vector_store %arg12[%c0_0, %c0_1], %0 {strides = array<i32>} : memref<4x1024xf32, #tpu.memory_space<vmem>>, vector<4x256xf32>,
    %c0_2 = arith.constant 0 : index
    %c0_3 = arith.constant 0 : index
    %2 = vector.load %arg2[%c0_2, %c0_3] : memref<4x512xf32, #tpu.memory_space<vmem>>, vector<4x512xf32>
    %c0_4 = arith.constant 0 : index
    %c256_5 = arith.constant 256 : index
    %3 = vector.load %arg12[%c0_4, %c256_5] : memref<4x1024xf32, #tpu.memory_space<vmem>>, vector<4x512xf32>
    tpu.vector_store %arg12[%c0_4, %c256_5], %2 {strides = array<i32>} : memref<4x1024xf32, #tpu.memory_space<vmem>>, vector<4x512xf32>,
    %c0_6 = arith.constant 0 : index
    %c0_7 = arith.constant 0 : index
    %4 = vector.load %arg3[%c0_6, %c0_7] : memref<4x512xf32, #tpu.memory_space<vmem>>, vector<4x256xf32>
    %c0_8 = arith.constant 0 : index
    %c768 = arith.constant 768 : index
    %5 = vector.load %arg12[%c0_8, %c768] : memref<4x1024xf32, #tpu.memory_space<vmem>>, vector<4x256xf32>
    tpu.vector_store %arg12[%c0_8, %c768], %4 {strides = array<i32>} : memref<4x1024xf32, #tpu.memory_space<vmem>>, vector<4x256xf32>,
    %c0_9 = arith.constant 0 : index
    %c256_10 = arith.constant 256 : index
    %6 = vector.load %arg4[%c0_9, %c256_10] : memref<1x512xi32, #tpu.memory_space<vmem>>, vector<1x256xi32>
    %c0_11 = arith.constant 0 : index
    %c0_12 = arith.constant 0 : index
    %7 = vector.load %arg13[%c0_11, %c0_12] : memref<1x1024xi32, #tpu.memory_space<vmem>>, vector<1x256xi32>
    tpu.vector_store %arg13[%c0_11, %c0_12], %6 {strides = array<i32>} : memref<1x1024xi32, #tpu.memory_space<vmem>>, vector<1x256xi32>,
    %c0_13 = arith.constant 0 : index
    %c0_14 = arith.constant 0 : index
    %8 = vector.load %arg5[%c0_13, %c0_14] : memref<1x512xi32, #tpu.memory_space<vmem>>, vector<1x512xi32>
    %c0_15 = arith.constant 0 : index
    %c256_16 = arith.constant 256 : index
    %9 = vector.load %arg13[%c0_15, %c256_16] : memref<1x1024xi32, #tpu.memory_space<vmem>>, vector<1x512xi32>
    tpu.vector_store %arg13[%c0_15, %c256_16], %8 {strides = array<i32>} : memref<1x1024xi32, #tpu.memory_space<vmem>>, vector<1x512xi32>,
    %c0_17 = arith.constant 0 : index
    %c0_18 = arith.constant 0 : index
    %10 = vector.load %arg6[%c0_17, %c0_18] : memref<1x512xi32, #tpu.memory_space<vmem>>, vector<1x256xi32>
    %c0_19 = arith.constant 0 : index
    %c768_20 = arith.constant 768 : index
    %11 = vector.load %arg13[%c0_19, %c768_20] : memref<1x1024xi32, #tpu.memory_space<vmem>>, vector<1x256xi32>
    tpu.vector_store %arg13[%c0_19, %c768_20], %10 {strides = array<i32>} : memref<1x1024xi32, #tpu.memory_space<vmem>>, vector<1x256xi32>,
    %c0_21 = arith.constant 0 : index
    %c183 = arith.constant 183 : index
    %12 = vector.load %arg13[%c0_21, %c183] : memref<1x1024xi32, #tpu.memory_space<vmem>>, vector<1x658xi32>
    %c0_22 = arith.constant 0 : index
    %c110 = arith.constant 110 : index
    %13 = vector.load %arg12[%c0_22, %c110] : memref<4x1024xf32, #tpu.memory_space<vmem>>, vector<4x658xf32>
    %c0_i32 = arith.constant 0 : i32
    %14 = vector.broadcast %c0_i32 : i32 to vector<1x658xi32>
    %15 = arith.shrsi %12, %14 : vector<1x658xi32>
    %c1_i32 = arith.constant 1 : i32
    %16 = vector.broadcast %c1_i32 : i32 to vector<1x658xi32>
    %17 = arith.andi %15, %16 : vector<1x658xi32>
    %18 = arith.sitofp %17 : vector<1x658xi32> to vector<1x658xf32>
    %19 = vector.broadcast %18 : vector<1x658xf32> to vector<4x658xf32>
    %20 = arith.mulf %13, %19 : vector<4x658xf32>
    %21 = arith.truncf %20 : vector<4x658xf32> to vector<4x658xbf16>
    %c0_23 = arith.constant 0 : index
    %c0_24 = arith.constant 0 : index
    %22 = vector.load %arg14[%c0_23, %c0_24] : memref<108x768xbf16, #tpu.memory_space<vmem>>, vector<4x658xbf16>
    tpu.vector_store %arg14[%c0_23, %c0_24], %21 {strides = array<i32>} : memref<108x768xbf16, #tpu.memory_space<vmem>>, vector<4x658xbf16>,
    %c0_25 = arith.constant 0 : index
    %c111 = arith.constant 111 : index
    %23 = vector.load %arg12[%c0_25, %c111] : memref<4x1024xf32, #tpu.memory_space<vmem>>, vector<4x658xf32>
    %c1_i32_26 = arith.constant 1 : i32
    %24 = vector.broadcast %c1_i32_26 : i32 to vector<1x658xi32>
    %25 = arith.shrsi %12, %24 : vector<1x658xi32>
    %c1_i32_27 = arith.constant 1 : i32
    %26 = vector.broadcast %c1_i32_27 : i32 to vector<1x658xi32>
    %27 = arith.andi %25, %26 : vector<1x658xi32>
    %28 = arith.sitofp %27 : vector<1x658xi32> to vector<1x658xf32>
    %29 = vector.broadcast %28 : vector<1x658xf32> to vector<4x658xf32>
    %30 = arith.mulf %23, %29 : vector<4x658xf32>
    %31 = arith.truncf %30 : vector<4x658xf32> to vector<4x658xbf16>
    %c4 = arith.constant 4 : index
    %c0_28 = arith.constant 0 : index
    %32 = vector.load %arg14[%c4, %c0_28] : memref<108x768xbf16, #tpu.memory_space<vmem>>, vector<4x658xbf16>
    tpu.vector_store %arg14[%c4, %c0_28], %31 {strides = array<i32>} : memref<108x768xbf16, #tpu.memory_space<vmem>>, vector<4x658xbf16>,
    %c0_29 = arith.constant 0 : index
    %c112 = arith.constant 112 : index
    %33 = vector.load %arg12[%c0_29, %c112] : memref<4x1024xf32, #tpu.memory_space<vmem>>, vector<4x658xf32>
    %c2_i32 = arith.constant 2 : i32
    %34 = vector.broadcast %c2_i32 : i32 to vector<1x658xi32>
    %35 = arith.shrsi %12, %34 : vector<1x658xi32>
    %c1_i32_30 = arith.constant 1 : i32
    %36 = vector.broadcast %c1_i32_30 : i32 to vector<1x658xi32>
    %37 = arith.andi %35, %36 : vector<1x658xi32>
    %38 = arith.sitofp %37 : vector<1x658xi32> to vector<1x658xf32>
    %39 = vector.broadcast %38 : vector<1x658xf32> to vector<4x658xf32>
    %40 = arith.mulf %33, %39 : vector<4x658xf32>
    %41 = arith.truncf %40 : vector<4x658xf32> to vector<4x658xbf16>
    %c8 = arith.constant 8 : index
    %c0_31 = arith.constant 0 : index
    %42 = vector.load %arg14[%c8, %c0_31] : memref<108x768xbf16, #tpu.memory_space<vmem>>, vector<4x658xbf16>
    tpu.vector_store %arg14[%c8, %c0_31], %41 {strides = array<i32>} : memref<108x768xbf16, #tpu.memory_space<vmem>>, vector<4x658xbf16>,
    %c0_32 = arith.constant 0 : index
    %c118 = arith.constant 118 : index
    %43 = vector.load %arg12[%c0_32, %c118] : memref<4x1024xf32, #tpu.memory_space<vmem>>, vector<4x658xf32>
    %c3_i32 = arith.constant 3 : i32
    %44 = vector.broadcast %c3_i32 : i32 to vector<1x658xi32>
    %45 = arith.shrsi %12, %44 : vector<1x658xi32>
    %c1_i32_33 = arith.constant 1 : i32
    %46 = vector.broadcast %c1_i32_33 : i32 to vector<1x658xi32>
    %47 = arith.andi %45, %46 : vector<1x658xi32>
    %48 = arith.sitofp %47 : vector<1x658xi32> to vector<1x658xf32>
    %49 = vector.broadcast %48 : vector<1x658xf32> to vector<4x658xf32>
    %50 = arith.mulf %43, %49 : vector<4x658xf32>
    %51 = arith.truncf %50 : vector<4x658xf32> to vector<4x658xbf16>
    %c12 = arith.constant 12 : index
    %c0_34 = arith.constant 0 : index
    %52 = vector.load %arg14[%c12, %c0_34] : memref<108x768xbf16, #tpu.memory_space<vmem>>, vector<4x658xbf16>
    tpu.vector_store %arg14[%c12, %c0_34], %51 {strides = array<i32>} : memref<108x768xbf16, #tpu.memory_space<vmem>>, vector<4x658xbf16>,
    %c0_35 = arith.constant 0 : index
    %c119 = arith.constant 119 : index
    %53 = vector.load %arg12[%c0_35, %c119] : memref<4x1024xf32, #tpu.memory_space<vmem>>, vector<4x658xf32>
    %c4_i32 = arith.constant 4 : i32
    %54 = vector.broadcast %c4_i32 : i32 to vector<1x658xi32>
    %55 = arith.shrsi %12, %54 : vector<1x658xi32>
    %c1_i32_36 = arith.constant 1 : i32
    %56 = vector.broadcast %c1_i32_36 : i32 to vector<1x658xi32>
    %57 = arith.andi %55, %56 : vector<1x658xi32>
    %58 = arith.sitofp %57 : vector<1x658xi32> to vector<1x658xf32>
    %59 = vector.broadcast %58 : vector<1x658xf32> to vector<4x658xf32>
    %60 = arith.mulf %53, %59 : vector<4x658xf32>
    %61 = arith.truncf %60 : vector<4x658xf32> to vector<4x658xbf16>
    %c16 = arith.constant 16 : index
    %c0_37 = arith.constant 0 : index
    %62 = vector.load %arg14[%c16, %c0_37] : memref<108x768xbf16, #tpu.memory_space<vmem>>, vector<4x658xbf16>
    tpu.vector_store %arg14[%c16, %c0_37], %61 {strides = array<i32>} : memref<108x768xbf16, #tpu.memory_space<vmem>>, vector<4x658xbf16>,
    %c0_38 = arith.constant 0 : index
    %c120 = arith.constant 120 : index
    %63 = vector.load %arg12[%c0_38, %c120] : memref<4x1024xf32, #tpu.memory_space<vmem>>, vector<4x658xf32>
    %c5_i32 = arith.constant 5 : i32
    %64 = vector.broadcast %c5_i32 : i32 to vector<1x658xi32>
    %65 = arith.shrsi %12, %64 : vector<1x658xi32>
    %c1_i32_39 = arith.constant 1 : i32
    %66 = vector.broadcast %c1_i32_39 : i32 to vector<1x658xi32>
    %67 = arith.andi %65, %66 : vector<1x658xi32>
    %68 = arith.sitofp %67 : vector<1x658xi32> to vector<1x658xf32>
    %69 = vector.broadcast %68 : vector<1x658xf32> to vector<4x658xf32>
    %70 = arith.mulf %63, %69 : vector<4x658xf32>
    %71 = arith.truncf %70 : vector<4x658xf32> to vector<4x658xbf16>
    %c20 = arith.constant 20 : index
    %c0_40 = arith.constant 0 : index
    %72 = vector.load %arg14[%c20, %c0_40] : memref<108x768xbf16, #tpu.memory_space<vmem>>, vector<4x658xbf16>
    tpu.vector_store %arg14[%c20, %c0_40], %71 {strides = array<i32>} : memref<108x768xbf16, #tpu.memory_space<vmem>>, vector<4x658xbf16>,
    %c0_41 = arith.constant 0 : index
    %c126 = arith.constant 126 : index
    %73 = vector.load %arg12[%c0_41, %c126] : memref<4x1024xf32, #tpu.memory_space<vmem>>, vector<4x658xf32>
    %c6_i32 = arith.constant 6 : i32
    %74 = vector.broadcast %c6_i32 : i32 to vector<1x658xi32>
    %75 = arith.shrsi %12, %74 : vector<1x658xi32>
    %c1_i32_42 = arith.constant 1 : i32
    %76 = vector.broadcast %c1_i32_42 : i32 to vector<1x658xi32>
    %77 = arith.andi %75, %76 : vector<1x658xi32>
    %78 = arith.sitofp %77 : vector<1x658xi32> to vector<1x658xf32>
    %79 = vector.broadcast %78 : vector<1x658xf32> to vector<4x658xf32>
    %80 = arith.mulf %73, %79 : vector<4x658xf32>
    %81 = arith.truncf %80 : vector<4x658xf32> to vector<4x658xbf16>
    %c24 = arith.constant 24 : index
    %c0_43 = arith.constant 0 : index
    %82 = vector.load %arg14[%c24, %c0_43] : memref<108x768xbf16, #tpu.memory_space<vmem>>, vector<4x658xbf16>
    tpu.vector_store %arg14[%c24, %c0_43], %81 {strides = array<i32>} : memref<108x768xbf16, #tpu.memory_space<vmem>>, vector<4x658xbf16>,
    %c0_44 = arith.constant 0 : index
    %c127 = arith.constant 127 : index
    %83 = vector.load %arg12[%c0_44, %c127] : memref<4x1024xf32, #tpu.memory_space<vmem>>, vector<4x658xf32>
    %c7_i32 = arith.constant 7 : i32
    %84 = vector.broadcast %c7_i32 : i32 to vector<1x658xi32>
    %85 = arith.shrsi %12, %84 : vector<1x658xi32>
    %c1_i32_45 = arith.constant 1 : i32
    %86 = vector.broadcast %c1_i32_45 : i32 to vector<1x658xi32>
    %87 = arith.andi %85, %86 : vector<1x658xi32>
    %88 = arith.sitofp %87 : vector<1x658xi32> to vector<1x658xf32>
    %89 = vector.broadcast %88 : vector<1x658xf32> to vector<4x658xf32>
    %90 = arith.mulf %83, %89 : vector<4x658xf32>
    %91 = arith.truncf %90 : vector<4x658xf32> to vector<4x658xbf16>
    %c28 = arith.constant 28 : index
    %c0_46 = arith.constant 0 : index
    %92 = vector.load %arg14[%c28, %c0_46] : memref<108x768xbf16, #tpu.memory_space<vmem>>, vector<4x658xbf16>
    tpu.vector_store %arg14[%c28, %c0_46], %91 {strides = array<i32>} : memref<108x768xbf16, #tpu.memory_space<vmem>>, vector<4x658xbf16>,
    %c0_47 = arith.constant 0 : index
    %c128 = arith.constant 128 : index
    %93 = vector.load %arg12[%c0_47, %c128] : memref<4x1024xf32, #tpu.memory_space<vmem>>, vector<4x658xf32>
    %c8_i32 = arith.constant 8 : i32
    %94 = vector.broadcast %c8_i32 : i32 to vector<1x658xi32>
    %95 = arith.shrsi %12, %94 : vector<1x658xi32>
    %c1_i32_48 = arith.constant 1 : i32
    %96 = vector.broadcast %c1_i32_48 : i32 to vector<1x658xi32>
    %97 = arith.andi %95, %96 : vector<1x658xi32>
    %98 = arith.sitofp %97 : vector<1x658xi32> to vector<1x658xf32>
    %99 = vector.broadcast %98 : vector<1x658xf32> to vector<4x658xf32>
    %100 = arith.mulf %93, %99 : vector<4x658xf32>
    %101 = arith.truncf %100 : vector<4x658xf32> to vector<4x658xbf16>
    %c32 = arith.constant 32 : index
    %c0_49 = arith.constant 0 : index
    %102 = vector.load %arg14[%c32, %c0_49] : memref<108x768xbf16, #tpu.memory_space<vmem>>, vector<4x658xbf16>
    tpu.vector_store %arg14[%c32, %c0_49], %101 {strides = array<i32>} : memref<108x768xbf16, #tpu.memory_space<vmem>>, vector<4x658xbf16>,
    %c0_50 = arith.constant 0 : index
    %c174 = arith.constant 174 : index
    %103 = vector.load %arg12[%c0_50, %c174] : memref<4x1024xf32, #tpu.memory_space<vmem>>, vector<4x658xf32>
    %c9_i32 = arith.constant 9 : i32
    %104 = vector.broadcast %c9_i32 : i32 to vector<1x658xi32>
    %105 = arith.shrsi %12, %104 : vector<1x658xi32>
    %c1_i32_51 = arith.constant 1 : i32
    %106 = vector.broadcast %c1_i32_51 : i32 to vector<1x658xi32>
    %107 = arith.andi %105, %106 : vector<1x658xi32>
    %108 = arith.sitofp %107 : vector<1x658xi32> to vector<1x658xf32>
    %109 = vector.broadcast %108 : vector<1x658xf32> to vector<4x658xf32>
    %110 = arith.mulf %103, %109 : vector<4x658xf32>
    %111 = arith.truncf %110 : vector<4x658xf32> to vector<4x658xbf16>
    %c36 = arith.constant 36 : index
    %c0_52 = arith.constant 0 : index
    %112 = vector.load %arg14[%c36, %c0_52] : memref<108x768xbf16, #tpu.memory_space<vmem>>, vector<4x658xbf16>
    tpu.vector_store %arg14[%c36, %c0_52], %111 {strides = array<i32>} : memref<108x768xbf16, #tpu.memory_space<vmem>>, vector<4x658xbf16>,
    %c0_53 = arith.constant 0 : index
    %c175 = arith.constant 175 : index
    %113 = vector.load %arg12[%c0_53, %c175] : memref<4x1024xf32, #tpu.memory_space<vmem>>, vector<4x658xf32>
    %c10_i32 = arith.constant 10 : i32
    %114 = vector.broadcast %c10_i32 : i32 to vector<1x658xi32>
    %115 = arith.shrsi %12, %114 : vector<1x658xi32>
    %c1_i32_54 = arith.constant 1 : i32
    %116 = vector.broadcast %c1_i32_54 : i32 to vector<1x658xi32>
    %117 = arith.andi %115, %116 : vector<1x658xi32>
    %118 = arith.sitofp %117 : vector<1x658xi32> to vector<1x658xf32>
    %119 = vector.broadcast %118 : vector<1x658xf32> to vector<4x658xf32>
    %120 = arith.mulf %113, %119 : vector<4x658xf32>
    %121 = arith.truncf %120 : vector<4x658xf32> to vector<4x658xbf16>
    %c40 = arith.constant 40 : index
    %c0_55 = arith.constant 0 : index
    %122 = vector.load %arg14[%c40, %c0_55] : memref<108x768xbf16, #tpu.memory_space<vmem>>, vector<4x658xbf16>
    tpu.vector_store %arg14[%c40, %c0_55], %121 {strides = array<i32>} : memref<108x768xbf16, #tpu.memory_space<vmem>>, vector<4x658xbf16>,
    %c0_56 = arith.constant 0 : index
    %c176 = arith.constant 176 : index
    %123 = vector.load %arg12[%c0_56, %c176] : memref<4x1024xf32, #tpu.memory_space<vmem>>, vector<4x658xf32>
    %c11_i32 = arith.constant 11 : i32
    %124 = vector.broadcast %c11_i32 : i32 to vector<1x658xi32>
    %125 = arith.shrsi %12, %124 : vector<1x658xi32>
    %c1_i32_57 = arith.constant 1 : i32
    %126 = vector.broadcast %c1_i32_57 : i32 to vector<1x658xi32>
    %127 = arith.andi %125, %126 : vector<1x658xi32>
    %128 = arith.sitofp %127 : vector<1x658xi32> to vector<1x658xf32>
    %129 = vector.broadcast %128 : vector<1x658xf32> to vector<4x658xf32>
    %130 = arith.mulf %123, %129 : vector<4x658xf32>
    %131 = arith.truncf %130 : vector<4x658xf32> to vector<4x658xbf16>
    %c44 = arith.constant 44 : index
    %c0_58 = arith.constant 0 : index
    %132 = vector.load %arg14[%c44, %c0_58] : memref<108x768xbf16, #tpu.memory_space<vmem>>, vector<4x658xbf16>
    tpu.vector_store %arg14[%c44, %c0_58], %131 {strides = array<i32>} : memref<108x768xbf16, #tpu.memory_space<vmem>>, vector<4x658xbf16>,
    %c0_59 = arith.constant 0 : index
    %c182 = arith.constant 182 : index
    %133 = vector.load %arg12[%c0_59, %c182] : memref<4x1024xf32, #tpu.memory_space<vmem>>, vector<4x658xf32>
    %c12_i32 = arith.constant 12 : i32
    %134 = vector.broadcast %c12_i32 : i32 to vector<1x658xi32>
    %135 = arith.shrsi %12, %134 : vector<1x658xi32>
    %c1_i32_60 = arith.constant 1 : i32
    %136 = vector.broadcast %c1_i32_60 : i32 to vector<1x658xi32>
    %137 = arith.andi %135, %136 : vector<1x658xi32>
    %138 = arith.sitofp %137 : vector<1x658xi32> to vector<1x658xf32>
    %139 = vector.broadcast %138 : vector<1x658xf32> to vector<4x658xf32>
    %140 = arith.mulf %133, %139 : vector<4x658xf32>
    %141 = arith.truncf %140 : vector<4x658xf32> to vector<4x658xbf16>
    %c48 = arith.constant 48 : index
    %c0_61 = arith.constant 0 : index
    %142 = vector.load %arg14[%c48, %c0_61] : memref<108x768xbf16, #tpu.memory_space<vmem>>, vector<4x658xbf16>
    tpu.vector_store %arg14[%c48, %c0_61], %141 {strides = array<i32>} : memref<108x768xbf16, #tpu.memory_space<vmem>>, vector<4x658xbf16>,
    %c0_62 = arith.constant 0 : index
    %c183_63 = arith.constant 183 : index
    %143 = vector.load %arg12[%c0_62, %c183_63] : memref<4x1024xf32, #tpu.memory_space<vmem>>, vector<4x658xf32>
    %c13_i32 = arith.constant 13 : i32
    %144 = vector.broadcast %c13_i32 : i32 to vector<1x658xi32>
    %145 = arith.shrsi %12, %144 : vector<1x658xi32>
    %c1_i32_64 = arith.constant 1 : i32
    %146 = vector.broadcast %c1_i32_64 : i32 to vector<1x658xi32>
    %147 = arith.andi %145, %146 : vector<1x658xi32>
    %148 = arith.sitofp %147 : vector<1x658xi32> to vector<1x658xf32>
    %149 = vector.broadcast %148 : vector<1x658xf32> to vector<4x658xf32>
    %150 = arith.mulf %143, %149 : vector<4x658xf32>
    %151 = arith.truncf %150 : vector<4x658xf32> to vector<4x658xbf16>
    %c52 = arith.constant 52 : index
    %c0_65 = arith.constant 0 : index
    %152 = vector.load %arg14[%c52, %c0_65] : memref<108x768xbf16, #tpu.memory_space<vmem>>, vector<4x658xbf16>
    tpu.vector_store %arg14[%c52, %c0_65], %151 {strides = array<i32>} : memref<108x768xbf16, #tpu.memory_space<vmem>>, vector<4x658xbf16>,
    %c0_66 = arith.constant 0 : index
    %c184 = arith.constant 184 : index
    %153 = vector.load %arg12[%c0_66, %c184] : memref<4x1024xf32, #tpu.memory_space<vmem>>, vector<4x658xf32>
    %c14_i32 = arith.constant 14 : i32
    %154 = vector.broadcast %c14_i32 : i32 to vector<1x658xi32>
    %155 = arith.shrsi %12, %154 : vector<1x658xi32>
    %c1_i32_67 = arith.constant 1 : i32
    %156 = vector.broadcast %c1_i32_67 : i32 to vector<1x658xi32>
    %157 = arith.andi %155, %156 : vector<1x658xi32>
    %158 = arith.sitofp %157 : vector<1x658xi32> to vector<1x658xf32>
    %159 = vector.broadcast %158 : vector<1x658xf32> to vector<4x658xf32>
    %160 = arith.mulf %153, %159 : vector<4x658xf32>
    %161 = arith.truncf %160 : vector<4x658xf32> to vector<4x658xbf16>
    %c56 = arith.constant 56 : index
    %c0_68 = arith.constant 0 : index
    %162 = vector.load %arg14[%c56, %c0_68] : memref<108x768xbf16, #tpu.memory_space<vmem>>, vector<4x658xbf16>
    tpu.vector_store %arg14[%c56, %c0_68], %161 {strides = array<i32>} : memref<108x768xbf16, #tpu.memory_space<vmem>>, vector<4x658xbf16>,
    %c0_69 = arith.constant 0 : index
    %c190 = arith.constant 190 : index
    %163 = vector.load %arg12[%c0_69, %c190] : memref<4x1024xf32, #tpu.memory_space<vmem>>, vector<4x658xf32>
    %c15_i32 = arith.constant 15 : i32
    %164 = vector.broadcast %c15_i32 : i32 to vector<1x658xi32>
    %165 = arith.shrsi %12, %164 : vector<1x658xi32>
    %c1_i32_70 = arith.constant 1 : i32
    %166 = vector.broadcast %c1_i32_70 : i32 to vector<1x658xi32>
    %167 = arith.andi %165, %166 : vector<1x658xi32>
    %168 = arith.sitofp %167 : vector<1x658xi32> to vector<1x658xf32>
    %169 = vector.broadcast %168 : vector<1x658xf32> to vector<4x658xf32>
    %170 = arith.mulf %163, %169 : vector<4x658xf32>
    %171 = arith.truncf %170 : vector<4x658xf32> to vector<4x658xbf16>
    %c60 = arith.constant 60 : index
    %c0_71 = arith.constant 0 : index
    %172 = vector.load %arg14[%c60, %c0_71] : memref<108x768xbf16, #tpu.memory_space<vmem>>, vector<4x658xbf16>
    tpu.vector_store %arg14[%c60, %c0_71], %171 {strides = array<i32>} : memref<108x768xbf16, #tpu.memory_space<vmem>>, vector<4x658xbf16>,
    %c0_72 = arith.constant 0 : index
    %c191 = arith.constant 191 : index
    %173 = vector.load %arg12[%c0_72, %c191] : memref<4x1024xf32, #tpu.memory_space<vmem>>, vector<4x658xf32>
    %c16_i32 = arith.constant 16 : i32
    %174 = vector.broadcast %c16_i32 : i32 to vector<1x658xi32>
    %175 = arith.shrsi %12, %174 : vector<1x658xi32>
    %c1_i32_73 = arith.constant 1 : i32
    %176 = vector.broadcast %c1_i32_73 : i32 to vector<1x658xi32>
    %177 = arith.andi %175, %176 : vector<1x658xi32>
    %178 = arith.sitofp %177 : vector<1x658xi32> to vector<1x658xf32>
    %179 = vector.broadcast %178 : vector<1x658xf32> to vector<4x658xf32>
    %180 = arith.mulf %173, %179 : vector<4x658xf32>
    %181 = arith.truncf %180 : vector<4x658xf32> to vector<4x658xbf16>
    %c64 = arith.constant 64 : index
    %c0_74 = arith.constant 0 : index
    %182 = vector.load %arg14[%c64, %c0_74] : memref<108x768xbf16, #tpu.memory_space<vmem>>, vector<4x658xbf16>
    tpu.vector_store %arg14[%c64, %c0_74], %181 {strides = array<i32>} : memref<108x768xbf16, #tpu.memory_space<vmem>>, vector<4x658xbf16>,
    %c0_75 = arith.constant 0 : index
    %c192 = arith.constant 192 : index
    %183 = vector.load %arg12[%c0_75, %c192] : memref<4x1024xf32, #tpu.memory_space<vmem>>, vector<4x658xf32>
    %c17_i32 = arith.constant 17 : i32
    %184 = vector.broadcast %c17_i32 : i32 to vector<1x658xi32>
    %185 = arith.shrsi %12, %184 : vector<1x658xi32>
    %c1_i32_76 = arith.constant 1 : i32
    %186 = vector.broadcast %c1_i32_76 : i32 to vector<1x658xi32>
    %187 = arith.andi %185, %186 : vector<1x658xi32>
    %188 = arith.sitofp %187 : vector<1x658xi32> to vector<1x658xf32>
    %189 = vector.broadcast %188 : vector<1x658xf32> to vector<4x658xf32>
    %190 = arith.mulf %183, %189 : vector<4x658xf32>
    %191 = arith.truncf %190 : vector<4x658xf32> to vector<4x658xbf16>
    %c68 = arith.constant 68 : index
    %c0_77 = arith.constant 0 : index
    %192 = vector.load %arg14[%c68, %c0_77] : memref<108x768xbf16, #tpu.memory_space<vmem>>, vector<4x658xbf16>
    tpu.vector_store %arg14[%c68, %c0_77], %191 {strides = array<i32>} : memref<108x768xbf16, #tpu.memory_space<vmem>>, vector<4x658xbf16>,
    %c0_78 = arith.constant 0 : index
    %c238 = arith.constant 238 : index
    %193 = vector.load %arg12[%c0_78, %c238] : memref<4x1024xf32, #tpu.memory_space<vmem>>, vector<4x658xf32>
    %c18_i32 = arith.constant 18 : i32
    %194 = vector.broadcast %c18_i32 : i32 to vector<1x658xi32>
    %195 = arith.shrsi %12, %194 : vector<1x658xi32>
    %c1_i32_79 = arith.constant 1 : i32
    %196 = vector.broadcast %c1_i32_79 : i32 to vector<1x658xi32>
    %197 = arith.andi %195, %196 : vector<1x658xi32>
    %198 = arith.sitofp %197 : vector<1x658xi32> to vector<1x658xf32>
    %199 = vector.broadcast %198 : vector<1x658xf32> to vector<4x658xf32>
    %200 = arith.mulf %193, %199 : vector<4x658xf32>
    %201 = arith.truncf %200 : vector<4x658xf32> to vector<4x658xbf16>
    %c72 = arith.constant 72 : index
    %c0_80 = arith.constant 0 : index
    %202 = vector.load %arg14[%c72, %c0_80] : memref<108x768xbf16, #tpu.memory_space<vmem>>, vector<4x658xbf16>
    tpu.vector_store %arg14[%c72, %c0_80], %201 {strides = array<i32>} : memref<108x768xbf16, #tpu.memory_space<vmem>>, vector<4x658xbf16>,
    %c0_81 = arith.constant 0 : index
    %c239 = arith.constant 239 : index
    %203 = vector.load %arg12[%c0_81, %c239] : memref<4x1024xf32, #tpu.memory_space<vmem>>, vector<4x658xf32>
    %c19_i32 = arith.constant 19 : i32
    %204 = vector.broadcast %c19_i32 : i32 to vector<1x658xi32>
    %205 = arith.shrsi %12, %204 : vector<1x658xi32>
    %c1_i32_82 = arith.constant 1 : i32
    %206 = vector.broadcast %c1_i32_82 : i32 to vector<1x658xi32>
    %207 = arith.andi %205, %206 : vector<1x658xi32>
    %208 = arith.sitofp %207 : vector<1x658xi32> to vector<1x658xf32>
    %209 = vector.broadcast %208 : vector<1x658xf32> to vector<4x658xf32>
    %210 = arith.mulf %203, %209 : vector<4x658xf32>
    %211 = arith.truncf %210 : vector<4x658xf32> to vector<4x658xbf16>
    %c76 = arith.constant 76 : index
    %c0_83 = arith.constant 0 : index
    %212 = vector.load %arg14[%c76, %c0_83] : memref<108x768xbf16, #tpu.memory_space<vmem>>, vector<4x658xbf16>
    tpu.vector_store %arg14[%c76, %c0_83], %211 {strides = array<i32>} : memref<108x768xbf16, #tpu.memory_space<vmem>>, vector<4x658xbf16>,
    %c0_84 = arith.constant 0 : index
    %c240 = arith.constant 240 : index
    %213 = vector.load %arg12[%c0_84, %c240] : memref<4x1024xf32, #tpu.memory_space<vmem>>, vector<4x658xf32>
    %c20_i32 = arith.constant 20 : i32
    %214 = vector.broadcast %c20_i32 : i32 to vector<1x658xi32>
    %215 = arith.shrsi %12, %214 : vector<1x658xi32>
    %c1_i32_85 = arith.constant 1 : i32
    %216 = vector.broadcast %c1_i32_85 : i32 to vector<1x658xi32>
    %217 = arith.andi %215, %216 : vector<1x658xi32>
    %218 = arith.sitofp %217 : vector<1x658xi32> to vector<1x658xf32>
    %219 = vector.broadcast %218 : vector<1x658xf32> to vector<4x658xf32>
    %220 = arith.mulf %213, %219 : vector<4x658xf32>
    %221 = arith.truncf %220 : vector<4x658xf32> to vector<4x658xbf16>
    %c80 = arith.constant 80 : index
    %c0_86 = arith.constant 0 : index
    %222 = vector.load %arg14[%c80, %c0_86] : memref<108x768xbf16, #tpu.memory_space<vmem>>, vector<4x658xbf16>
    tpu.vector_store %arg14[%c80, %c0_86], %221 {strides = array<i32>} : memref<108x768xbf16, #tpu.memory_space<vmem>>, vector<4x658xbf16>,
    %c0_87 = arith.constant 0 : index
    %c246 = arith.constant 246 : index
    %223 = vector.load %arg12[%c0_87, %c246] : memref<4x1024xf32, #tpu.memory_space<vmem>>, vector<4x658xf32>
    %c21_i32 = arith.constant 21 : i32
    %224 = vector.broadcast %c21_i32 : i32 to vector<1x658xi32>
    %225 = arith.shrsi %12, %224 : vector<1x658xi32>
    %c1_i32_88 = arith.constant 1 : i32
    %226 = vector.broadcast %c1_i32_88 : i32 to vector<1x658xi32>
    %227 = arith.andi %225, %226 : vector<1x658xi32>
    %228 = arith.sitofp %227 : vector<1x658xi32> to vector<1x658xf32>
    %229 = vector.broadcast %228 : vector<1x658xf32> to vector<4x658xf32>
    %230 = arith.mulf %223, %229 : vector<4x658xf32>
    %231 = arith.truncf %230 : vector<4x658xf32> to vector<4x658xbf16>
    %c84 = arith.constant 84 : index
    %c0_89 = arith.constant 0 : index
    %232 = vector.load %arg14[%c84, %c0_89] : memref<108x768xbf16, #tpu.memory_space<vmem>>, vector<4x658xbf16>
    tpu.vector_store %arg14[%c84, %c0_89], %231 {strides = array<i32>} : memref<108x768xbf16, #tpu.memory_space<vmem>>, vector<4x658xbf16>,
    %c0_90 = arith.constant 0 : index
    %c247 = arith.constant 247 : index
    %233 = vector.load %arg12[%c0_90, %c247] : memref<4x1024xf32, #tpu.memory_space<vmem>>, vector<4x658xf32>
    %c22_i32 = arith.constant 22 : i32
    %234 = vector.broadcast %c22_i32 : i32 to vector<1x658xi32>
    %235 = arith.shrsi %12, %234 : vector<1x658xi32>
    %c1_i32_91 = arith.constant 1 : i32
    %236 = vector.broadcast %c1_i32_91 : i32 to vector<1x658xi32>
    %237 = arith.andi %235, %236 : vector<1x658xi32>
    %238 = arith.sitofp %237 : vector<1x658xi32> to vector<1x658xf32>
    %239 = vector.broadcast %238 : vector<1x658xf32> to vector<4x658xf32>
    %240 = arith.mulf %233, %239 : vector<4x658xf32>
    %241 = arith.truncf %240 : vector<4x658xf32> to vector<4x658xbf16>
    %c88 = arith.constant 88 : index
    %c0_92 = arith.constant 0 : index
    %242 = vector.load %arg14[%c88, %c0_92] : memref<108x768xbf16, #tpu.memory_space<vmem>>, vector<4x658xbf16>
    tpu.vector_store %arg14[%c88, %c0_92], %241 {strides = array<i32>} : memref<108x768xbf16, #tpu.memory_space<vmem>>, vector<4x658xbf16>,
    %c0_93 = arith.constant 0 : index
    %c248 = arith.constant 248 : index
    %243 = vector.load %arg12[%c0_93, %c248] : memref<4x1024xf32, #tpu.memory_space<vmem>>, vector<4x658xf32>
    %c23_i32 = arith.constant 23 : i32
    %244 = vector.broadcast %c23_i32 : i32 to vector<1x658xi32>
    %245 = arith.shrsi %12, %244 : vector<1x658xi32>
    %c1_i32_94 = arith.constant 1 : i32
    %246 = vector.broadcast %c1_i32_94 : i32 to vector<1x658xi32>
    %247 = arith.andi %245, %246 : vector<1x658xi32>
    %248 = arith.sitofp %247 : vector<1x658xi32> to vector<1x658xf32>
    %249 = vector.broadcast %248 : vector<1x658xf32> to vector<4x658xf32>
    %250 = arith.mulf %243, %249 : vector<4x658xf32>
    %251 = arith.truncf %250 : vector<4x658xf32> to vector<4x658xbf16>
    %c92 = arith.constant 92 : index
    %c0_95 = arith.constant 0 : index
    %252 = vector.load %arg14[%c92, %c0_95] : memref<108x768xbf16, #tpu.memory_space<vmem>>, vector<4x658xbf16>
    tpu.vector_store %arg14[%c92, %c0_95], %251 {strides = array<i32>} : memref<108x768xbf16, #tpu.memory_space<vmem>>, vector<4x658xbf16>,
    %c0_96 = arith.constant 0 : index
    %c254 = arith.constant 254 : index
    %253 = vector.load %arg12[%c0_96, %c254] : memref<4x1024xf32, #tpu.memory_space<vmem>>, vector<4x658xf32>
    %c24_i32 = arith.constant 24 : i32
    %254 = vector.broadcast %c24_i32 : i32 to vector<1x658xi32>
    %255 = arith.shrsi %12, %254 : vector<1x658xi32>
    %c1_i32_97 = arith.constant 1 : i32
    %256 = vector.broadcast %c1_i32_97 : i32 to vector<1x658xi32>
    %257 = arith.andi %255, %256 : vector<1x658xi32>
    %258 = arith.sitofp %257 : vector<1x658xi32> to vector<1x658xf32>
    %259 = vector.broadcast %258 : vector<1x658xf32> to vector<4x658xf32>
    %260 = arith.mulf %253, %259 : vector<4x658xf32>
    %261 = arith.truncf %260 : vector<4x658xf32> to vector<4x658xbf16>
    %c96 = arith.constant 96 : index
    %c0_98 = arith.constant 0 : index
    %262 = vector.load %arg14[%c96, %c0_98] : memref<108x768xbf16, #tpu.memory_space<vmem>>, vector<4x658xbf16>
    tpu.vector_store %arg14[%c96, %c0_98], %261 {strides = array<i32>} : memref<108x768xbf16, #tpu.memory_space<vmem>>, vector<4x658xbf16>,
    %c0_99 = arith.constant 0 : index
    %c255 = arith.constant 255 : index
    %263 = vector.load %arg12[%c0_99, %c255] : memref<4x1024xf32, #tpu.memory_space<vmem>>, vector<4x658xf32>
    %c25_i32 = arith.constant 25 : i32
    %264 = vector.broadcast %c25_i32 : i32 to vector<1x658xi32>
    %265 = arith.shrsi %12, %264 : vector<1x658xi32>
    %c1_i32_100 = arith.constant 1 : i32
    %266 = vector.broadcast %c1_i32_100 : i32 to vector<1x658xi32>
    %267 = arith.andi %265, %266 : vector<1x658xi32>
    %268 = arith.sitofp %267 : vector<1x658xi32> to vector<1x658xf32>
    %269 = vector.broadcast %268 : vector<1x658xf32> to vector<4x658xf32>
    %270 = arith.mulf %263, %269 : vector<4x658xf32>
    %271 = arith.truncf %270 : vector<4x658xf32> to vector<4x658xbf16>
    %c100 = arith.constant 100 : index
    %c0_101 = arith.constant 0 : index
    %272 = vector.load %arg14[%c100, %c0_101] : memref<108x768xbf16, #tpu.memory_space<vmem>>, vector<4x658xbf16>
    tpu.vector_store %arg14[%c100, %c0_101], %271 {strides = array<i32>} : memref<108x768xbf16, #tpu.memory_space<vmem>>, vector<4x658xbf16>,
    %c0_102 = arith.constant 0 : index
    %c256_103 = arith.constant 256 : index
    %273 = vector.load %arg12[%c0_102, %c256_103] : memref<4x1024xf32, #tpu.memory_space<vmem>>, vector<4x658xf32>
    %c26_i32 = arith.constant 26 : i32
    %274 = vector.broadcast %c26_i32 : i32 to vector<1x658xi32>
    %275 = arith.shrsi %12, %274 : vector<1x658xi32>
    %c1_i32_104 = arith.constant 1 : i32
    %276 = vector.broadcast %c1_i32_104 : i32 to vector<1x658xi32>
    %277 = arith.andi %275, %276 : vector<1x658xi32>
    %278 = arith.sitofp %277 : vector<1x658xi32> to vector<1x658xf32>
    %279 = vector.broadcast %278 : vector<1x658xf32> to vector<4x658xf32>
    %280 = arith.mulf %273, %279 : vector<4x658xf32>
    %281 = arith.truncf %280 : vector<4x658xf32> to vector<4x658xbf16>
    %c104 = arith.constant 104 : index
    %c0_105 = arith.constant 0 : index
    %282 = vector.load %arg14[%c104, %c0_105] : memref<108x768xbf16, #tpu.memory_space<vmem>>, vector<4x658xbf16>
    tpu.vector_store %arg14[%c104, %c0_105], %281 {strides = array<i32>} : memref<108x768xbf16, #tpu.memory_space<vmem>>, vector<4x658xbf16>,
    %c0_106 = arith.constant 0 : index
    %c0_107 = arith.constant 0 : index
    %283 = vector.load %arg7[%c0_106, %c0_107] : memref<2x108xbf16, #tpu.memory_space<vmem>>, vector<2x108xbf16>
    %c0_108 = arith.constant 0 : index
    %c0_109 = arith.constant 0 : index
    %284 = vector.load %arg14[%c0_108, %c0_109] : memref<108x768xbf16, #tpu.memory_space<vmem>>, vector<108x658xbf16>
    %cst = arith.constant dense<0.000000e+00> : vector<2x658xf32>
    %285 = tpu.matmul %283, %284, %cst {dimension_numbers = #tpu.dot_dimension_numbers<[1], [0], [0], [1], [0, 0, 1, 1], [], []>} : vector<2x108xbf16>, vector<108x658xbf16>, vector<2x658xf32> -> vector<2x658xf32>
    %c0_110 = arith.constant 0 : index
    %c0_111 = arith.constant 0 : index
    %286 = vector.load %arg8[%c0_110, %c0_111] : memref<2x1xf32, #tpu.memory_space<vmem>>, vector<2x1xf32>
    %287 = vector.broadcast %286 : vector<2x1xf32> to vector<2x658xf32>
    %288 = arith.addf %285, %287 : vector<2x658xf32>
    %cst_112 = arith.constant 0.000000e+00 : f32
    %289 = vector.broadcast %cst_112 : f32 to vector<2x658xf32>
    %290 = arith.maximumf %288, %289 : vector<2x658xf32>
    %c0_113 = arith.constant 0 : index
    %c0_114 = arith.constant 0 : index
    %291 = vector.load %arg15[%c0_113, %c0_114] : memref<2x768xf32, #tpu.memory_space<vmem>>, vector<2x658xf32>
    tpu.vector_store %arg15[%c0_113, %c0_114], %290 {strides = array<i32>} : memref<2x768xf32, #tpu.memory_space<vmem>>, vector<2x658xf32>,
    %c0_115 = arith.constant 0 : index
    %c256_116 = arith.constant 256 : index
    %292 = vector.load %arg13[%c0_115, %c256_116] : memref<1x1024xi32, #tpu.memory_space<vmem>>, vector<1x512xi32>
    %c0_117 = arith.constant 0 : index
    %c0_118 = arith.constant 0 : index
    %293 = vector.load %arg15[%c0_117, %c0_118] : memref<2x768xf32, #tpu.memory_space<vmem>>, vector<2x512xf32>
    %c0_i32_119 = arith.constant 0 : i32
    %294 = vector.broadcast %c0_i32_119 : i32 to vector<1x512xi32>
    %295 = arith.shrsi %292, %294 : vector<1x512xi32>
    %c1_i32_120 = arith.constant 1 : i32
    %296 = vector.broadcast %c1_i32_120 : i32 to vector<1x512xi32>
    %297 = arith.andi %295, %296 : vector<1x512xi32>
    %298 = arith.sitofp %297 : vector<1x512xi32> to vector<1x512xf32>
    %299 = vector.broadcast %298 : vector<1x512xf32> to vector<2x512xf32>
    %300 = arith.mulf %293, %299 : vector<2x512xf32>
    %301 = arith.truncf %300 : vector<2x512xf32> to vector<2x512xbf16>
    %c0_121 = arith.constant 0 : index
    %c0_122 = arith.constant 0 : index
    %302 = vector.load %arg14[%c0_121, %c0_122] : memref<108x768xbf16, #tpu.memory_space<vmem>>, vector<2x512xbf16>
    tpu.vector_store %arg14[%c0_121, %c0_122], %301 {strides = array<i32>} : memref<108x768xbf16, #tpu.memory_space<vmem>>, vector<2x512xbf16>,
    %c0_123 = arith.constant 0 : index
    %c1 = arith.constant 1 : index
    %303 = vector.load %arg15[%c0_123, %c1] : memref<2x768xf32, #tpu.memory_space<vmem>>, vector<2x512xf32>
    %c1_i32_124 = arith.constant 1 : i32
    %304 = vector.broadcast %c1_i32_124 : i32 to vector<1x512xi32>
    %305 = arith.shrsi %292, %304 : vector<1x512xi32>
    %c1_i32_125 = arith.constant 1 : i32
    %306 = vector.broadcast %c1_i32_125 : i32 to vector<1x512xi32>
    %307 = arith.andi %305, %306 : vector<1x512xi32>
    %308 = arith.sitofp %307 : vector<1x512xi32> to vector<1x512xf32>
    %309 = vector.broadcast %308 : vector<1x512xf32> to vector<2x512xf32>
    %310 = arith.mulf %303, %309 : vector<2x512xf32>
    %311 = arith.truncf %310 : vector<2x512xf32> to vector<2x512xbf16>
    %c2 = arith.constant 2 : index
    %c0_126 = arith.constant 0 : index
    %312 = vector.load %arg14[%c2, %c0_126] : memref<108x768xbf16, #tpu.memory_space<vmem>>, vector<2x512xbf16>
    tpu.vector_store %arg14[%c2, %c0_126], %311 {strides = array<i32>} : memref<108x768xbf16, #tpu.memory_space<vmem>>, vector<2x512xbf16>,
    %c0_127 = arith.constant 0 : index
    %c2_128 = arith.constant 2 : index
    %313 = vector.load %arg15[%c0_127, %c2_128] : memref<2x768xf32, #tpu.memory_space<vmem>>, vector<2x512xf32>
    %c2_i32_129 = arith.constant 2 : i32
    %314 = vector.broadcast %c2_i32_129 : i32 to vector<1x512xi32>
    %315 = arith.shrsi %292, %314 : vector<1x512xi32>
    %c1_i32_130 = arith.constant 1 : i32
    %316 = vector.broadcast %c1_i32_130 : i32 to vector<1x512xi32>
    %317 = arith.andi %315, %316 : vector<1x512xi32>
    %318 = arith.sitofp %317 : vector<1x512xi32> to vector<1x512xf32>
    %319 = vector.broadcast %318 : vector<1x512xf32> to vector<2x512xf32>
    %320 = arith.mulf %313, %319 : vector<2x512xf32>
    %321 = arith.truncf %320 : vector<2x512xf32> to vector<2x512xbf16>
    %c4_131 = arith.constant 4 : index
    %c0_132 = arith.constant 0 : index
    %322 = vector.load %arg14[%c4_131, %c0_132] : memref<108x768xbf16, #tpu.memory_space<vmem>>, vector<2x512xbf16>
    tpu.vector_store %arg14[%c4_131, %c0_132], %321 {strides = array<i32>} : memref<108x768xbf16, #tpu.memory_space<vmem>>, vector<2x512xbf16>,
    %c0_133 = arith.constant 0 : index
    %c8_134 = arith.constant 8 : index
    %323 = vector.load %arg15[%c0_133, %c8_134] : memref<2x768xf32, #tpu.memory_space<vmem>>, vector<2x512xf32>
    %c3_i32_135 = arith.constant 3 : i32
    %324 = vector.broadcast %c3_i32_135 : i32 to vector<1x512xi32>
    %325 = arith.shrsi %292, %324 : vector<1x512xi32>
    %c1_i32_136 = arith.constant 1 : i32
    %326 = vector.broadcast %c1_i32_136 : i32 to vector<1x512xi32>
    %327 = arith.andi %325, %326 : vector<1x512xi32>
    %328 = arith.sitofp %327 : vector<1x512xi32> to vector<1x512xf32>
    %329 = vector.broadcast %328 : vector<1x512xf32> to vector<2x512xf32>
    %330 = arith.mulf %323, %329 : vector<2x512xf32>
    %331 = arith.truncf %330 : vector<2x512xf32> to vector<2x512xbf16>
    %c6 = arith.constant 6 : index
    %c0_137 = arith.constant 0 : index
    %332 = vector.load %arg14[%c6, %c0_137] : memref<108x768xbf16, #tpu.memory_space<vmem>>, vector<2x512xbf16>
    tpu.vector_store %arg14[%c6, %c0_137], %331 {strides = array<i32>} : memref<108x768xbf16, #tpu.memory_space<vmem>>, vector<2x512xbf16>,
    %c0_138 = arith.constant 0 : index
    %c9 = arith.constant 9 : index
    %333 = vector.load %arg15[%c0_138, %c9] : memref<2x768xf32, #tpu.memory_space<vmem>>, vector<2x512xf32>
    %c4_i32_139 = arith.constant 4 : i32
    %334 = vector.broadcast %c4_i32_139 : i32 to vector<1x512xi32>
    %335 = arith.shrsi %292, %334 : vector<1x512xi32>
    %c1_i32_140 = arith.constant 1 : i32
    %336 = vector.broadcast %c1_i32_140 : i32 to vector<1x512xi32>
    %337 = arith.andi %335, %336 : vector<1x512xi32>
    %338 = arith.sitofp %337 : vector<1x512xi32> to vector<1x512xf32>
    %339 = vector.broadcast %338 : vector<1x512xf32> to vector<2x512xf32>
    %340 = arith.mulf %333, %339 : vector<2x512xf32>
    %341 = arith.truncf %340 : vector<2x512xf32> to vector<2x512xbf16>
    %c8_141 = arith.constant 8 : index
    %c0_142 = arith.constant 0 : index
    %342 = vector.load %arg14[%c8_141, %c0_142] : memref<108x768xbf16, #tpu.memory_space<vmem>>, vector<2x512xbf16>
    tpu.vector_store %arg14[%c8_141, %c0_142], %341 {strides = array<i32>} : memref<108x768xbf16, #tpu.memory_space<vmem>>, vector<2x512xbf16>,
    %c0_143 = arith.constant 0 : index
    %c10 = arith.constant 10 : index
    %343 = vector.load %arg15[%c0_143, %c10] : memref<2x768xf32, #tpu.memory_space<vmem>>, vector<2x512xf32>
    %c5_i32_144 = arith.constant 5 : i32
    %344 = vector.broadcast %c5_i32_144 : i32 to vector<1x512xi32>
    %345 = arith.shrsi %292, %344 : vector<1x512xi32>
    %c1_i32_145 = arith.constant 1 : i32
    %346 = vector.broadcast %c1_i32_145 : i32 to vector<1x512xi32>
    %347 = arith.andi %345, %346 : vector<1x512xi32>
    %348 = arith.sitofp %347 : vector<1x512xi32> to vector<1x512xf32>
    %349 = vector.broadcast %348 : vector<1x512xf32> to vector<2x512xf32>
    %350 = arith.mulf %343, %349 : vector<2x512xf32>
    %351 = arith.truncf %350 : vector<2x512xf32> to vector<2x512xbf16>
    %c10_146 = arith.constant 10 : index
    %c0_147 = arith.constant 0 : index
    %352 = vector.load %arg14[%c10_146, %c0_147] : memref<108x768xbf16, #tpu.memory_space<vmem>>, vector<2x512xbf16>
    tpu.vector_store %arg14[%c10_146, %c0_147], %351 {strides = array<i32>} : memref<108x768xbf16, #tpu.memory_space<vmem>>, vector<2x512xbf16>,
    %c0_148 = arith.constant 0 : index
    %c16_149 = arith.constant 16 : index
    %353 = vector.load %arg15[%c0_148, %c16_149] : memref<2x768xf32, #tpu.memory_space<vmem>>, vector<2x512xf32>
    %c6_i32_150 = arith.constant 6 : i32
    %354 = vector.broadcast %c6_i32_150 : i32 to vector<1x512xi32>
    %355 = arith.shrsi %292, %354 : vector<1x512xi32>
    %c1_i32_151 = arith.constant 1 : i32
    %356 = vector.broadcast %c1_i32_151 : i32 to vector<1x512xi32>
    %357 = arith.andi %355, %356 : vector<1x512xi32>
    %358 = arith.sitofp %357 : vector<1x512xi32> to vector<1x512xf32>
    %359 = vector.broadcast %358 : vector<1x512xf32> to vector<2x512xf32>
    %360 = arith.mulf %353, %359 : vector<2x512xf32>
    %361 = arith.truncf %360 : vector<2x512xf32> to vector<2x512xbf16>
    %c12_152 = arith.constant 12 : index
    %c0_153 = arith.constant 0 : index
    %362 = vector.load %arg14[%c12_152, %c0_153] : memref<108x768xbf16, #tpu.memory_space<vmem>>, vector<2x512xbf16>
    tpu.vector_store %arg14[%c12_152, %c0_153], %361 {strides = array<i32>} : memref<108x768xbf16, #tpu.memory_space<vmem>>, vector<2x512xbf16>,
    %c0_154 = arith.constant 0 : index
    %c17 = arith.constant 17 : index
    %363 = vector.load %arg15[%c0_154, %c17] : memref<2x768xf32, #tpu.memory_space<vmem>>, vector<2x512xf32>
    %c7_i32_155 = arith.constant 7 : i32
    %364 = vector.broadcast %c7_i32_155 : i32 to vector<1x512xi32>
    %365 = arith.shrsi %292, %364 : vector<1x512xi32>
    %c1_i32_156 = arith.constant 1 : i32
    %366 = vector.broadcast %c1_i32_156 : i32 to vector<1x512xi32>
    %367 = arith.andi %365, %366 : vector<1x512xi32>
    %368 = arith.sitofp %367 : vector<1x512xi32> to vector<1x512xf32>
    %369 = vector.broadcast %368 : vector<1x512xf32> to vector<2x512xf32>
    %370 = arith.mulf %363, %369 : vector<2x512xf32>
    %371 = arith.truncf %370 : vector<2x512xf32> to vector<2x512xbf16>
    %c14 = arith.constant 14 : index
    %c0_157 = arith.constant 0 : index
    %372 = vector.load %arg14[%c14, %c0_157] : memref<108x768xbf16, #tpu.memory_space<vmem>>, vector<2x512xbf16>
    tpu.vector_store %arg14[%c14, %c0_157], %371 {strides = array<i32>} : memref<108x768xbf16, #tpu.memory_space<vmem>>, vector<2x512xbf16>,
    %c0_158 = arith.constant 0 : index
    %c18 = arith.constant 18 : index
    %373 = vector.load %arg15[%c0_158, %c18] : memref<2x768xf32, #tpu.memory_space<vmem>>, vector<2x512xf32>
    %c8_i32_159 = arith.constant 8 : i32
    %374 = vector.broadcast %c8_i32_159 : i32 to vector<1x512xi32>
    %375 = arith.shrsi %292, %374 : vector<1x512xi32>
    %c1_i32_160 = arith.constant 1 : i32
    %376 = vector.broadcast %c1_i32_160 : i32 to vector<1x512xi32>
    %377 = arith.andi %375, %376 : vector<1x512xi32>
    %378 = arith.sitofp %377 : vector<1x512xi32> to vector<1x512xf32>
    %379 = vector.broadcast %378 : vector<1x512xf32> to vector<2x512xf32>
    %380 = arith.mulf %373, %379 : vector<2x512xf32>
    %381 = arith.truncf %380 : vector<2x512xf32> to vector<2x512xbf16>
    %c16_161 = arith.constant 16 : index
    %c0_162 = arith.constant 0 : index
    %382 = vector.load %arg14[%c16_161, %c0_162] : memref<108x768xbf16, #tpu.memory_space<vmem>>, vector<2x512xbf16>
    tpu.vector_store %arg14[%c16_161, %c0_162], %381 {strides = array<i32>} : memref<108x768xbf16, #tpu.memory_space<vmem>>, vector<2x512xbf16>,
    %c0_163 = arith.constant 0 : index
    %c64_164 = arith.constant 64 : index
    %383 = vector.load %arg15[%c0_163, %c64_164] : memref<2x768xf32, #tpu.memory_space<vmem>>, vector<2x512xf32>
    %c9_i32_165 = arith.constant 9 : i32
    %384 = vector.broadcast %c9_i32_165 : i32 to vector<1x512xi32>
    %385 = arith.shrsi %292, %384 : vector<1x512xi32>
    %c1_i32_166 = arith.constant 1 : i32
    %386 = vector.broadcast %c1_i32_166 : i32 to vector<1x512xi32>
    %387 = arith.andi %385, %386 : vector<1x512xi32>
    %388 = arith.sitofp %387 : vector<1x512xi32> to vector<1x512xf32>
    %389 = vector.broadcast %388 : vector<1x512xf32> to vector<2x512xf32>
    %390 = arith.mulf %383, %389 : vector<2x512xf32>
    %391 = arith.truncf %390 : vector<2x512xf32> to vector<2x512xbf16>
    %c18_167 = arith.constant 18 : index
    %c0_168 = arith.constant 0 : index
    %392 = vector.load %arg14[%c18_167, %c0_168] : memref<108x768xbf16, #tpu.memory_space<vmem>>, vector<2x512xbf16>
    tpu.vector_store %arg14[%c18_167, %c0_168], %391 {strides = array<i32>} : memref<108x768xbf16, #tpu.memory_space<vmem>>, vector<2x512xbf16>,
    %c0_169 = arith.constant 0 : index
    %c65 = arith.constant 65 : index
    %393 = vector.load %arg15[%c0_169, %c65] : memref<2x768xf32, #tpu.memory_space<vmem>>, vector<2x512xf32>
    %c10_i32_170 = arith.constant 10 : i32
    %394 = vector.broadcast %c10_i32_170 : i32 to vector<1x512xi32>
    %395 = arith.shrsi %292, %394 : vector<1x512xi32>
    %c1_i32_171 = arith.constant 1 : i32
    %396 = vector.broadcast %c1_i32_171 : i32 to vector<1x512xi32>
    %397 = arith.andi %395, %396 : vector<1x512xi32>
    %398 = arith.sitofp %397 : vector<1x512xi32> to vector<1x512xf32>
    %399 = vector.broadcast %398 : vector<1x512xf32> to vector<2x512xf32>
    %400 = arith.mulf %393, %399 : vector<2x512xf32>
    %401 = arith.truncf %400 : vector<2x512xf32> to vector<2x512xbf16>
    %c20_172 = arith.constant 20 : index
    %c0_173 = arith.constant 0 : index
    %402 = vector.load %arg14[%c20_172, %c0_173] : memref<108x768xbf16, #tpu.memory_space<vmem>>, vector<2x512xbf16>
    tpu.vector_store %arg14[%c20_172, %c0_173], %401 {strides = array<i32>} : memref<108x768xbf16, #tpu.memory_space<vmem>>, vector<2x512xbf16>,
    %c0_174 = arith.constant 0 : index
    %c66 = arith.constant 66 : index
    %403 = vector.load %arg15[%c0_174, %c66] : memref<2x768xf32, #tpu.memory_space<vmem>>, vector<2x512xf32>
    %c11_i32_175 = arith.constant 11 : i32
    %404 = vector.broadcast %c11_i32_175 : i32 to vector<1x512xi32>
    %405 = arith.shrsi %292, %404 : vector<1x512xi32>
    %c1_i32_176 = arith.constant 1 : i32
    %406 = vector.broadcast %c1_i32_176 : i32 to vector<1x512xi32>
    %407 = arith.andi %405, %406 : vector<1x512xi32>
    %408 = arith.sitofp %407 : vector<1x512xi32> to vector<1x512xf32>
    %409 = vector.broadcast %408 : vector<1x512xf32> to vector<2x512xf32>
    %410 = arith.mulf %403, %409 : vector<2x512xf32>
    %411 = arith.truncf %410 : vector<2x512xf32> to vector<2x512xbf16>
    %c22 = arith.constant 22 : index
    %c0_177 = arith.constant 0 : index
    %412 = vector.load %arg14[%c22, %c0_177] : memref<108x768xbf16, #tpu.memory_space<vmem>>, vector<2x512xbf16>
    tpu.vector_store %arg14[%c22, %c0_177], %411 {strides = array<i32>} : memref<108x768xbf16, #tpu.memory_space<vmem>>, vector<2x512xbf16>,
    %c0_178 = arith.constant 0 : index
    %c72_179 = arith.constant 72 : index
    %413 = vector.load %arg15[%c0_178, %c72_179] : memref<2x768xf32, #tpu.memory_space<vmem>>, vector<2x512xf32>
    %c12_i32_180 = arith.constant 12 : i32
    %414 = vector.broadcast %c12_i32_180 : i32 to vector<1x512xi32>
    %415 = arith.shrsi %292, %414 : vector<1x512xi32>
    %c1_i32_181 = arith.constant 1 : i32
    %416 = vector.broadcast %c1_i32_181 : i32 to vector<1x512xi32>
    %417 = arith.andi %415, %416 : vector<1x512xi32>
    %418 = arith.sitofp %417 : vector<1x512xi32> to vector<1x512xf32>
    %419 = vector.broadcast %418 : vector<1x512xf32> to vector<2x512xf32>
    %420 = arith.mulf %413, %419 : vector<2x512xf32>
    %421 = arith.truncf %420 : vector<2x512xf32> to vector<2x512xbf16>
    %c24_182 = arith.constant 24 : index
    %c0_183 = arith.constant 0 : index
    %422 = vector.load %arg14[%c24_182, %c0_183] : memref<108x768xbf16, #tpu.memory_space<vmem>>, vector<2x512xbf16>
    tpu.vector_store %arg14[%c24_182, %c0_183], %421 {strides = array<i32>} : memref<108x768xbf16, #tpu.memory_space<vmem>>, vector<2x512xbf16>,
    %c0_184 = arith.constant 0 : index
    %c73 = arith.constant 73 : index
    %423 = vector.load %arg15[%c0_184, %c73] : memref<2x768xf32, #tpu.memory_space<vmem>>, vector<2x512xf32>
    %c13_i32_185 = arith.constant 13 : i32
    %424 = vector.broadcast %c13_i32_185 : i32 to vector<1x512xi32>
    %425 = arith.shrsi %292, %424 : vector<1x512xi32>
    %c1_i32_186 = arith.constant 1 : i32
    %426 = vector.broadcast %c1_i32_186 : i32 to vector<1x512xi32>
    %427 = arith.andi %425, %426 : vector<1x512xi32>
    %428 = arith.sitofp %427 : vector<1x512xi32> to vector<1x512xf32>
    %429 = vector.broadcast %428 : vector<1x512xf32> to vector<2x512xf32>
    %430 = arith.mulf %423, %429 : vector<2x512xf32>
    %431 = arith.truncf %430 : vector<2x512xf32> to vector<2x512xbf16>
    %c26 = arith.constant 26 : index
    %c0_187 = arith.constant 0 : index
    %432 = vector.load %arg14[%c26, %c0_187] : memref<108x768xbf16, #tpu.memory_space<vmem>>, vector<2x512xbf16>
    tpu.vector_store %arg14[%c26, %c0_187], %431 {strides = array<i32>} : memref<108x768xbf16, #tpu.memory_space<vmem>>, vector<2x512xbf16>,
    %c0_188 = arith.constant 0 : index
    %c74 = arith.constant 74 : index
    %433 = vector.load %arg15[%c0_188, %c74] : memref<2x768xf32, #tpu.memory_space<vmem>>, vector<2x512xf32>
    %c14_i32_189 = arith.constant 14 : i32
    %434 = vector.broadcast %c14_i32_189 : i32 to vector<1x512xi32>
    %435 = arith.shrsi %292, %434 : vector<1x512xi32>
    %c1_i32_190 = arith.constant 1 : i32
    %436 = vector.broadcast %c1_i32_190 : i32 to vector<1x512xi32>
    %437 = arith.andi %435, %436 : vector<1x512xi32>
    %438 = arith.sitofp %437 : vector<1x512xi32> to vector<1x512xf32>
    %439 = vector.broadcast %438 : vector<1x512xf32> to vector<2x512xf32>
    %440 = arith.mulf %433, %439 : vector<2x512xf32>
    %441 = arith.truncf %440 : vector<2x512xf32> to vector<2x512xbf16>
    %c28_191 = arith.constant 28 : index
    %c0_192 = arith.constant 0 : index
    %442 = vector.load %arg14[%c28_191, %c0_192] : memref<108x768xbf16, #tpu.memory_space<vmem>>, vector<2x512xbf16>
    tpu.vector_store %arg14[%c28_191, %c0_192], %441 {strides = array<i32>} : memref<108x768xbf16, #tpu.memory_space<vmem>>, vector<2x512xbf16>,
    %c0_193 = arith.constant 0 : index
    %c80_194 = arith.constant 80 : index
    %443 = vector.load %arg15[%c0_193, %c80_194] : memref<2x768xf32, #tpu.memory_space<vmem>>, vector<2x512xf32>
    %c15_i32_195 = arith.constant 15 : i32
    %444 = vector.broadcast %c15_i32_195 : i32 to vector<1x512xi32>
    %445 = arith.shrsi %292, %444 : vector<1x512xi32>
    %c1_i32_196 = arith.constant 1 : i32
    %446 = vector.broadcast %c1_i32_196 : i32 to vector<1x512xi32>
    %447 = arith.andi %445, %446 : vector<1x512xi32>
    %448 = arith.sitofp %447 : vector<1x512xi32> to vector<1x512xf32>
    %449 = vector.broadcast %448 : vector<1x512xf32> to vector<2x512xf32>
    %450 = arith.mulf %443, %449 : vector<2x512xf32>
    %451 = arith.truncf %450 : vector<2x512xf32> to vector<2x512xbf16>
    %c30 = arith.constant 30 : index
    %c0_197 = arith.constant 0 : index
    %452 = vector.load %arg14[%c30, %c0_197] : memref<108x768xbf16, #tpu.memory_space<vmem>>, vector<2x512xbf16>
    tpu.vector_store %arg14[%c30, %c0_197], %451 {strides = array<i32>} : memref<108x768xbf16, #tpu.memory_space<vmem>>, vector<2x512xbf16>,
    %c0_198 = arith.constant 0 : index
    %c81 = arith.constant 81 : index
    %453 = vector.load %arg15[%c0_198, %c81] : memref<2x768xf32, #tpu.memory_space<vmem>>, vector<2x512xf32>
    %c16_i32_199 = arith.constant 16 : i32
    %454 = vector.broadcast %c16_i32_199 : i32 to vector<1x512xi32>
    %455 = arith.shrsi %292, %454 : vector<1x512xi32>
    %c1_i32_200 = arith.constant 1 : i32
    %456 = vector.broadcast %c1_i32_200 : i32 to vector<1x512xi32>
    %457 = arith.andi %455, %456 : vector<1x512xi32>
    %458 = arith.sitofp %457 : vector<1x512xi32> to vector<1x512xf32>
    %459 = vector.broadcast %458 : vector<1x512xf32> to vector<2x512xf32>
    %460 = arith.mulf %453, %459 : vector<2x512xf32>
    %461 = arith.truncf %460 : vector<2x512xf32> to vector<2x512xbf16>
    %c32_201 = arith.constant 32 : index
    %c0_202 = arith.constant 0 : index
    %462 = vector.load %arg14[%c32_201, %c0_202] : memref<108x768xbf16, #tpu.memory_space<vmem>>, vector<2x512xbf16>
    tpu.vector_store %arg14[%c32_201, %c0_202], %461 {strides = array<i32>} : memref<108x768xbf16, #tpu.memory_space<vmem>>, vector<2x512xbf16>,
    %c0_203 = arith.constant 0 : index
    %c82 = arith.constant 82 : index
    %463 = vector.load %arg15[%c0_203, %c82] : memref<2x768xf32, #tpu.memory_space<vmem>>, vector<2x512xf32>
    %c17_i32_204 = arith.constant 17 : i32
    %464 = vector.broadcast %c17_i32_204 : i32 to vector<1x512xi32>
    %465 = arith.shrsi %292, %464 : vector<1x512xi32>
    %c1_i32_205 = arith.constant 1 : i32
    %466 = vector.broadcast %c1_i32_205 : i32 to vector<1x512xi32>
    %467 = arith.andi %465, %466 : vector<1x512xi32>
    %468 = arith.sitofp %467 : vector<1x512xi32> to vector<1x512xf32>
    %469 = vector.broadcast %468 : vector<1x512xf32> to vector<2x512xf32>
    %470 = arith.mulf %463, %469 : vector<2x512xf32>
    %471 = arith.truncf %470 : vector<2x512xf32> to vector<2x512xbf16>
    %c34 = arith.constant 34 : index
    %c0_206 = arith.constant 0 : index
    %472 = vector.load %arg14[%c34, %c0_206] : memref<108x768xbf16, #tpu.memory_space<vmem>>, vector<2x512xbf16>
    tpu.vector_store %arg14[%c34, %c0_206], %471 {strides = array<i32>} : memref<108x768xbf16, #tpu.memory_space<vmem>>, vector<2x512xbf16>,
    %c0_207 = arith.constant 0 : index
    %c128_208 = arith.constant 128 : index
    %473 = vector.load %arg15[%c0_207, %c128_208] : memref<2x768xf32, #tpu.memory_space<vmem>>, vector<2x512xf32>
    %c18_i32_209 = arith.constant 18 : i32
    %474 = vector.broadcast %c18_i32_209 : i32 to vector<1x512xi32>
    %475 = arith.shrsi %292, %474 : vector<1x512xi32>
    %c1_i32_210 = arith.constant 1 : i32
    %476 = vector.broadcast %c1_i32_210 : i32 to vector<1x512xi32>
    %477 = arith.andi %475, %476 : vector<1x512xi32>
    %478 = arith.sitofp %477 : vector<1x512xi32> to vector<1x512xf32>
    %479 = vector.broadcast %478 : vector<1x512xf32> to vector<2x512xf32>
    %480 = arith.mulf %473, %479 : vector<2x512xf32>
    %481 = arith.truncf %480 : vector<2x512xf32> to vector<2x512xbf16>
    %c36_211 = arith.constant 36 : index
    %c0_212 = arith.constant 0 : index
    %482 = vector.load %arg14[%c36_211, %c0_212] : memref<108x768xbf16, #tpu.memory_space<vmem>>, vector<2x512xbf16>
    tpu.vector_store %arg14[%c36_211, %c0_212], %481 {strides = array<i32>} : memref<108x768xbf16, #tpu.memory_space<vmem>>, vector<2x512xbf16>,
    %c0_213 = arith.constant 0 : index
    %c129 = arith.constant 129 : index
    %483 = vector.load %arg15[%c0_213, %c129] : memref<2x768xf32, #tpu.memory_space<vmem>>, vector<2x512xf32>
    %c19_i32_214 = arith.constant 19 : i32
    %484 = vector.broadcast %c19_i32_214 : i32 to vector<1x512xi32>
    %485 = arith.shrsi %292, %484 : vector<1x512xi32>
    %c1_i32_215 = arith.constant 1 : i32
    %486 = vector.broadcast %c1_i32_215 : i32 to vector<1x512xi32>
    %487 = arith.andi %485, %486 : vector<1x512xi32>
    %488 = arith.sitofp %487 : vector<1x512xi32> to vector<1x512xf32>
    %489 = vector.broadcast %488 : vector<1x512xf32> to vector<2x512xf32>
    %490 = arith.mulf %483, %489 : vector<2x512xf32>
    %491 = arith.truncf %490 : vector<2x512xf32> to vector<2x512xbf16>
    %c38 = arith.constant 38 : index
    %c0_216 = arith.constant 0 : index
    %492 = vector.load %arg14[%c38, %c0_216] : memref<108x768xbf16, #tpu.memory_space<vmem>>, vector<2x512xbf16>
    tpu.vector_store %arg14[%c38, %c0_216], %491 {strides = array<i32>} : memref<108x768xbf16, #tpu.memory_space<vmem>>, vector<2x512xbf16>,
    %c0_217 = arith.constant 0 : index
    %c130 = arith.constant 130 : index
    %493 = vector.load %arg15[%c0_217, %c130] : memref<2x768xf32, #tpu.memory_space<vmem>>, vector<2x512xf32>
    %c20_i32_218 = arith.constant 20 : i32
    %494 = vector.broadcast %c20_i32_218 : i32 to vector<1x512xi32>
    %495 = arith.shrsi %292, %494 : vector<1x512xi32>
    %c1_i32_219 = arith.constant 1 : i32
    %496 = vector.broadcast %c1_i32_219 : i32 to vector<1x512xi32>
    %497 = arith.andi %495, %496 : vector<1x512xi32>
    %498 = arith.sitofp %497 : vector<1x512xi32> to vector<1x512xf32>
    %499 = vector.broadcast %498 : vector<1x512xf32> to vector<2x512xf32>
    %500 = arith.mulf %493, %499 : vector<2x512xf32>
    %501 = arith.truncf %500 : vector<2x512xf32> to vector<2x512xbf16>
    %c40_220 = arith.constant 40 : index
    %c0_221 = arith.constant 0 : index
    %502 = vector.load %arg14[%c40_220, %c0_221] : memref<108x768xbf16, #tpu.memory_space<vmem>>, vector<2x512xbf16>
    tpu.vector_store %arg14[%c40_220, %c0_221], %501 {strides = array<i32>} : memref<108x768xbf16, #tpu.memory_space<vmem>>, vector<2x512xbf16>,
    %c0_222 = arith.constant 0 : index
    %c136 = arith.constant 136 : index
    %503 = vector.load %arg15[%c0_222, %c136] : memref<2x768xf32, #tpu.memory_space<vmem>>, vector<2x512xf32>
    %c21_i32_223 = arith.constant 21 : i32
    %504 = vector.broadcast %c21_i32_223 : i32 to vector<1x512xi32>
    %505 = arith.shrsi %292, %504 : vector<1x512xi32>
    %c1_i32_224 = arith.constant 1 : i32
    %506 = vector.broadcast %c1_i32_224 : i32 to vector<1x512xi32>
    %507 = arith.andi %505, %506 : vector<1x512xi32>
    %508 = arith.sitofp %507 : vector<1x512xi32> to vector<1x512xf32>
    %509 = vector.broadcast %508 : vector<1x512xf32> to vector<2x512xf32>
    %510 = arith.mulf %503, %509 : vector<2x512xf32>
    %511 = arith.truncf %510 : vector<2x512xf32> to vector<2x512xbf16>
    %c42 = arith.constant 42 : index
    %c0_225 = arith.constant 0 : index
    %512 = vector.load %arg14[%c42, %c0_225] : memref<108x768xbf16, #tpu.memory_space<vmem>>, vector<2x512xbf16>
    tpu.vector_store %arg14[%c42, %c0_225], %511 {strides = array<i32>} : memref<108x768xbf16, #tpu.memory_space<vmem>>, vector<2x512xbf16>,
    %c0_226 = arith.constant 0 : index
    %c137 = arith.constant 137 : index
    %513 = vector.load %arg15[%c0_226, %c137] : memref<2x768xf32, #tpu.memory_space<vmem>>, vector<2x512xf32>
    %c22_i32_227 = arith.constant 22 : i32
    %514 = vector.broadcast %c22_i32_227 : i32 to vector<1x512xi32>
    %515 = arith.shrsi %292, %514 : vector<1x512xi32>
    %c1_i32_228 = arith.constant 1 : i32
    %516 = vector.broadcast %c1_i32_228 : i32 to vector<1x512xi32>
    %517 = arith.andi %515, %516 : vector<1x512xi32>
    %518 = arith.sitofp %517 : vector<1x512xi32> to vector<1x512xf32>
    %519 = vector.broadcast %518 : vector<1x512xf32> to vector<2x512xf32>
    %520 = arith.mulf %513, %519 : vector<2x512xf32>
    %521 = arith.truncf %520 : vector<2x512xf32> to vector<2x512xbf16>
    %c44_229 = arith.constant 44 : index
    %c0_230 = arith.constant 0 : index
    %522 = vector.load %arg14[%c44_229, %c0_230] : memref<108x768xbf16, #tpu.memory_space<vmem>>, vector<2x512xbf16>
    tpu.vector_store %arg14[%c44_229, %c0_230], %521 {strides = array<i32>} : memref<108x768xbf16, #tpu.memory_space<vmem>>, vector<2x512xbf16>,
    %c0_231 = arith.constant 0 : index
    %c138 = arith.constant 138 : index
    %523 = vector.load %arg15[%c0_231, %c138] : memref<2x768xf32, #tpu.memory_space<vmem>>, vector<2x512xf32>
    %c23_i32_232 = arith.constant 23 : i32
    %524 = vector.broadcast %c23_i32_232 : i32 to vector<1x512xi32>
    %525 = arith.shrsi %292, %524 : vector<1x512xi32>
    %c1_i32_233 = arith.constant 1 : i32
    %526 = vector.broadcast %c1_i32_233 : i32 to vector<1x512xi32>
    %527 = arith.andi %525, %526 : vector<1x512xi32>
    %528 = arith.sitofp %527 : vector<1x512xi32> to vector<1x512xf32>
    %529 = vector.broadcast %528 : vector<1x512xf32> to vector<2x512xf32>
    %530 = arith.mulf %523, %529 : vector<2x512xf32>
    %531 = arith.truncf %530 : vector<2x512xf32> to vector<2x512xbf16>
    %c46 = arith.constant 46 : index
    %c0_234 = arith.constant 0 : index
    %532 = vector.load %arg14[%c46, %c0_234] : memref<108x768xbf16, #tpu.memory_space<vmem>>, vector<2x512xbf16>
    tpu.vector_store %arg14[%c46, %c0_234], %531 {strides = array<i32>} : memref<108x768xbf16, #tpu.memory_space<vmem>>, vector<2x512xbf16>,
    %c0_235 = arith.constant 0 : index
    %c144 = arith.constant 144 : index
    %533 = vector.load %arg15[%c0_235, %c144] : memref<2x768xf32, #tpu.memory_space<vmem>>, vector<2x512xf32>
    %c24_i32_236 = arith.constant 24 : i32
    %534 = vector.broadcast %c24_i32_236 : i32 to vector<1x512xi32>
    %535 = arith.shrsi %292, %534 : vector<1x512xi32>
    %c1_i32_237 = arith.constant 1 : i32
    %536 = vector.broadcast %c1_i32_237 : i32 to vector<1x512xi32>
    %537 = arith.andi %535, %536 : vector<1x512xi32>
    %538 = arith.sitofp %537 : vector<1x512xi32> to vector<1x512xf32>
    %539 = vector.broadcast %538 : vector<1x512xf32> to vector<2x512xf32>
    %540 = arith.mulf %533, %539 : vector<2x512xf32>
    %541 = arith.truncf %540 : vector<2x512xf32> to vector<2x512xbf16>
    %c48_238 = arith.constant 48 : index
    %c0_239 = arith.constant 0 : index
    %542 = vector.load %arg14[%c48_238, %c0_239] : memref<108x768xbf16, #tpu.memory_space<vmem>>, vector<2x512xbf16>
    tpu.vector_store %arg14[%c48_238, %c0_239], %541 {strides = array<i32>} : memref<108x768xbf16, #tpu.memory_space<vmem>>, vector<2x512xbf16>,
    %c0_240 = arith.constant 0 : index
    %c145 = arith.constant 145 : index
    %543 = vector.load %arg15[%c0_240, %c145] : memref<2x768xf32, #tpu.memory_space<vmem>>, vector<2x512xf32>
    %c25_i32_241 = arith.constant 25 : i32
    %544 = vector.broadcast %c25_i32_241 : i32 to vector<1x512xi32>
    %545 = arith.shrsi %292, %544 : vector<1x512xi32>
    %c1_i32_242 = arith.constant 1 : i32
    %546 = vector.broadcast %c1_i32_242 : i32 to vector<1x512xi32>
    %547 = arith.andi %545, %546 : vector<1x512xi32>
    %548 = arith.sitofp %547 : vector<1x512xi32> to vector<1x512xf32>
    %549 = vector.broadcast %548 : vector<1x512xf32> to vector<2x512xf32>
    %550 = arith.mulf %543, %549 : vector<2x512xf32>
    %551 = arith.truncf %550 : vector<2x512xf32> to vector<2x512xbf16>
    %c50 = arith.constant 50 : index
    %c0_243 = arith.constant 0 : index
    %552 = vector.load %arg14[%c50, %c0_243] : memref<108x768xbf16, #tpu.memory_space<vmem>>, vector<2x512xbf16>
    tpu.vector_store %arg14[%c50, %c0_243], %551 {strides = array<i32>} : memref<108x768xbf16, #tpu.memory_space<vmem>>, vector<2x512xbf16>,
    %c0_244 = arith.constant 0 : index
    %c146 = arith.constant 146 : index
    %553 = vector.load %arg15[%c0_244, %c146] : memref<2x768xf32, #tpu.memory_space<vmem>>, vector<2x512xf32>
    %c26_i32_245 = arith.constant 26 : i32
    %554 = vector.broadcast %c26_i32_245 : i32 to vector<1x512xi32>
    %555 = arith.shrsi %292, %554 : vector<1x512xi32>
    %c1_i32_246 = arith.constant 1 : i32
    %556 = vector.broadcast %c1_i32_246 : i32 to vector<1x512xi32>
    %557 = arith.andi %555, %556 : vector<1x512xi32>
    %558 = arith.sitofp %557 : vector<1x512xi32> to vector<1x512xf32>
    %559 = vector.broadcast %558 : vector<1x512xf32> to vector<2x512xf32>
    %560 = arith.mulf %553, %559 : vector<2x512xf32>
    %561 = arith.truncf %560 : vector<2x512xf32> to vector<2x512xbf16>
    %c52_247 = arith.constant 52 : index
    %c0_248 = arith.constant 0 : index
    %562 = vector.load %arg14[%c52_247, %c0_248] : memref<108x768xbf16, #tpu.memory_space<vmem>>, vector<2x512xbf16>
    tpu.vector_store %arg14[%c52_247, %c0_248], %561 {strides = array<i32>} : memref<108x768xbf16, #tpu.memory_space<vmem>>, vector<2x512xbf16>,
    %c0_249 = arith.constant 0 : index
    %c0_250 = arith.constant 0 : index
    %563 = vector.load %arg9[%c0_249, %c0_250] : memref<2x54xbf16, #tpu.memory_space<vmem>>, vector<2x54xbf16>
    %c0_251 = arith.constant 0 : index
    %c0_252 = arith.constant 0 : index
    %564 = vector.load %arg14[%c0_251, %c0_252] : memref<108x768xbf16, #tpu.memory_space<vmem>>, vector<54x512xbf16>
    %cst_253 = arith.constant dense<0.000000e+00> : vector<2x512xf32>
    %565 = tpu.matmul %563, %564, %cst_253 {dimension_numbers = #tpu.dot_dimension_numbers<[1], [0], [0], [1], [0, 0, 1, 1], [], []>} : vector<2x54xbf16>, vector<54x512xbf16>, vector<2x512xf32> -> vector<2x512xf32>
    %c0_254 = arith.constant 0 : index
    %c0_255 = arith.constant 0 : index
    %566 = vector.load %arg10[%c0_254, %c0_255] : memref<2x1xf32, #tpu.memory_space<vmem>>, vector<2x1xf32>
    %567 = vector.broadcast %566 : vector<2x1xf32> to vector<2x512xf32>
    %568 = arith.addf %565, %567 : vector<2x512xf32>
    %cst_256 = arith.constant 0.000000e+00 : f32
    %569 = vector.broadcast %cst_256 : f32 to vector<2x512xf32>
    %570 = arith.maximumf %568, %569 : vector<2x512xf32>
    %c0_257 = arith.constant 0 : index
    %c0_258 = arith.constant 0 : index
    %571 = vector.load %arg11[%c0_257, %c0_258] : memref<2x512xf32, #tpu.memory_space<vmem>>, vector<2x512xf32>
    tpu.vector_store %arg11[%c0_257, %c0_258], %570 {strides = array<i32>} : memref<2x512xf32, #tpu.memory_space<vmem>>, vector<2x512xf32>,
    return
  }
  func.func @transform_0(%arg0: i32) -> (i32, i32) {
    %c1_i32 = arith.constant 1 : i32
    %0 = arith.subi %arg0, %c1_i32 : i32
    %c0_i32 = arith.constant 0 : i32
    %1 = arith.maxsi %0, %c0_i32 : i32
    %c0_i32_0 = arith.constant 0 : i32
    %c0_i32_1 = arith.constant 0 : i32
    return %c0_i32_0, %1 : i32, i32
  }
  func.func @transform_1(%arg0: i32) -> (i32, i32) {
    %c0_i32 = arith.constant 0 : i32
    %c0_i32_0 = arith.constant 0 : i32
    return %c0_i32, %arg0 : i32, i32
  }
  func.func @transform_2(%arg0: i32) -> (i32, i32) {
    %c1_i32 = arith.constant 1 : i32
    %0 = arith.addi %arg0, %c1_i32 : i32
    %c1_i32_0 = arith.constant 1 : i32
    %1 = arith.minsi %0, %c1_i32_0 : i32
    %c0_i32 = arith.constant 0 : i32
    %c0_i32_1 = arith.constant 0 : i32
    return %c0_i32, %1 : i32, i32
  }
  func.func @transform_3(%arg0: i32) -> (i32, i32) {
    %c1_i32 = arith.constant 1 : i32
    %0 = arith.subi %arg0, %c1_i32 : i32
    %c0_i32 = arith.constant 0 : i32
    %1 = arith.maxsi %0, %c0_i32 : i32
    %c0_i32_0 = arith.constant 0 : i32
    %c0_i32_1 = arith.constant 0 : i32
    return %c0_i32_0, %1 : i32, i32
  }
  func.func @transform_4(%arg0: i32) -> (i32, i32) {
    %c0_i32 = arith.constant 0 : i32
    %c0_i32_0 = arith.constant 0 : i32
    return %c0_i32, %arg0 : i32, i32
  }
  func.func @transform_5(%arg0: i32) -> (i32, i32) {
    %c1_i32 = arith.constant 1 : i32
    %0 = arith.addi %arg0, %c1_i32 : i32
    %c1_i32_0 = arith.constant 1 : i32
    %1 = arith.minsi %0, %c1_i32_0 : i32
    %c0_i32 = arith.constant 0 : i32
    %c0_i32_1 = arith.constant 0 : i32
    return %c0_i32, %1 : i32, i32
  }
  func.func @transform_6(%arg0: i32) -> (i32, i32) {
    %c0_i32 = arith.constant 0 : i32
    %c0_i32_0 = arith.constant 0 : i32
    %c0_i32_1 = arith.constant 0 : i32
    return %c0_i32, %c0_i32_0 : i32, i32
  }
  func.func @transform_7(%arg0: i32) -> (i32, i32) {
    %c0_i32 = arith.constant 0 : i32
    %c0_i32_0 = arith.constant 0 : i32
    %c0_i32_1 = arith.constant 0 : i32
    return %c0_i32, %c0_i32_0 : i32, i32
  }
  func.func @transform_8(%arg0: i32) -> (i32, i32) {
    %c0_i32 = arith.constant 0 : i32
    %c0_i32_0 = arith.constant 0 : i32
    %c0_i32_1 = arith.constant 0 : i32
    return %c0_i32, %c0_i32_0 : i32, i32
  }
  func.func @transform_9(%arg0: i32) -> (i32, i32) {
    %c0_i32 = arith.constant 0 : i32
    %c0_i32_0 = arith.constant 0 : i32
    %c0_i32_1 = arith.constant 0 : i32
    return %c0_i32, %c0_i32_0 : i32, i32
  }
  func.func @transform_10(%arg0: i32) -> (i32, i32) {
    %c0_i32 = arith.constant 0 : i32
    %c0_i32_0 = arith.constant 0 : i32
    return %c0_i32, %arg0 : i32, i32
  }
}

</mosaic_0001>

<bundles_post_ra>
// kernel: convblock_forward.1
= control target key start
LH: loop header
LB: loop body
LE: loop exit
PB: predicated region body
PF: predicated region fallthrough
CT: control target
= control target key end

     0   :  { %s8089_s13 = smov 0   ;;  %s10829_s0 = inlined_call_operand.vmem [shape: f32[4,1024], index: 0, kind: input, shape index: {}, may-alias: {0,1,2}]   ;;  %s10830_s1 = inlined_call_operand.vmem [shape: f32[4,1024], index: 1, kind: input, shape index: {}, may-alias: {0,1,2}]   ;;  %s10831_s2 = inlined_call_operand.vmem [shape: f32[4,1024], index: 2, kind: input, shape index: {}, may-alias: {0,1,2}]   ;;  %s10832_s3 = inlined_call_operand.vmem [shape: s32[1,1024], index: 3, kind: input, shape index: {}, may-alias: {3,4,5}]   ;;  %s10833_s4 = inlined_call_operand.vmem [shape: s32[1,1024], index: 4, kind: input, shape index: {}, may-alias: {3,4,5}]   ;;  %s10834_s5 = inlined_call_operand.vmem [shape: s32[1,1024], index: 5, kind: input, shape index: {}, may-alias: {3,4,5}]   ;;  %s10835_s6 = inlined_call_operand.vmem [shape: bf16[2,108], index: 6, kind: input, shape index: {}]   ;;  %s10836_s7 = inlined_call_operand.vmem [shape: f32[2,1], index: 7, kind: input, shape index: {}]   ;;  %s10837_s8 = inlined_call_operand.vmem [shape: bf16[2,54], index: 8, kind: input, shape index: {}]   ;;  %s10838_s9 = inlined_call_operand.vmem [shape: f32[2,1], index: 9, kind: input, shape index: {}]   ;;  %s10839_s10 = inlined_call_operand.vmem [shape: f32[2,1024], index: 10, kind: output, shape index: {}]  }
   0x1 LB: > { %s7414_s14 = sadd.s32 4294967295, %s7993_s13   ;;  %p7422_p0 = scmp.ge.s32.totalorder %s7993_s13, 1  ;;  %s7993_s13 = sphi %s8089_s13, %s20_s13  }
   0x2   : > { %p413_p1 = scmp.lt.s32.totalorder %s7993_s13, 3 }
   0x4   : > { %p414_p2 = pnand %p7422_p0, %p413_p1 }
   0x6   : > { %417 = sbr.rel (%p414_p2) target bundleno = 1249 (0x4e1), region = 60 }
   0xd   : > { %s7423_s15 = sadd.s32 4294967295, %s7414_s14  ;;  %s7426_s16 = sshll.u32 %s7414_s14, 2  ;;  %v558_v0 = vlaneseq  ;;  %vm614_vm2 = vcmask 1043456   ;;  %vm10891_vm3 = vcmask 449536   ;;  %vm10892_vm4 = vcmask 457728  }
   0xe   : > { %p486_p3 = scmp.gt.s32.totalorder %s7423_s15, 0  ;;  %p498_p4 = scmp.lt.s32.totalorder %s7426_s16, 7  ;;  %vm848_vm5 = vcmask 465920   ;;  %vm10893_vm6 = vcmask 515072   ;;  %vm10896_vm7 = vcmask 531456   ;;  %vm1441_vm8 = vcmask 588800  }
   0xf   : > { %s503_s17 = sadd.s32 1, %s7414_s14  ;;  %vm564_vm0 = vcmp.lt.s32.totalorder %v558_v0, 512  ;;  %vm560_vm1 = vcmp.lt.s32.totalorder %v558_v0, 256  ;;  %v8112_v4 = vshrl.u32 %v558_v0, 7  ;;  %s10845_s20 = smov 63   ;;  %vm10895_vm9 = vcmask 523264  }
  0x10   : > { %s11079_s15 = smov (!%p486_p3, %s7423_s15), 0  ;;  %s11081_s16 = smov (!%p498_p4, %s7426_s16), 7  ;;  %vm10885_vm10 = vcmask 580608   ;;  %vm1868_vm11 = vcmask 990208   ;;  %vm10881_vm12 = vcmask 973824   ;;  %vm10882_vm13 = vcmask 982016  }
  0x11   : > { %s7424_s18 = sshll.u32 %s11079_s15, 2  ;;  %p504_p5 = scmp.lt.s32.totalorder %s503_s17, 1  ;;  %10942 = vst [vmem:[#allocation6_spill] sm:$0xff] %v8112_v4  ;;  %v8132_v8 = vsub.s32 0, %v8112_v4  ;;  %v8135_v9 = vsub.s32 1, %v8112_v4  ;;  %v8138_v10 = vsub.s32 2, %v8112_v4 }
  0x12   : > { %p489_p6 = scmp.lt.s32.totalorder %s7424_s18, 7  ;;  %s529_s21 = scalar_lea.vmem %s10833_s4, %s11081_s16  ;;  %v8141_v11 = vsub.s32 3, %v8112_v4  ;;  %vm10888_vm14 = vcmask 1039360   ;;  %vm2282_vm15 = vcmask 56320  }
  0x13   : > { %s11083_s17 = smov (!%p504_p5, %s503_s17), 1  ;;  %v563_v1 = vld [vmem:[%s529_s21] sm:$0xf]  ;;  %s7427_s14 = sshll.u32 %s11081_s16, 2  ;;  %10943 = vst [vmem:[#allocation7_spill] sm:$0xff] %v8132_v8  ;;  %10944 = vst [vmem:[#allocation8_spill] sm:$0xff] %v8135_v9 }
  0x14   : > { %s11085_s18 = smov (!%p489_p6, %s7424_s18), 7  ;;  %566 = vst.msk [vmem:[#allocation3 + $0x2] sm:$0xf] %vm564_vm0, %v563_v1  ;;  %s7428_s22 = sshll.u32 %s11083_s17, 2  ;;  %10945 = vst [vmem:[#allocation9_spill] sm:$0xff] %v8138_v10  ;;  %vm1506_vm0 = vcmask 7168  }
  0x15   : > { %p507_p7 = scmp.lt.s32.totalorder %s7428_s22, 7  ;;  %s521_s25 = scalar_lea.vmem %s10832_s3, %s11085_s18  ;;  %10946 = vst [vmem:[#allocation10_spill] sm:$0xff] %v8141_v11 }
  0x16   : > { %v557_v2 = vld [vmem:[%s521_s25 + $0x2] sm:$0x3]  ;;  %s7425_s29 = sshll.u32 %s11085_s18, 2  ;;  %s8123_s19 = scalar_lea.vmem %s10830_s1, %s7427_s14 }
  0x17   : > { %s11087_s22 = smov (!%p507_p7, %s7428_s22), 7  ;;  %562 = vst.msk [vmem:[#allocation3] sm:$0x3] %vm560_vm1, %v557_v2  ;;  %s492_s12 = scalar_lea.vmem %s10829_s0, %s7425_s29  ;;  %v8127_v6 = vld [vmem:[%s8123_s19] sm:$0xff] }
  0x18   : > { %s537_s28 = scalar_lea.vmem %s10834_s5, %s11087_s22  ;;  %v8118_v5 = vld [vmem:[%s492_s12 + $0x8] sm:$0xff]  ;;  %553 = vst [vmem:[#allocation2 + $0x8] sm:$0xff] %v8127_v6  ;;  %s10842_s18 = smov 55  }
  0x19   : > { %v567_v3 = vld [vmem:[%s537_s28] sm:$0x3]  ;;  %550 = vst [vmem:[#allocation2] sm:$0xff] %v8118_v5  ;;  %s10860_s21 = smov 56   ;;  %s7998_s23 = smov 57  }
  0x1a   : > { %568 = vst.msk [vmem:[#allocation3 + $0x6] sm:$0x3] %vm560_vm1, %v567_v3  ;;  %s7429_s24 = sshll.u32 %s11087_s22, 2  ;;  %s7999_s25 = smov 65   ;;  %vm1147_vm1 = vcmask 72704  }
  0x1b   : > { %s510_s28 = scalar_lea.vmem %s10831_s2, %s7429_s24  ;;  %s8000_s22 = smov 72  }
  0x1c   : > { %s8001_s29 = smov 64   ;;  %s8002_s30 = smov 71  }
  0x1d   : > { %s10897_s11 = smov 119   ;;  %s8004_s12 = smov 121  }
  0x1e   : > { %s10847_s14 = smov 120   ;;  %s8006_s15 = smov 7  }
  0x1f   : > { %s10852_s17 = smov 127   ;;  %s8009_s24 = smov 9  }
  0x20   : > { %s8010_s26 = smov 8   ;;  %s8012_s27 = smov 16  }
  0x21   : > { %v8129_v7 = vld [vmem:[#allocation3 + $0x1] sm:$0x3f] }
  0x22   : > { %v573_v12 = vand.u32 1, %v8129_v7  ;;  %v925_v13 = vshra.s32 %v8129_v7, 3  ;;  %v684_v14 = vshra.s32 %v8129_v7, 1  ;;  %v808_v15 = vshra.s32 %v8129_v7, 2 }
  0x23   : > { %v1163_v16 = vshra.s32 %v8129_v7, 5  ;;  %v1401_v27 = vshra.s32 %v8129_v7, 7  ;;  %v1046_v43 = vshra.s32 %v8129_v7, 4  ;;  %v1284_v52 = vshra.s32 %v8129_v7, 6 }
  0x24   : > { %v8149_v17 = vcvt.s32.f32 %v573_v12  ;;  %v926_v18 = vand.u32 1, %v925_v13  ;;  %v685_v19 = vand.u32 1, %v684_v14  ;;  %v809_v20 = vand.u32 1, %v808_v15 }
  0x25   : > { %v1164_v31 = vand.u32 1, %v1163_v16  ;;  %v1402_v42 = vand.u32 1, %v1401_v27  ;;  %v1047_v51 = vand.u32 1, %v1046_v43  ;;  %v1285_v61 = vand.u32 1, %v1284_v52 }
  0x26   : > { %v587_v21 = vrot.slane %v8149_v17, %v8138_v10  ;;  %v591_v22 = vrot.slane %v8149_v17, %v8141_v11  ;;  %v579_v23 = vrot.slane %v8149_v17, %v8132_v8  ;;  %v583_v24 = vrot.slane %v8149_v17, %v8135_v9 }
  0x27   : > { %v8159_v25 = vcvt.s32.f32 %v926_v18  ;;  %v8161_v26 = vcvt.s32.f32 %v685_v19  ;;  %v8164_v30 = vcvt.s32.f32 %v809_v20  ;;  %v8189_v47 = vcvt.s32.f32 %v1164_v31 }
  0x28   : > { %v601_v28 = vcombine.low %v587_v21, %v591_v22  ;;  %v600_v29 = vcombine.low %v579_v23, %v583_v24  ;;  %v8204_v56 = vcvt.s32.f32 %v1402_v42  ;;  %v8210_v60 = vcvt.s32.f32 %v1047_v51  ;;  %v552_v23 = vld [vmem:[%s8123_s19 + $0x8] sm:$0xff]  ;;  %v555_v24 = vld [vmem:[%s510_s28] sm:$0xff]  ;;  %s8008_s19 = smov 1   ;;  %s8013_s28 = smov 17  }
  0x29   : > { %v932_v32 = vrot.slane %v8159_v25, %v8132_v8  ;;  %v936_v33 = vrot.slane %v8159_v25, %v8135_v9  ;;  %v691_v34 = vrot.slane %v8161_v26, %v8132_v8  ;;  %v695_v35 = vrot.slane %v8161_v26, %v8135_v9  ;;  %554 = vst [vmem:[#allocation2 + $0x10] sm:$0xff] %v552_v23 }
  0x2a   : > { %605 = vrot.lane.b32.xlu1 %v601_v28, %s10842_s18  ;;  %603 = vrot.lane.b32.xlu0 %v600_v29, %s10842_s18  ;;  %v940_v36 = vrot.slane %v8159_v25, %v8138_v10  ;;  %v944_v37 = vrot.slane %v8159_v25, %v8141_v11  ;;  %v699_v38 = vrot.slane %v8161_v26, %v8138_v10  ;;  %v1612_v1 = vshra.s32 %v8129_v7, 9 }
  0x2b   : > { %v953_v39 = vcombine.low %v932_v32, %v936_v33  ;;  %v712_v40 = vcombine.low %v691_v34, %v695_v35  ;;  %v703_v41 = vrot.slane %v8161_v26, %v8141_v11  ;;  %v823_v45 = vrot.slane %v8164_v30, %v8138_v10  ;;  %556 = vst [vmem:[#allocation2 + $0x18] sm:$0xff] %v555_v24 }
  0x2c   : > { %v954_v44 = vcombine.low %v940_v36, %v944_v37  ;;  %v827_v46 = vrot.slane %v8164_v30, %v8141_v11  ;;  %v815_v49 = vrot.slane %v8164_v30, %v8132_v8  ;;  %v819_v50 = vrot.slane %v8164_v30, %v8135_v9 }
  0x2d   : > { %v713_v48 = vcombine.low %v699_v38, %v703_v41  ;;  %v1178_v53 = vrot.slane %v8189_v47, %v8138_v10  ;;  %v1182_v54 = vrot.slane %v8189_v47, %v8141_v11  ;;  %v1170_v55 = vrot.slane %v8189_v47, %v8132_v8 }
  0x2e   : > { %956 = vrot.lane.b32.xlu1 %v953_v39, %s10845_s20  ;;  %715 = vrot.lane.b32.xlu0 %v712_v40, %s10860_s21  ;;  %v837_v57 = vcombine.low %v823_v45, %v827_v46  ;;  %v836_v58 = vcombine.low %v815_v49, %v819_v50  ;;  %v1174_v59 = vrot.slane %v8189_v47, %v8135_v9  ;;  %v8223_v13 = vcvt.s32.f32 %v1285_v61 }
  0x2f   : > { %v1192_v62 = vcombine.low %v1178_v53, %v1182_v54  ;;  %v1416_v63 = vrot.slane %v8204_v56, %v8138_v10  ;;  %v1420_v0 = vrot.slane %v8204_v56, %v8141_v11  ;;  %v1408_v3 = vrot.slane %v8204_v56, %v8132_v8 }
  0x30   : > { %v1191_v2 = vcombine.low %v1170_v55, %v1174_v59  ;;  %v1412_v12 = vrot.slane %v8204_v56, %v8135_v9  ;;  %v1061_v15 = vrot.slane %v8210_v60, %v8138_v10  ;;  %v1065_v16 = vrot.slane %v8210_v60, %v8141_v11 }
  0x31   : > { %v1430_v14 = vcombine.low %v1416_v63, %v1420_v0  ;;  %v1613_v18 = vand.u32 1, %v1612_v1  ;;  %v1053_v20 = vrot.slane %v8210_v60, %v8132_v8  ;;  %v1057_v21 = vrot.slane %v8210_v60, %v8135_v9 }
  0x32   : > { %958 = vrot.lane.b32.xlu1 %v954_v44, %s10845_s20  ;;  %717 = vrot.lane.b32.xlu0 %v713_v48, %s10860_s21  ;;  %v1429_v19 = vcombine.low %v1408_v3, %v1412_v12  ;;  %v1827_v22 = vshra.s32 %v8129_v7, 11  ;;  %v1075_v27 = vcombine.low %v1061_v15, %v1065_v16  ;;  %v1299_v28 = vrot.slane %v8223_v13, %v8138_v10 }
  0x33   : > { %v1303_v29 = vrot.slane %v8223_v13, %v8141_v11  ;;  %v1614_v31 = vcvt.s32.f32 %v1613_v18  ;;  %v1074_v32 = vcombine.low %v1053_v20, %v1057_v21  ;;  %v1291_v33 = vrot.slane %v8223_v13, %v8132_v8 }
  0x34   : > { %v1295_v34 = vrot.slane %v8223_v13, %v8135_v9  ;;  %v1828_v35 = vand.u32 1, %v1827_v22  ;;  %v8252_v36 = vsub.s32 4, %v8112_v4  ;;  %v1721_v37 = vshra.s32 %v8129_v7, 10 }
  0x35   : > { %v8256_v38 = vsub.s32 5, %v8112_v4  ;;  %v1313_v39 = vcombine.low %v1299_v28, %v1303_v29  ;;  %v1627_v40 = vrot.slane %v1614_v31, %v8138_v10  ;;  %v1631_v41 = vrot.slane %v1614_v31, %v8141_v11 }
  0x36   : > { %841 = vrot.lane.b32.xlu1 %v837_v57, %s7998_s23  ;;  %839 = vrot.lane.b32.xlu0 %v836_v58, %s7998_s23  ;;  %v1312_v42 = vcombine.low %v1291_v33, %v1295_v34  ;;  %v1619_v43 = vrot.slane %v1614_v31, %v8132_v8  ;;  %v1623_v44 = vrot.slane %v1614_v31, %v8135_v9  ;;  %v1829_v45 = vcvt.s32.f32 %v1828_v35 }
  0x37   : > { %v1722_v46 = vand.u32 1, %v1721_v37  ;;  %v1641_v48 = vcombine.low %v1627_v40, %v1631_v41  ;;  %v1635_v49 = vrot.slane %v1614_v31, %v8252_v36  ;;  %v1639_v50 = vrot.slane %v1614_v31, %v8256_v38 }
  0x38   : > { %v2242_v51 = vshra.s32 %v8129_v7, 15  ;;  %v1640_v52 = vcombine.low %v1619_v43, %v1623_v44  ;;  %v1834_v53 = vrot.slane %v1829_v45, %v8132_v8  ;;  %v1838_v54 = vrot.slane %v1829_v45, %v8135_v9 }
  0x39   : > { %v1723_v55 = vcvt.s32.f32 %v1722_v46  ;;  %v1642_v57 = vcombine.low %v1635_v49, %v1639_v50  ;;  %v1850_v58 = vrot.slane %v1829_v45, %v8252_v36  ;;  %v1854_v59 = vrot.slane %v1829_v45, %v8256_v38 }
  0x3a   : > { %1196 = vrot.lane.b32.xlu1 %v1192_v62, %s7999_s25  ;;  %1194 = vrot.lane.b32.xlu0 %v1191_v2, %s7999_s25  ;;  %v2243_v61 = vand.u32 1, %v2242_v51  ;;  %v1855_v62 = vcombine.low %v1834_v53, %v1838_v54  ;;  %v1842_v63 = vrot.slane %v1829_v45, %v8138_v10  ;;  %v1846_v0 = vrot.slane %v1829_v45, %v8141_v11 }
  0x3b   : > { %v1936_v1 = vshra.s32 %v8129_v7, 12  ;;  %v1857_v2 = vcombine.low %v1850_v58, %v1854_v59  ;;  %v1736_v3 = vrot.slane %v1723_v55, %v8138_v10  ;;  %v1740_v12 = vrot.slane %v1723_v55, %v8141_v11 }
  0x3c   : > { %v1856_v15 = vcombine.low %v1842_v63, %v1846_v0  ;;  %v1728_v16 = vrot.slane %v1723_v55, %v8132_v8  ;;  %v1732_v18 = vrot.slane %v1723_v55, %v8135_v9  ;;  %v2136_v23 = vshra.s32 %v8129_v7, 14 }
  0x3d   : > { %v1750_v20 = vcombine.low %v1736_v3, %v1740_v12  ;;  %v1748_v28 = vrot.slane %v1723_v55, %v8256_v38  ;;  %v2457_v31 = vshra.s32 %v8129_v7, 17 }
  0x3e   : > { %1434 = vrot.lane.b32.xlu1 %v1430_v14, %s8000_s22  ;;  %1432 = vrot.lane.b32.xlu0 %v1429_v19, %s8000_s22  ;;  %v8280_v14 = vcvt.s32.f32 %v2243_v61  ;;  %v1937_v19 = vand.u32 1, %v1936_v1  ;;  %v1749_v24 = vcombine.low %v1728_v16, %v1732_v18  ;;  %v2137_v35 = vand.u32 1, %v2136_v23 }
  0x3f   : > { %v2458_v43 = vand.u32 1, %v2457_v31 }
  0x40   : > { %v2249_v21 = vrot.slane %v8280_v14, %v8132_v8  ;;  %v2253_v22 = vrot.slane %v8280_v14, %v8135_v9  ;;  %v1938_v29 = vcvt.s32.f32 %v1937_v19  ;;  %v2257_v33 = vrot.slane %v8280_v14, %v8138_v10 }
  0x41   : > { %v2261_v34 = vrot.slane %v8280_v14, %v8141_v11  ;;  %v8305_v46 = vcvt.s32.f32 %v2137_v35  ;;  %v8310_v51 = vcvt.s32.f32 %v2458_v43 }
  0x42   : > { %1079 = vrot.lane.b32.xlu1 %v1075_v27, %s8001_s29  ;;  %1077 = vrot.lane.b32.xlu0 %v1074_v32, %s8001_s29  ;;  %v1744_v27 = vrot.slane %v1723_v55, %v8252_v36  ;;  %v2270_v32 = vcombine.low %v2249_v21, %v2253_v22  ;;  %v1947_v40 = vrot.slane %v1938_v29, %v8135_v9 }
  0x43   : > { %v1959_v41 = vrot.slane %v1938_v29, %v8252_v36  ;;  %v1951_v44 = vrot.slane %v1938_v29, %v8138_v10  ;;  %v1955_v45 = vrot.slane %v1938_v29, %v8141_v11  ;;  %v2271_v50 = vcombine.low %v2257_v33, %v2261_v34 }
  0x44   : > { %v1751_v37 = vcombine.low %v1744_v27, %v1748_v28  ;;  %v2151_v54 = vrot.slane %v8305_v46, %v8138_v10  ;;  %v2143_v58 = vrot.slane %v8305_v46, %v8132_v8  ;;  %v2147_v59 = vrot.slane %v8305_v46, %v8135_v9 }
  0x45   : > { %v1965_v53 = vcombine.low %v1951_v44, %v1955_v45  ;;  %v2472_v61 = vrot.slane %v8310_v51, %v8138_v10  ;;  %v2476_v63 = vrot.slane %v8310_v51, %v8141_v11  ;;  %v2464_v0 = vrot.slane %v8310_v51, %v8132_v8 }
  0x46   : > { %1317 = vrot.lane.b32.xlu1 %v1313_v39, %s8002_s30  ;;  %1315 = vrot.lane.b32.xlu0 %v1312_v42, %s8002_s30  ;;  %v1943_v39 = vrot.slane %v1938_v29, %v8132_v8  ;;  %v1963_v42 = vrot.slane %v1938_v29, %v8256_v38  ;;  %v2468_v1 = vrot.slane %v8310_v51, %v8135_v9 }
  0x47   : > { %v2164_v12 = vcombine.low %v2143_v58, %v2147_v59  ;;  %v2486_v16 = vcombine.low %v2472_v61, %v2476_v63  ;;  %v948_v27 = vrot.slane %v8159_v25, %v8252_v36  ;;  %v952_v28 = vrot.slane %v8159_v25, %v8256_v38 }
  0x48   : > { %v1964_v49 = vcombine.low %v1943_v39, %v1947_v40  ;;  %v2485_v18 = vcombine.low %v2464_v0, %v2468_v1  ;;  %v707_v29 = vrot.slane %v8161_v26, %v8252_v36  ;;  %v711_v34 = vrot.slane %v8161_v26, %v8256_v38 }
  0x49   : > { %v955_v26 = vcombine.low %v948_v27, %v952_v28  ;;  %v599_v58 = vrot.slane %v8149_v17, %v8256_v38 }
  0x4a   : > { %1645 = vrot.lane.b32.xlu1 %v1641_v48, %s10897_s11  ;;  %1643 = vrot.lane.b32.xlu0 %v1640_v52, %s10897_s11  ;;  %v2671_v48 = vshra.s32 %v8129_v7, 19  ;;  %v1966_v52 = vcombine.low %v1959_v41, %v1963_v42  ;;  %v2905_v41 = vshra.s32 %v8129_v7, 21  ;;  %v714_v42 = vcombine.low %v707_v29, %v711_v34 }
  0x4b   : > { %v1424_v29 = vrot.slane %v8204_v56, %v8252_v36 }
  0x4c   : > { %v2672_v55 = vand.u32 1, %v2671_v48  ;;  %v2906_v48 = vand.u32 1, %v2905_v41 }
  0x4e   : > { %1858 = vrot.lane.b32.xlu1 %v1855_v62, %s8004_s12  ;;  %1647 = vrot.lane.b32.xlu0 %v1642_v57, %s10897_s11  ;;  %v2155_v57 = vrot.slane %v8305_v46, %v8141_v11  ;;  %v2351_v62 = vshra.s32 %v8129_v7, 16  ;;  %v8390_v59 = vcvt.s32.f32 %v2906_v48  ;;  %s11027_s11 = smov 56  }
  0x50   : > { %v2165_v3 = vcombine.low %v2151_v54, %v2155_v57  ;;  %v831_v54 = vrot.slane %v8164_v30, %v8252_v36  ;;  %v595_v57 = vrot.slane %v8149_v17, %v8252_v36  ;;  %v2924_v17 = vrot.slane %v8390_v59, %v8141_v11 }
  0x52   : > { %1862 = vrot.lane.b32.xlu1 %v1857_v2, %s8004_s12  ;;  %1860 = vrot.lane.b32.xlu0 %v1856_v15, %s8004_s12  ;;  %v8331_v2 = vcvt.s32.f32 %v2672_v55  ;;  %v2352_v15 = vand.u32 1, %v2351_v62  ;;  %v835_v55 = vrot.slane %v8164_v30, %v8256_v38  ;;  %v602_v1 = vcombine.low %v595_v57, %v599_v58  ;;  %s8015_s12 = smov 73  }
  0x53   : > { %v2920_v30 = vrot.slane %v8390_v59, %v8138_v10  ;;  %v1307_v58 = vrot.slane %v8223_v13, %v8252_v36 }
  0x54   : > { %v2686_v19 = vrot.slane %v8331_v2, %v8138_v10  ;;  %v2690_v21 = vrot.slane %v8331_v2, %v8141_v11  ;;  %v2678_v22 = vrot.slane %v8331_v2, %v8132_v8  ;;  %v2682_v23 = vrot.slane %v8331_v2, %v8135_v9 }
  0x55   : > { %v838_v0 = vcombine.low %v831_v54, %v835_v55 }
  0x56   : > { %1754 = vrot.lane.b32.xlu1 %v1750_v20, %s10847_s14  ;;  %1752 = vrot.lane.b32.xlu0 %v1749_v24, %s10847_s14  ;;  %v2566_v20 = vshra.s32 %v8129_v7, 18  ;;  %v8346_v24 = vcvt.s32.f32 %v2352_v15  ;;  %v2699_v33 = vcombine.low %v2678_v22, %v2682_v23  ;;  %v2912_v15 = vrot.slane %v8390_v59, %v8132_v8 }
  0x57   : > { %v2934_v23 = vcombine.low %v2920_v30, %v2924_v17  ;;  %v1073_v30 = vrot.slane %v8210_v60, %v8256_v38 }
  0x58   : > { %v2567_v31 = vand.u32 1, %v2566_v20  ;;  %v2366_v35 = vrot.slane %v8346_v24, %v8138_v10  ;;  %v2370_v25 = vrot.slane %v8346_v24, %v8141_v11  ;;  %v2362_v39 = vrot.slane %v8346_v24, %v8135_v9 }
  0x5a   : > { %2273 = vrot.lane.b32.xlu1 %v2270_v32, %s8006_s15  ;;  %1756 = vrot.lane.b32.xlu0 %v1751_v37, %s10847_s14  ;;  %v2700_v32 = vcombine.low %v2686_v19, %v2690_v21  ;;  %v2358_v37 = vrot.slane %v8346_v24, %v8132_v8  ;;  %v8366_v40 = vcvt.s32.f32 %v2567_v31  ;;  %v2380_v43 = vcombine.low %v2366_v35, %v2370_v25  ;;  %s8019_s14 = smov 80  }
  0x5b   : > { %v1428_v31 = vrot.slane %v8204_v56, %v8256_v38 }
  0x5c   : > { %v2379_v44 = vcombine.low %v2358_v37, %v2362_v39  ;;  %v2581_v45 = vrot.slane %v8366_v40, %v8138_v10  ;;  %v3373_v39 = vshra.s32 %v8129_v7, 25 }
  0x5d   : > { %v1431_v41 = vcombine.low %v1424_v29, %v1428_v31  ;;  %v2163_v29 = vrot.slane %v8305_v46, %v8256_v38  ;;  %v2265_v31 = vrot.slane %v8280_v14, %v8252_v36 }
  0x5e   : > { %1967 = vrot.lane.b32.xlu1 %v1964_v49, %s10852_s17  ;;  %2275 = vrot.lane.b32.xlu0 %v2271_v50, %s8006_s15  ;;  %v3139_v49 = vshra.s32 %v8129_v7, 23  ;;  %v2585_v50 = vrot.slane %v8366_v40, %v8141_v11 }
  0x60   : > { %v3140_v61 = vand.u32 1, %v3139_v49  ;;  %v2595_v62 = vcombine.low %v2581_v45, %v2585_v50  ;;  %v3374_v45 = vand.u32 1, %v3373_v39 }
  0x62   : > { %1971 = vrot.lane.b32.xlu1 %v1966_v52, %s10852_s17  ;;  %1969 = vrot.lane.b32.xlu0 %v1965_v53, %s10852_s17  ;;  %v2573_v52 = vrot.slane %v8366_v40, %v8132_v8  ;;  %v2577_v53 = vrot.slane %v8366_v40, %v8135_v9  ;;  %v8454_v57 = vcvt.s32.f32 %v3374_v45  ;;  %v2589_v45 = vrot.slane %v8366_v40, %v8252_v36  ;;  %s8020_s17 = smov 74  }
  0x64   : > { %v2594_v63 = vcombine.low %v2573_v52, %v2577_v53  ;;  %v3258_v52 = vshra.s32 %v8129_v7, 24  ;;  %v3392_v17 = vrot.slane %v8454_v57, %v8141_v11 }
  0x66   : > { %2169 = vrot.lane.b32.xlu1 %v2165_v3, %s8008_s19  ;;  %2167 = vrot.lane.b32.xlu0 %v2164_v12, %s8008_s19  ;;  %v8396_v3 = vcvt.s32.f32 %v3140_v61  ;;  %v2790_v12 = vshra.s32 %v8129_v7, 20  ;;  %v1311_v61 = vrot.slane %v8223_v13, %v8256_v38  ;;  %v3380_v13 = vrot.slane %v8454_v57, %v8132_v8 }
  0x68   : > { %v3154_v19 = vrot.slane %v8396_v3, %v8138_v10  ;;  %v3158_v20 = vrot.slane %v8396_v3, %v8141_v11  ;;  %v3146_v21 = vrot.slane %v8396_v3, %v8132_v8  ;;  %v2791_v22 = vand.u32 1, %v2790_v12 }
  0x69   : > { %v3150_v28 = vrot.slane %v8396_v3, %v8135_v9  ;;  %v3388_v12 = vrot.slane %v8454_v57, %v8138_v10 }
  0x6a   : > { %2490 = vrot.lane.b32.xlu1 %v2486_v16, %s8009_s24  ;;  %2488 = vrot.lane.b32.xlu0 %v2485_v18, %s8009_s24  ;;  %v2916_v16 = vrot.slane %v8390_v59, %v8135_v9  ;;  %v3024_v18 = vshra.s32 %v8129_v7, 22  ;;  %v8426_v34 = vcvt.s32.f32 %v2791_v22  ;;  %v3168_v25 = vcombine.low %v3154_v19, %v3158_v20 }
  0x6b   : > { %v3167_v37 = vcombine.low %v3146_v21, %v3150_v28  ;;  %v3402_v19 = vcombine.low %v3388_v12, %v3392_v17  ;;  %v2159_v28 = vrot.slane %v8305_v46, %v8252_v36  ;;  %v2698_v46 = vrot.slane %v8331_v2, %v8256_v38 }
  0x6c   : > { %v2933_v27 = vcombine.low %v2912_v15, %v2916_v16  ;;  %v3025_v35 = vand.u32 1, %v3024_v18  ;;  %v2805_v56 = vrot.slane %v8426_v34, %v8138_v10  ;;  %v3384_v15 = vrot.slane %v8454_v57, %v8135_v9 }
  0x6d   : > { %v1314_v18 = vcombine.low %v1307_v58, %v1311_v61  ;;  %v2166_v39 = vcombine.low %v2159_v28, %v2163_v29  ;;  %v3166_v58 = vrot.slane %v8396_v3, %v8256_v38  ;;  %v2928_v61 = vrot.slane %v8390_v59, %v8252_v36 }
  0x6e   : > { %2704 = vrot.lane.b32.xlu1 %v2700_v32, %s10860_s21  ;;  %2702 = vrot.lane.b32.xlu0 %v2699_v33, %s10860_s21  ;;  %v1186_v32 = vrot.slane %v8189_v47, %v8252_v36  ;;  %v1190_v33 = vrot.slane %v8189_v47, %v8256_v38  ;;  %v2809_v47 = vrot.slane %v8426_v34, %v8141_v11 }
  0x6f   : > { %v3401_v20 = vcombine.low %v3380_v13, %v3384_v15  ;;  %v2813_v17 = vrot.slane %v8426_v34, %v8252_v36 }
  0x70   : > { %v2819_v53 = vcombine.low %v2805_v56, %v2809_v47  ;;  %v2480_v56 = vrot.slane %v8310_v51, %v8252_v36 }
  0x72   : > { %960 = vrot.lane.b32.xlu1 %v955_v26, %s10845_s20  ;;  %719 = vrot.lane.b32.xlu0 %v714_v42, %s10860_s21  ;;  %v1193_v26 = vcombine.low %v1186_v32, %v1190_v33  ;;  %v8433_v42 = vcvt.s32.f32 %v3025_v35  ;;  %v2269_v35 = vrot.slane %v8280_v14, %v8256_v38  ;;  %v2484_v14 = vrot.slane %v8310_v51, %v8256_v38 }
  0x73   : > { %v2378_v51 = vrot.slane %v8346_v24, %v8256_v38 }
  0x74   : > { %v3039_v48 = vrot.slane %v8433_v42, %v8138_v10  ;;  %v3043_v49 = vrot.slane %v8433_v42, %v8141_v11  ;;  %v3031_v50 = vrot.slane %v8433_v42, %v8132_v8  ;;  %v3035_v55 = vrot.slane %v8433_v42, %v8135_v9 }
  0x76   : > { %2384 = vrot.lane.b32.xlu1 %v2380_v43, %s8010_s26  ;;  %2382 = vrot.lane.b32.xlu0 %v2379_v44, %s8010_s26  ;;  %v2797_v43 = vrot.slane %v8426_v34, %v8132_v8  ;;  %v2801_v44 = vrot.slane %v8426_v34, %v8135_v9 }
  0x78   : > { %v2818_v54 = vcombine.low %v2797_v43, %v2801_v44 }
  0x7a   : > { %2599 = vrot.lane.b32.xlu1 %v2595_v62, %s10842_s18  ;;  %2597 = vrot.lane.b32.xlu0 %v2594_v63, %s10842_s18  ;;  %v1069_v62 = vrot.slane %v8210_v60, %v8252_v36  ;;  %v3259_v63 = vand.u32 1, %v3258_v52 }
  0x7c   : > { %v8474_v16 = vcvt.s32.f32 %v3259_v63  ;;  %v1076_v60 = vcombine.low %v1069_v62, %v1073_v30  ;;  %v2932_v62 = vrot.slane %v8390_v59, %v8256_v38  ;;  %v3047_v63 = vrot.slane %v8433_v42, %v8252_v36 }
  0x7d   : > { %v2817_v59 = vrot.slane %v8426_v34, %v8256_v38 }
  0x7e   : > { %843 = vrot.lane.b32.xlu1 %v838_v0, %s7998_s23  ;;  %607 = vrot.lane.b32.xlu0 %v602_v1, %s10842_s18  ;;  %v3053_v0 = vcombine.low %v3039_v48, %v3043_v49  ;;  %v3052_v1 = vcombine.low %v3031_v50, %v3035_v55  ;;  %v3273_v21 = vrot.slane %v8474_v16, %v8138_v10 }
  0x7f   : > { %v3277_v22 = vrot.slane %v8474_v16, %v8141_v11  ;;  %v2487_v48 = vcombine.low %v2480_v56, %v2484_v14  ;;  %v2374_v49 = vrot.slane %v8346_v24, %v8252_v36  ;;  %v3281_v34 = vrot.slane %v8474_v16, %v8252_v36 }
  0x80   : > { %v2820_v28 = vcombine.low %v2813_v17, %v2817_v59  ;;  %v3285_v29 = vrot.slane %v8474_v16, %v8256_v38 }
  0x81   : > { %v3287_v32 = vcombine.low %v3273_v21, %v3277_v22  ;;  %v2381_v24 = vcombine.low %v2374_v49, %v2378_v51 }
  0x82   : > { %2938 = vrot.lane.b32.xlu1 %v2934_v23, %s10845_s20  ;;  %2936 = vrot.lane.b32.xlu0 %v2933_v27, %s10845_s20  ;;  %v3265_v23 = vrot.slane %v8474_v16, %v8132_v8  ;;  %v3269_v27 = vrot.slane %v8474_v16, %v8135_v9 }
  0x84   : > { %v3286_v33 = vcombine.low %v3265_v23, %v3269_v27 }
  0x86   : > { %3172 = vrot.lane.b32.xlu1 %v3168_v25, %s7999_s25  ;;  %3170 = vrot.lane.b32.xlu0 %v3167_v37, %s7999_s25 }
  0x8a   : > { %1436 = vrot.lane.b32.xlu1 %v1431_v41, %s8000_s22  ;;  %1198 = vrot.lane.b32.xlu0 %v1193_v26, %s7999_s25  ;;  %v2694_v41 = vrot.slane %v8331_v2, %v8252_v36  ;;  %v2272_v26 = vcombine.low %v2265_v31, %v2269_v35  ;;  %v2593_v2 = vrot.slane %v8366_v40, %v8256_v38 }
  0x8b   : > { %v3396_v31 = vrot.slane %v8454_v57, %v8252_v36  ;;  %v3400_v35 = vrot.slane %v8454_v57, %v8256_v38 }
  0x8c   : > { %v2701_v44 = vcombine.low %v2694_v41, %v2698_v46  ;;  %v2596_v55 = vcombine.low %v2589_v45, %v2593_v2  ;;  %v1521_v2 = vshra.s32 %v8129_v7, 8 }
  0x8d   : > { %v3403_v45 = vcombine.low %v3396_v31, %v3400_v35 }
  0x8e   : > { %2823 = vrot.lane.b32.xlu1 %v2819_v53, %s7998_s23  ;;  %2821 = vrot.lane.b32.xlu0 %v2818_v54, %s7998_s23  ;;  %v3162_v53 = vrot.slane %v8396_v3, %v8252_v36 }
  0x90   : > { %v3169_v12 = vcombine.low %v3162_v53, %v3166_v58 }
  0x92   : > { %3057 = vrot.lane.b32.xlu1 %v3053_v0, %s8001_s29  ;;  %3055 = vrot.lane.b32.xlu0 %v3052_v1, %s8001_s29  ;;  %v3051_v0 = vrot.slane %v8433_v42, %v8256_v38 }
  0x96   : > { %1319 = vrot.lane.b32.xlu1 %v1314_v18, %s8002_s30  ;;  %1081 = vrot.lane.b32.xlu0 %v1076_v60, %s8001_s29  ;;  %v2935_v18 = vcombine.low %v2928_v61, %v2932_v62  ;;  %v3054_v60 = vcombine.low %v3047_v63, %v3051_v0 }
  0x9a   : > { %3406 = vrot.lane.b32.xlu1 %v3402_v19, %s8000_s22  ;;  %3404 = vrot.lane.b32.xlu0 %v3401_v20, %s8000_s22 }
  0x9c   : > { %v8498_v25 = vpop.permute.xlu1 %605  ;;  %v604_v37 = vpop.permute.xlu0 %603 }
  0x9d   : > { %v610_v40 = vrot.slane %v8498_v25, 4  ;;  %v609_v54 = vrot.slane %v604_v37, 4 }
  0x9e   : > { %3291 = vrot.lane.b32.xlu1 %v3287_v32, %s8002_s30  ;;  %3289 = vrot.lane.b32.xlu0 %v3286_v33, %s8002_s30 }
  0x9f   : > { %v615_v30 = vsel %vm614_vm2, %v609_v54, %v610_v40  ;;  %v613_v19 = vsel %vm10891_vm3, %v609_v54, %v604_v37 }
  0xa0   : > { %v8510_v47 = vpop.permute.xlu1 %956  ;;  %v716_v43 = vpop.permute.xlu0 %715  ;;  %v616_v23 = vsel %vm10891_vm3, %v615_v30, %v8498_v25  ;;  %v622_v16 = vmul.f32 %v613_v19, %v8118_v5 }
  0xa1   : > { %v721_v20 = vrot.slane %v716_v43, 4  ;;  %v962_v37 = vrot.slane %v8510_v47, 4 }
  0xa2   : > { %2171 = vrot.lane.b32.xlu1 %v2166_v39, %s8008_s19  ;;  %2277 = vrot.lane.b32.xlu0 %v2272_v26, %s8006_s15  ;;  %v623_v39 = vmul.f32 %v616_v23, %v8127_v6  ;;  %v628_v53 = vcombine.high %v622_v16, %v622_v16  ;;  %s8016_s15 = smov 2  }
  0xa3   : > { %v725_v41 = vsel %vm10892_vm4, %v721_v20, %v716_v43  ;;  %v3288_v43 = vcombine.low %v3281_v34, %v3285_v29 }
  0xa4   : > { %v8522_v50 = vpop.permute.xlu1 %958  ;;  %v8524_v52 = vpop.permute.xlu0 %717  ;;  %v734_v49 = vmul.f32 %v725_v41, %v8118_v5  ;;  %v629_v51 = vcombine.high %v623_v39, %v623_v39 }
  0xa5   : > { %v722_v13 = vrot.slane %v8524_v52, 4  ;;  %v963_v27 = vrot.slane %v8522_v50, 4 }
  0xa6   : > { %2706 = vrot.lane.b32.xlu1 %v2701_v44, %s10860_s21  ;;  %2492 = vrot.lane.b32.xlu0 %v2487_v48, %s8009_s24  ;;  %v966_v48 = vsel %vm10893_vm6, %v962_v37, %v8510_v47  ;;  %v1522_v47 = vand.u32 1, %v1521_v2  ;;  %v741_v30 = vcombine.high %v734_v49, %v734_v49  ;;  %v7681_v59 = vpack.c.bf16 %v629_v51, %v623_v39  ;;  %s8021_s21 = smov 66  }
  0xa7   : > { %v726_v32 = vsel %vm614_vm2, %v721_v20, %v722_v13  ;;  %v967_v56 = vsel %vm614_vm2, %v962_v37, %v963_v27  ;;  %v975_v63 = vmul.f32 %v966_v48, %v8118_v5 }
  0xa8   : > { %v8541_v3 = vpop.permute.xlu1 %841  ;;  %v840_v1 = vpop.permute.xlu0 %839  ;;  %v727_v57 = vsel %vm10892_vm4, %v726_v32, %v8524_v52  ;;  %v968_v54 = vsel %vm10893_vm6, %v967_v56, %v8522_v50  ;;  %v7683_v29 = vpack.c.bf16 %v741_v30, %v734_v49 }
  0xa9   : > { %v10859_v15 = vrot.slane %v8541_v3, 4  ;;  %v845_v42 = vrot.slane %v840_v1, 4  ;;  %v976_v0 = vmul.f32 %v968_v54, %v8127_v6  ;;  %v982_v32 = vcombine.high %v975_v63, %v975_v63 }
  0xaa   : > { %2601 = vrot.lane.b32.xlu1 %v2596_v55, %s10842_s18  ;;  %2386 = vrot.lane.b32.xlu0 %v2381_v24, %s8010_s26  ;;  %v735_v55 = vmul.f32 %v727_v57, %v8127_v6  ;;  %s8017_s18 = smov 82  }
  0xab   : > { %v850_v33 = vsel %vm614_vm2, %v845_v42, %v10859_v15  ;;  %v849_v14 = vsel %vm848_vm5, %v845_v42, %v840_v1  ;;  %v7680_v1 = vpack.c.bf16 %v628_v53, %v622_v16  ;;  %v983_v31 = vcombine.high %v976_v0, %v976_v0 }
  0xac   : > { %v8555_v21 = vpop.permute.xlu1 %1196  ;;  %v8557_v22 = vpop.permute.xlu0 %1194  ;;  %v851_v44 = vsel %vm848_vm5, %v850_v33, %v8541_v3  ;;  %v858_v58 = vmul.f32 %v849_v14, %v8118_v5  ;;  %v7691_v2 = vpack.c.bf16 %v982_v32, %v975_v63 }
  0xad   : > { %v859_v62 = vmul.f32 %v851_v44, %v8127_v6  ;;  %v10857_v19 = vrot.slane %v8555_v21, 4  ;;  %v1200_v20 = vrot.slane %v8557_v22, 4 }
  0xae   : > { %3174 = vrot.lane.b32.xlu1 %v3169_v12, %s7999_s25  ;;  %2940 = vrot.lane.b32.xlu0 %v2935_v18, %s10845_s20  ;;  %v865_v18 = vcombine.high %v858_v58, %v858_v58  ;;  %s10899_s20 = smov 81  }
  0xaf   : > { %v866_v42 = vcombine.high %v859_v62, %v859_v62  ;;  %v1205_v41 = vsel %vm614_vm2, %v1200_v20, %v10857_v19  ;;  %v1204_v44 = vsel %vm10896_vm7, %v1200_v20, %v8557_v22 }
  0xb0   : > { %v8582_v46 = vpop.permute.xlu1 %1434  ;;  %v8584_v26 = vpop.permute.xlu0 %1432  ;;  %v7687_v37 = vpack.c.bf16 %v865_v18, %v858_v58  ;;  %v1213_v63 = vmul.f32 %v1204_v44, %v8118_v5 }
  0xb1   : > { %v7688_v16 = vpack.c.bf16 %v866_v42, %v859_v62  ;;  %v10841_v48 = vrot.slane %v8582_v46, 4  ;;  %v1438_v49 = vrot.slane %v8584_v26, 4 }
  0xb2   : > { %3059 = vrot.lane.b32.xlu1 %v3054_v60, %s8001_s29  ;;  %2825 = vrot.lane.b32.xlu0 %v2820_v28, %s7998_s23  ;;  %v742_v60 = vcombine.high %v735_v55, %v735_v55  ;;  %s8011_s23 = smov 18   ;;  %v8620_v28 = vcvt.s32.f32 %v1522_v47 }
  0xb3   : > { %v1443_v42 = vsel %vm614_vm2, %v1438_v49, %v10841_v48 }
  0xb4   : > { %v8604_v24 = vpop.permute.xlu1 %1079  ;;  %v1078_v61 = vpop.permute.xlu0 %1077  ;;  %v7684_v39 = vpack.c.bf16 %v742_v60, %v735_v55  ;;  %v1536_v57 = vrot.slane %v8620_v28, %v8138_v10  ;;  %v1540_v14 = vrot.slane %v8620_v28, %v8141_v11  ;;  %v1206_v55 = vsel %vm10896_vm7, %v1205_v41, %v8555_v21 }
  0xb5   : > { %v10858_v34 = vrot.slane %v8604_v24, 4  ;;  %v1083_v23 = vrot.slane %v1078_v61, 4  ;;  %v1214_v30 = vmul.f32 %v1206_v55, %v8127_v6  ;;  %v1442_v41 = vsel %vm1441_vm8, %v1438_v49, %v8584_v26  ;;  %v7981_v49 = vld [vmem:[#allocation2] sm:$0xff] }
  0xb6   : > { %3293 = vrot.lane.b32.xlu1 %v3288_v43, %s8002_s30  ;;  %3408 = vrot.lane.b32.xlu0 %v3403_v45, %s8000_s22  ;;  %v772_v43 = vrot.slane %v7683_v29, 6  ;;  %v7692_v45 = vpack.c.bf16 %v983_v31, %v976_v0  ;;  %v773_v54 = vrot.slane %v7684_v39, 6  ;;  %v1528_v0 = vrot.slane %v8620_v28, %v8132_v8  ;;  %s8014_s30 = smov 10  }
  0xb7   : > { %v1088_v56 = vsel %vm614_vm2, %v1083_v23, %v10858_v34  ;;  %v1087_v58 = vsel %vm10895_vm9, %v1083_v23, %v1078_v61  ;;  %v1532_v61 = vrot.slane %v8620_v28, %v8135_v9  ;;  %v1221_v44 = vcombine.high %v1214_v30, %v1214_v30 }
  0xb8   : > { %v8611_v12 = vpop.permute.xlu1 %1317  ;;  %v8613_v17 = vpop.permute.xlu0 %1315  ;;  %v1089_v47 = vsel %vm10895_vm9, %v1088_v56, %v8604_v24  ;;  %v1096_v18 = vmul.f32 %v1087_v58, %v8118_v5  ;;  %v1014_v23 = vrot.slane %v7692_v45, 6  ;;  %v1550_v5 = vcombine.low %v1536_v57, %v1540_v14 }
  0xb9   : > { %v10856_v62 = vrot.slane %v8611_v12, 4  ;;  %v1321_v22 = vrot.slane %v8613_v17, 4  ;;  %v1097_v29 = vmul.f32 %v1089_v47, %v8127_v6  ;;  %v1549_v39 = vcombine.low %v1528_v0, %v1532_v61 }
  0xba   : > { %657 = vrot.lane.b32.xlu1 %v7681_v59, %s8011_s23  ;;  %655 = vrot.lane.b32.xlu0 %v7680_v1, %s8011_s23  ;;  %v1013_v1 = vrot.slane %v7691_v2, 6  ;;  %v2042_v59 = vshra.s32 %v8129_v7, 13  ;;  %v1220_v6 = vcombine.high %v1213_v63, %v1213_v63  ;;  %v1103_v14 = vcombine.high %v1096_v18, %v1096_v18 }
  0xbb   : > { %v1326_v31 = vsel %vm614_vm2, %v1321_v22, %v10856_v62  ;;  %v1325_v45 = vsel %vm10885_vm10, %v1321_v22, %v8613_v17  ;;  %v1104_v57 = vcombine.high %v1097_v29, %v1097_v29  ;;  %v1451_v58 = vmul.f32 %v7981_v49, %v1442_v41  ;;  %v7982_v17 = vld [vmem:[#allocation2 + $0x8] sm:$0xff] }
  0xbc   : > { %v8622_v33 = vpop.permute.xlu1 %1645  ;;  %v8624_v35 = vpop.permute.xlu0 %1643  ;;  %v1327_v55 = vsel %vm10885_vm10, %v1326_v31, %v8611_v12  ;;  %v1334_v0 = vmul.f32 %v7981_v49, %v1325_v45  ;;  %v7699_v61 = vpack.c.bf16 %v1220_v6, %v1213_v63  ;;  %v7695_v41 = vpack.c.bf16 %v1103_v14, %v1096_v18 }
  0xbd   : > { %v1650_v32 = vrot.slane %v8622_v33, 4  ;;  %v1649_v7 = vrot.slane %v8624_v35, 4 }
  0xbe   : > { %898 = vrot.lane.b32.xlu1 %v7688_v16, %s8012_s27  ;;  %896 = vrot.lane.b32.xlu0 %v7687_v37, %s8012_s27  ;;  %v1341_v45 = vcombine.high %v1334_v0, %v1334_v0 }
  0xbf   : > { %v1652_v26 = vsel %vm614_vm2, %v1649_v7, %v1650_v32 }
  0xc0   : > { %v8642_v51 = vpop.permute.xlu1 %1858  ;;  %v8644_v53 = vpop.permute.xlu0 %1647 }
  0xc1   : > { %v10840_v37 = vrot.slane %v8644_v53, 4  ;;  %v1864_v18 = vrot.slane %v8642_v51, 4 }
  0xc2   : > { %778 = vrot.lane.b32.xlu1 %v773_v54, %s8013_s28  ;;  %776 = vrot.lane.b32.xlu0 %v772_v43, %s8013_s28  ;;  %v1444_v43 = vsel %vm1441_vm8, %v1443_v42, %v8582_v46  ;;  %v2043_v42 = vand.u32 1, %v2042_v59 }
  0xc3   : > { %v1655_v47 = vsel %vm614_vm2, %v1650_v32, %v10840_v37  ;;  %v1452_v22 = vmul.f32 %v7982_v17, %v1444_v43  ;;  %v7696_v32 = vpack.c.bf16 %v1104_v57, %v1097_v29  ;;  %v8708_v37 = vld [vmem:[#allocation2 + $0xc] sm:$0xff]  ;;  %v1458_v29 = vcombine.high %v1451_v58, %v1451_v58 }
  0xc4   : > { %v8666_v60 = vpop.permute.xlu1 %1862  ;;  %v8668_v20 = vpop.permute.xlu0 %1860  ;;  %v1656_v59 = vsel %vm10881_vm12, %v8622_v33, %v1655_v47  ;;  %v1251_v33 = vrot.slane %v7699_v61, 6 }
  0xc5   : > { %v1866_v16 = vrot.slane %v8666_v60, 4 }
  0xc6   : > { %1019 = vrot.lane.b32.xlu1 %v1014_v23, %s8014_s30  ;;  %1017 = vrot.lane.b32.xlu0 %v1013_v1, %s8014_s30  ;;  %v1335_v1 = vmul.f32 %v7982_v17, %v1327_v55  ;;  %v1654_v23 = vsel %vm10881_vm12, %v8624_v35, %v1652_v26  ;;  %v1459_v35 = vcombine.high %v1452_v22, %v1452_v22 }
  0xc7   : > { %v8684_v56 = vsel %vm1868_vm11, %v8666_v60, %v1866_v16  ;;  %v8700_v60 = vld [vmem:[#allocation2 + $0x4] sm:$0xff]  ;;  %v1662_v26 = vmul.f32 %v8708_v37, %v1656_v59 }
  0xc8   : > { %v8690_v2 = vpop.permute.xlu1 %1754  ;;  %v1753_v54 = vpop.permute.xlu0 %1752  ;;  %v7708_v59 = vpack.c.bf16 %v1459_v35, %v1452_v22 }
  0xc9   : > { %v1759_v63 = vrot.slane %v8690_v2, 4  ;;  %v1758_v6 = vrot.slane %v1753_v54, 4 }
  0xca   : > { %1554 = vrot.lane.b32.xlu1 %v1550_v5, %s8015_s12  ;;  %1552 = vrot.lane.b32.xlu0 %v1549_v39, %s8015_s12  ;;  %v7700_v5 = vpack.c.bf16 %v1221_v44, %v1214_v30  ;;  %v1865_v39 = vrot.slane %v8668_v20, 4  ;;  %v1661_v30 = vmul.f32 %v1654_v23, %v8700_v60  ;;  %v1342_v44 = vcombine.high %v1335_v1, %v1335_v1 }
  0xcb   : > { %v1761_v17 = vsel %vm614_vm2, %v1758_v6, %v1759_v63 }
  0xcc   : > { %v8704_v31 = vpop.permute.xlu1 %2273  ;;  %v8706_v7 = vpop.permute.xlu0 %1756  ;;  %v1252_v55 = vrot.slane %v7700_v5, 6  ;;  %v1867_v49 = vsel %vm614_vm2, %v1864_v18, %v1865_v39  ;;  %v1870_v47 = vsel %vm614_vm2, %v1865_v39, %v1866_v16  ;;  %v7704_v61 = vpack.c.bf16 %v1342_v44, %v1335_v1 }
  0xcd   : > { %v10851_v43 = vrot.slane %v8706_v7, 4  ;;  %v7703_v5 = vpack.c.bf16 %v1341_v45, %v1334_v0  ;;  %v1667_v48 = vcombine.high %v1661_v30, %v1661_v30  ;;  %v1871_v16 = vsel %vm1868_vm11, %v8668_v20, %v1870_v47 }
  0xce   : > { %1136 = vrot.lane.b32.xlu1 %v7696_v32, %s8009_s24  ;;  %1134 = vrot.lane.b32.xlu0 %v7695_v41, %s8009_s24  ;;  %v8725_v32 = vcvt.s32.f32 %v2043_v42  ;;  %v7707_v41 = vpack.c.bf16 %v1458_v29, %v1451_v58  ;;  %v1763_v39 = vsel %vm10882_vm13, %v1753_v54, %v1761_v17  ;;  %v1668_v18 = vcombine.high %v1662_v26, %v1662_v26 }
  0xcf   : > { %v1764_v23 = vsel %vm614_vm2, %v1759_v63, %v10851_v43  ;;  %v1869_v63 = vsel %vm1868_vm11, %v8642_v51, %v1867_v49  ;;  %v1877_v1 = vmul.f32 %v1871_v16, %v8708_v37  ;;  %v1770_v35 = vmul.f32 %v1763_v39, %v8700_v60 }
  0xd0   : > { %v1968_v57 = vpop.permute.xlu1 %1967  ;;  %v8719_v14 = vpop.permute.xlu0 %2275  ;;  %v2057_v58 = vrot.slane %v8725_v32, %v8138_v10  ;;  %v2061_v22 = vrot.slane %v8725_v32, %v8141_v11  ;;  %v2049_v20 = vrot.slane %v8725_v32, %v8132_v8  ;;  %v1489_v51 = vrot.slane %v7707_v41, 6 }
  0xd1   : > { %v1490_v29 = vrot.slane %v7708_v59, 6  ;;  %v1876_v44 = vmul.f32 %v1869_v63, %v8700_v60  ;;  %v1973_v45 = vrot.slane %v1968_v57, 4  ;;  %v7715_v47 = vpack.c.bf16 %v1668_v18, %v1662_v26 }
  0xd2   : > { %1257 = vrot.lane.b32.xlu1 %v1252_v55, %s8010_s26  ;;  %1255 = vrot.lane.b32.xlu0 %v1251_v33, %s8010_s26  ;;  %v1765_v55 = vsel %vm10882_vm13, %v8690_v2, %v1764_v23  ;;  %v2053_v2 = vrot.slane %v8725_v32, %v8135_v9  ;;  %v7714_v17 = vpack.c.bf16 %v1667_v48, %v1661_v30  ;;  %v10849_v48 = vrot.slane %v8719_v14, 4 }
  0xd3   : > { %v1771_v23 = vmul.f32 %v8708_v37, %v1765_v55  ;;  %v1776_v16 = vcombine.high %v1770_v35, %v1770_v35  ;;  %v1883_v39 = vcombine.high %v1877_v1, %v1877_v1  ;;  %v1882_v63 = vcombine.high %v1876_v44, %v1876_v44 }
  0xd4   : > { %v8735_v42 = vpop.permute.xlu1 %1971  ;;  %v1970_v6 = vpop.permute.xlu0 %1969  ;;  %v2070_v59 = vcombine.low %v2049_v20, %v2053_v2  ;;  %v1695_v18 = vrot.slane %v7715_v47, 6  ;;  %v1694_v55 = vrot.slane %v7714_v17, 6  ;;  %v2279_v20 = vrot.slane %v8704_v31, 4 }
  0xd5   : > { %v10844_v54 = vrot.slane %v8735_v42, 4  ;;  %v1974_v0 = vrot.slane %v1970_v6, 4  ;;  %v7717_v47 = vpack.c.bf16 %v1776_v16, %v1770_v35  ;;  %v7721_v17 = vpack.c.bf16 %v1883_v39, %v1877_v1 }
  0xd6   : > { %1374 = vrot.lane.b32.xlu1 %v7704_v61, %s8016_s15  ;;  %1372 = vrot.lane.b32.xlu0 %v7703_v5, %s8016_s15  ;;  %v2071_v61 = vcombine.low %v2057_v58, %v2061_v22  ;;  %v1777_v58 = vcombine.high %v1771_v23, %v1771_v23  ;;  %vm1268_vm11 = vcmask 64512  }
  0xd7   : > { %v1976_v41 = vsel %vm614_vm2, %v1973_v45, %v1974_v0  ;;  %v1979_v5 = vsel %vm614_vm2, %v1974_v0, %v10844_v54  ;;  %v2076_v45 = vmul.f32 %v2070_v59, %v8700_v60  ;;  %v2283_v59 = vsel %vm2282_vm15, %v2279_v20, %v8704_v31 }
  0xd8   : > { %v8755_v33 = vpop.permute.xlu1 %2169  ;;  %v2168_v49 = vpop.permute.xlu0 %2167  ;;  %v1980_v22 = vsel %vm10888_vm14, %v1970_v6, %v1979_v5  ;;  %v1978_v0 = vsel %vm10888_vm14, %v1968_v57, %v1976_v41  ;;  %v7720_v6 = vpack.c.bf16 %v1882_v63, %v1876_v44  ;;  %v2284_v57 = vsel %vm614_vm2, %v2279_v20, %v10849_v48 }
  0xd9   : > { %v2173_v2 = vrot.slane %v2168_v49, 4  ;;  %v7718_v54 = vpack.c.bf16 %v1777_v58, %v1771_v23  ;;  %v2082_v44 = vcombine.high %v2076_v45, %v2076_v45  ;;  %v2285_v23 = vsel %vm2282_vm15, %v2284_v57, %v8719_v14 }
  0xda   : > { %1495 = vrot.lane.b32.xlu1 %v1490_v29, %s8008_s19  ;;  %1493 = vrot.lane.b32.xlu0 %v1489_v51, %s8008_s19  ;;  %v2077_v29 = vmul.f32 %v2071_v61, %v8708_v37  ;;  %v10850_v51 = vrot.slane %v8755_v33, 4  ;;  %v1986_v61 = vmul.f32 %v1980_v22, %v8708_v37  ;;  %v1910_v16 = vrot.slane %v7721_v17, 6 }
  0xdb   : > { %v2177_v39 = vsel %vm1506_vm0, %v2173_v2, %v2168_v49  ;;  %v1909_v58 = vrot.slane %v7720_v6, 6  ;;  %v7726_v20 = vpack.c.bf16 %v2082_v44, %v2076_v45  ;;  %v2292_v17 = vmul.f32 %v2285_v23, %v8708_v37 }
  0xdc   : > { %v8765_v30 = vpop.permute.xlu1 %2490  ;;  %v8767_v26 = vpop.permute.xlu0 %2488  ;;  %v2178_v35 = vsel %vm614_vm2, %v2173_v2, %v10850_v51  ;;  %v2083_v1 = vcombine.high %v2077_v29, %v2077_v29  ;;  %v1992_v22 = vcombine.high %v1986_v61, %v1986_v61  ;;  %v2291_v2 = vmul.f32 %v2283_v59, %v8700_v60 }
  0xdd   : > { %v2494_v31 = vrot.slane %v8767_v26, 4  ;;  %v2185_v6 = vmul.f32 %v2177_v39, %v8700_v60  ;;  %v2109_v44 = vrot.slane %v7726_v20, 6 }
  0xde   : > { %1699 = vrot.lane.b32.xlu1 %v1695_v18, %s8017_s18  ;;  %1697 = vrot.lane.b32.xlu0 %v1694_v55, %s8017_s18  ;;  %v1985_v18 = vmul.f32 %v1978_v0, %v8700_v60  ;;  %v2179_v0 = vsel %vm1506_vm0, %v2178_v35, %v8755_v33  ;;  %v7727_v49 = vpack.c.bf16 %v2083_v1, %v2077_v29 }
  0xdf   : > { %v7724_v48 = vpack.c.bf16 %v1992_v22, %v1986_v61  ;;  %v2186_v43 = vmul.f32 %v2179_v0, %v8708_v37  ;;  %v2297_v59 = vcombine.high %v2291_v2, %v2291_v2  ;;  %v2298_v61 = vcombine.high %v2292_v17, %v2292_v17 }
  0xe0   : > { %v8781_v41 = vpop.permute.xlu1 %2704  ;;  %v8783_v5 = vpop.permute.xlu0 %2702  ;;  %v2110_v1 = vrot.slane %v7727_v49, 6  ;;  %v2498_v23 = vsel %vm1147_vm1, %v2494_v31, %v8767_v26 }
  0xe1   : > { %v2708_v0 = vrot.slane %v8783_v5, 4 }
  0xe2   : > { %1805 = vrot.lane.b32.xlu1 %v7718_v54, %s10899_s20  ;;  %1803 = vrot.lane.b32.xlu0 %v7717_v47, %s10899_s20  ;;  %v1991_v54 = vcombine.high %v1985_v18, %v1985_v18  ;;  %v10855_v47 = vrot.slane %v8765_v30, 4 }
  0xe4   : > { %v8796_v63 = vpop.permute.xlu1 %960  ;;  %v8798_v55 = vpop.permute.xlu0 %719  ;;  %v7723_v51 = vpack.c.bf16 %v1991_v54, %v1985_v18  ;;  %v2191_v18 = vcombine.high %v2185_v6, %v2185_v6  ;;  %v2192_v54 = vcombine.high %v2186_v43, %v2186_v43 }
  0xe5   : > { %v10868_v34 = vrot.slane %v8798_v55, 4 }
  0xe6   : > { %1914 = vrot.lane.b32.xlu1 %v1910_v16, %s8019_s14  ;;  %1912 = vrot.lane.b32.xlu0 %v1909_v58, %s8019_s14  ;;  %v2499_v16 = vsel %vm614_vm2, %v2494_v31, %v10855_v47  ;;  %v2506_v31 = vmul.f32 %v2498_v23, %v8700_v60  ;;  %v7733_v47 = vpack.c.bf16 %v2298_v61, %v2292_v17 }
  0xe7   : > { %v2500_v39 = vsel %vm1147_vm1, %v2499_v16, %v8765_v30  ;;  %v7729_v62 = vpack.c.bf16 %v2191_v18, %v2185_v6  ;;  %v7730_v23 = vpack.c.bf16 %v2192_v54, %v2186_v43  ;;  %v2711_v43 = vsel %vm10892_vm4, %v2708_v0, %v8783_v5 }
  0xe8   : > { %v8809_v57 = vpop.permute.xlu1 %2384  ;;  %v2383_v35 = vpop.permute.xlu0 %2382  ;;  %v2507_v19 = vmul.f32 %v2500_v39, %v8708_v37  ;;  %v2325_v6 = vrot.slane %v7733_v47, 6  ;;  %v728_v18 = vsel %vm614_vm2, %v722_v13, %v10868_v34  ;;  %v10867_v47 = vrot.slane %v8796_v63, 4 }
  0xe9   : > { %v10854_v29 = vrot.slane %v8809_v57, 4  ;;  %v2388_v45 = vrot.slane %v2383_v35, 4  ;;  %v2720_v52 = vmul.f32 %v2711_v43, %v8700_v60  ;;  %v729_v13 = vsel %vm10892_vm4, %v728_v18, %v8798_v55  ;;  %v8890_v43 = vld [vmem:[#allocation2 + $0x10] sm:$0xff] }
  0xea   : > { %2020 = vrot.lane.b32.xlu1 %v7724_v48, %s8020_s17  ;;  %2018 = vrot.lane.b32.xlu0 %v7723_v51, %s8020_s17  ;;  %v10863_v51 = vrot.slane %v8781_v41, 4 }
  0xeb   : > { %v2393_v58 = vsel %vm614_vm2, %v2388_v45, %v10854_v29  ;;  %v2392_v49 = vsel %vm1268_vm11, %v2388_v45, %v2383_v35  ;;  %v7732_v29 = vpack.c.bf16 %v2297_v59, %v2291_v2  ;;  %v2513_v59 = vcombine.high %v2507_v19, %v2507_v19 }
  0xec   : > { %v8825_v22 = vpop.permute.xlu1 %2599  ;;  %v2598_v48 = vpop.permute.xlu0 %2597  ;;  %v2394_v26 = vsel %vm1268_vm11, %v2393_v58, %v8809_v57  ;;  %v2400_v35 = vmul.f32 %v2392_v49, %v8700_v60 }
  0xed   : > { %v10862_v20 = vrot.slane %v8825_v22, 4  ;;  %v2603_v16 = vrot.slane %v2598_v48, 4  ;;  %v2401_v15 = vmul.f32 %v2394_v26, %v8708_v37  ;;  %v2324_v17 = vrot.slane %v7732_v29, 6 }
  0xee   : > { %2114 = vrot.lane.b32.xlu1 %v2110_v1, %s8015_s12  ;;  %2112 = vrot.lane.b32.xlu0 %v2109_v44, %s8015_s12  ;;  %v2712_v1 = vsel %vm614_vm2, %v2708_v0, %v10863_v51  ;;  %v2512_v44 = vcombine.high %v2506_v31, %v2506_v31  ;;  %v2406_v39 = vcombine.high %v2400_v35, %v2400_v35 }
  0xef   : > { %v2607_v2 = vsel %vm614_vm2, %v2603_v16, %v10862_v20  ;;  %v2713_v61 = vsel %vm10892_vm4, %v2712_v1, %v8781_v41  ;;  %v2606_v5 = vsel %vm10891_vm3, %v2603_v16, %v2598_v48 }
  0xf0   : > { %v8839_v45 = vpop.permute.xlu1 %843  ;;  %v608_v58 = vpop.permute.xlu0 %607  ;;  %v2608_v29 = vsel %vm10891_vm3, %v2607_v2, %v8825_v22  ;;  %v7738_v0 = vpack.c.bf16 %v2512_v44, %v2506_v31  ;;  %v2721_v1 = vmul.f32 %v2713_v61, %v8708_v37  ;;  %v7735_v20 = vpack.c.bf16 %v2406_v39, %v2400_v35 }
  0xf1   : > { %v611_v26 = vrot.slane %v608_v58, 4  ;;  %v2614_v48 = vmul.f32 %v2606_v5, %v8700_v60  ;;  %v2615_v2 = vmul.f32 %v2608_v29, %v8708_v37  ;;  %v7984_v29 = vld [vmem:[#allocation3 + $0x1] sm:$0x3f] }
  0xf2   : > { %2220 = vrot.lane.b32.xlu1 %v7730_v23, %s8000_s22  ;;  %2218 = vrot.lane.b32.xlu0 %v7729_v62, %s8000_s22  ;;  %v2407_v62 = vcombine.high %v2401_v15, %v2401_v15  ;;  %v7739_v23 = vpack.c.bf16 %v2513_v59, %v2507_v19  ;;  %v10866_v19 = vrot.slane %v8839_v45, 4  ;;  %v736_v59 = vmul.f32 %v8890_v43, %v729_v13 }
  0xf3   : > { %v617_v35 = vsel %vm614_vm2, %v610_v40, %v611_v26  ;;  %v2728_v61 = vcombine.high %v2721_v1, %v2721_v1  ;;  %v2621_v39 = vcombine.high %v2615_v2, %v2615_v2 }
  0xf4   : > { %v8859_v54 = vpop.permute.xlu1 %2938  ;;  %v8861_v49 = vpop.permute.xlu0 %2936  ;;  %v7736_v44 = vpack.c.bf16 %v2407_v62, %v2401_v15  ;;  %v2727_v15 = vcombine.high %v2720_v52, %v2720_v52  ;;  %v2540_v40 = vrot.slane %v7739_v23, 6  ;;  %v618_v5 = vsel %vm10891_vm3, %v617_v35, %v608_v58 }
  0xf5   : > { %v7745_v23 = vpack.c.bf16 %v2728_v61, %v2721_v1  ;;  %v7742_v35 = vpack.c.bf16 %v2621_v39, %v2615_v2  ;;  %v2942_v61 = vrot.slane %v8861_v49, 4 }
  0xf6   : > { %2329 = vrot.lane.b32.xlu1 %v2325_v6, %s8021_s21  ;;  %2327 = vrot.lane.b32.xlu0 %v2324_v17, %s8021_s21  ;;  %v969_v17 = vsel %vm614_vm2, %v963_v27, %v10867_v47  ;;  %v2539_v6 = vrot.slane %v7738_v0, 6  ;;  %v2620_v27 = vcombine.high %v2614_v48, %v2614_v48  ;;  %v3491_v0 = vshra.s32 %v7984_v29, 26 }
  0xf7   : > { %v970_v50 = vsel %vm10893_vm6, %v969_v17, %v8796_v63  ;;  %v7744_v26 = vpack.c.bf16 %v2727_v15, %v2720_v52 }
  0xf8   : > { %v8874_v16 = vpop.permute.xlu1 %3172  ;;  %v8876_v31 = vpop.permute.xlu0 %3170  ;;  %v977_v13 = vmul.f32 %v8890_v43, %v970_v50  ;;  %v7741_v17 = vpack.c.bf16 %v2620_v27, %v2614_v48  ;;  %v3492_v29 = vand.u32 1, %v3491_v0 }
  0xf9   : > { %v2758_v52 = vrot.slane %v7744_v26, 6 }
  0xfa   : > { %2435 = vrot.lane.b32.xlu1 %v7736_v44, %s7999_s25  ;;  %2433 = vrot.lane.b32.xlu0 %v7735_v20, %s7999_s25  ;;  %v10947_v20 = vrot.slane %v8541_v3, 4  ;;  %v743_v44 = vcombine.high %v736_v59, %v736_v59  ;;  %v624_v3 = vmul.f32 %v8890_v43, %v618_v5  ;;  %v8920_v39 = vcvt.s32.f32 %v3492_v29 }
  0xfc   : > { %v8895_v18 = vpop.permute.xlu1 %1436  ;;  %v8897_v25 = vpop.permute.xlu0 %1198  ;;  %v852_v62 = vsel %vm614_vm2, %v10947_v20, %v10866_v19  ;;  %v7685_v1 = vpack.c.bf16 %v743_v44, %v736_v59  ;;  %v630_v48 = vcombine.high %v624_v3, %v624_v3  ;;  %v2945_v44 = vsel %vm10893_vm6, %v2942_v61, %v8861_v49 }
  0xfd   : > { %v853_v51 = vsel %vm848_vm5, %v852_v62, %v8839_v45  ;;  %v10865_v62 = vrot.slane %v8859_v54, 4  ;;  %v1548_v19 = vrot.slane %v8620_v28, %v8256_v38 }
  0xfe   : > { %2544 = vrot.lane.b32.xlu1 %v2540_v40, %s8001_s29  ;;  %2542 = vrot.lane.b32.xlu0 %v2539_v6, %s8001_s29  ;;  %v984_v6 = vcombine.high %v977_v13, %v977_v13  ;;  %v860_v15 = vmul.f32 %v8890_v43, %v853_v51  ;;  %v2759_v40 = vrot.slane %v7745_v23, 6  ;;  %v774_v0 = vrot.slane %v7685_v1, 6 }
  0xff   : > { %v7682_v26 = vpack.c.bf16 %v630_v48, %v624_v3  ;;  %v3498_v3 = vrot.slane %v8920_v39, %v8132_v8  ;;  %v2954_v48 = vmul.f32 %v2945_v44, %v8700_v60 }
 0x100   : > { %v8911_v20 = vpop.permute.xlu1 %2823  ;;  %v2822_v58 = vpop.permute.xlu0 %2821  ;;  %v7693_v51 = vpack.c.bf16 %v984_v6, %v977_v13  ;;  %v867_v59 = vcombine.high %v860_v15, %v860_v15  ;;  %v3510_v13 = vrot.slane %v8920_v39, %v8141_v11 }
 0x101   : > { %v2827_v2 = vrot.slane %v2822_v58, 4  ;;  %v10864_v5 = vrot.slane %v8911_v20, 4  ;;  %v2961_v47 = vcombine.high %v2954_v48, %v2954_v48 }
 0x102   : > { %2649 = vrot.lane.b32.xlu1 %v7742_v35, %s8011_s23  ;;  %2647 = vrot.lane.b32.xlu0 %v7741_v17, %s8011_s23  ;;  %v2946_v35 = vsel %vm614_vm2, %v2942_v61, %v10865_v62  ;;  %v1015_v6 = vrot.slane %v7693_v51, 6  ;;  %v7689_v1 = vpack.c.bf16 %v867_v59, %v860_v15  ;;  %v8958_v62 = vld [vmem:[#allocation2 + $0xc] sm:$0xff] }
 0x103   : > { %v2830_v29 = vsel %vm848_vm5, %v2827_v2, %v2822_v58  ;;  %v2831_v49 = vsel %vm614_vm2, %v2827_v2, %v10864_v5  ;;  %v3502_v58 = vrot.slane %v8920_v39, %v8135_v9  ;;  %v2947_v61 = vsel %vm10893_vm6, %v2946_v35, %v8859_v54 }
 0x104   : > { %v8917_v50 = vpop.permute.xlu1 %3057  ;;  %v3056_v27 = vpop.permute.xlu0 %3055  ;;  %v3176_v2 = vrot.slane %v8876_v31, 4  ;;  %v2832_v15 = vsel %vm848_vm5, %v2831_v49, %v8911_v20  ;;  %v2955_v34 = vmul.f32 %v2947_v61, %v8958_v62  ;;  %v7752_v11 = vpack.c.bf16 %v2961_v47, %v2954_v48 }
 0x105   : > { %v3061_v51 = vrot.slane %v3056_v27, 4  ;;  %v10874_v44 = vrot.slane %v8917_v50, 4  ;;  %v3519_v35 = vcombine.low %v3498_v3, %v3502_v58  ;;  %v2840_v3 = vmul.f32 %v2832_v15, %v8708_v37 }
 0x106   : > { %2764 = vrot.lane.b32.xlu1 %v2759_v40, %s8013_s28  ;;  %2762 = vrot.lane.b32.xlu0 %v2758_v52, %s8013_s28  ;;  %v3506_v52 = vrot.slane %v8920_v39, %v8138_v10  ;;  %v10869_v40 = vrot.slane %v8874_v16, 4  ;;  %v3179_v58 = vsel %vm10896_vm7, %v3176_v2, %v8876_v31  ;;  %v10876_v15 = vrot.slane %v8897_v25, 4 }
 0x107   : > { %v2962_v31 = vcombine.high %v2955_v34, %v2955_v34 }
 0x108   : > { %v8927_v17 = vpop.permute.xlu1 %1319  ;;  %v8929_v23 = vpop.permute.xlu0 %1081  ;;  %v3520_v59 = vcombine.low %v3506_v52, %v3510_v13  ;;  %v3180_v52 = vsel %vm614_vm2, %v3176_v2, %v10869_v40 }
 0x109   : > { %v10875_v61 = vrot.slane %v8929_v23, 4  ;;  %v3181_v37 = vsel %vm10896_vm7, %v3180_v52, %v8874_v16  ;;  %v10950_v52 = vrot.slane %v8555_v21, 4 }
 0x10a   : > { %780 = vrot.lane.b32.xlu1 %v774_v0, %s8013_s28  ;;  %659 = vrot.lane.b32.xlu0 %v7682_v26, %s8011_s23  ;;  %v2839_v0 = vmul.f32 %v2830_v29, %v8700_v60  ;;  %v1544_v29 = vrot.slane %v8620_v28, %v8252_v36  ;;  %v3065_v28 = vsel %vm614_vm2, %v3061_v51, %v10874_v44 }
 0x10c   : > { %v8954_v26 = vpop.permute.xlu1 %3406  ;;  %v8956_v5 = vpop.permute.xlu0 %3404  ;;  %v2846_v13 = vcombine.high %v2839_v0, %v2839_v0  ;;  %v1551_v40 = vcombine.low %v1544_v29, %v1548_v19  ;;  %v3066_v19 = vsel %vm10895_vm9, %v3065_v28, %v8917_v50  ;;  %v2992_v29 = vrot.slane %v7752_v11, 6 }
 0x10e   : > { %1021 = vrot.lane.b32.xlu1 %v1015_v6, %s8014_s30  ;;  %900 = vrot.lane.b32.xlu0 %v7689_v1, %s8012_s27  ;;  %v3064_v1 = vsel %vm10895_vm9, %v3061_v51, %v3056_v27  ;;  %v3188_v27 = vmul.f32 %v3179_v58, %v8700_v60  ;;  %v7748_v2 = vpack.c.bf16 %v2846_v13, %v2839_v0 }
 0x10f   : > { %v3073_v10 = vmul.f32 %v3064_v1, %v8700_v60  ;;  %v1207_v13 = vsel %vm614_vm2, %v10950_v52, %v10876_v15  ;;  %v7753_v58 = vpack.c.bf16 %v2962_v31, %v2955_v34  ;;  %v3189_v1 = vmul.f32 %v3181_v37, %v8958_v62 }
 0x110   : > { %v8973_v49 = vpop.permute.xlu1 %3291  ;;  %v8975_v6 = vpop.permute.xlu0 %3289  ;;  %v3195_v28 = vcombine.high %v3188_v27, %v3188_v27  ;;  %v1208_v21 = vsel %vm10896_vm7, %v1207_v13, %v8897_v25  ;;  %v10952_v34 = vrot.slane %v8611_v12, 4  ;;  %v10954_v31 = vrot.slane %v8582_v46, 4 }
 0x111   : > { %10948 = vst [vmem:[#allocation11_spill] sm:$0xff] %v8973_v49  ;;  %v3080_v47 = vcombine.high %v3073_v10, %v3073_v10  ;;  %v3410_v46 = vrot.slane %v8956_v5, 4 }
 0x112   : > { %3524 = vrot.lane.b32.xlu1 %v3520_v59, %s8015_s12  ;;  %3522 = vrot.lane.b32.xlu0 %v3519_v35, %s8015_s12  ;;  %v2847_v59 = vcombine.high %v2840_v3, %v2840_v3  ;;  %v10949_v35 = vrot.slane %v8604_v24, 4  ;;  %v7760_v52 = vpack.c.bf16 %v3195_v28, %v3188_v27 }
 0x113   : > { %v7756_v13 = vpack.c.bf16 %v3080_v47, %v3073_v10  ;;  %v10880_v10 = vrot.slane %v8954_v26, 4  ;;  %v10879_v47 = vrot.slane %v8973_v49, 4 }
 0x114   : > { %v8992_v51 = vpop.permute.xlu1 %2171  ;;  %v8994_v44 = vpop.permute.xlu0 %2277  ;;  %v1090_v0 = vsel %vm614_vm2, %v10949_v35, %v10875_v61  ;;  %v7749_v35 = vpack.c.bf16 %v2847_v59, %v2840_v3  ;;  %v10953_v3 = vrot.slane %v8895_v18, 4  ;;  %v3226_v28 = vrot.slane %v7760_v52, 6 }
 0x115   : > { %v1091_v11 = vsel %vm10895_vm9, %v1090_v0, %v8929_v23  ;;  %v3196_v0 = vcombine.high %v3189_v1, %v3189_v1  ;;  %v2281_v8 = vrot.slane %v8994_v44, 4 }
 0x116   : > { %2877 = vrot.lane.b32.xlu1 %v7748_v2, %s8012_s27  ;;  %1556 = vrot.lane.b32.xlu0 %v1551_v40, %s8015_s12  ;;  %v3074_v2 = vmul.f32 %v3066_v19, %v8958_v62  ;;  %v10951_v40 = vrot.slane %v8927_v17, 4  ;;  %v1445_v59 = vsel %vm614_vm2, %v10954_v31, %v10953_v3  ;;  %v2993_v19 = vrot.slane %v7753_v58, 6 }
 0x117   : > { %v1098_v61 = vmul.f32 %v8890_v43, %v1091_v11  ;;  %v1446_v27 = vsel %vm1441_vm8, %v1445_v59, %v8895_v18  ;;  %v7761_v58 = vpack.c.bf16 %v3196_v0, %v3189_v1  ;;  %v3414_v1 = vsel %vm614_vm2, %v3410_v46, %v10880_v10 }
 0x118   : > { %v9013_v48 = vpop.permute.xlu1 %2706  ;;  %v9015_v24 = vpop.permute.xlu0 %2492  ;;  %v1328_v37 = vsel %vm614_vm2, %v10952_v34, %v10951_v40  ;;  %v3081_v40 = vcombine.high %v3074_v2, %v3074_v2  ;;  %v3295_v34 = vrot.slane %v8975_v6, 4  ;;  %v1453_v59 = vmul.f32 %v8890_v43, %v1446_v27  ;;  %v9074_v27 = vld [vmem:[#allocation2 + $0x14] sm:$0xff] }
 0x11a   : > { %2996 = vrot.lane.b32.xlu1 %v2992_v29, %s8014_s30  ;;  %2879 = vrot.lane.b32.xlu0 %v7749_v35, %s8012_s27  ;;  %v1215_v29 = vmul.f32 %v8890_v43, %v1208_v21  ;;  %v1329_v35 = vsel %vm10885_vm10, %v1328_v37, %v8927_v17  ;;  %v1105_v21 = vcombine.high %v1098_v61, %v1098_v61 }
 0x11b   : > { %v1336_v11 = vmul.f32 %v8890_v43, %v1329_v35  ;;  %v7757_v31 = vpack.c.bf16 %v3081_v40, %v3074_v2  ;;  %v3299_v2 = vsel %vm614_vm2, %v3295_v34, %v10879_v47  ;;  %v3227_v43 = vrot.slane %v7761_v58, 6 }
 0x11c   : > { %v9035_v15 = vpop.permute.xlu1 %2601  ;;  %v9037_v12 = vpop.permute.xlu0 %2386  ;;  %v1222_v9 = vcombine.high %v1215_v29, %v1215_v29  ;;  %v7697_v52 = vpack.c.bf16 %v1105_v21, %v1098_v61  ;;  %v3415_v61 = vsel %vm1441_vm8, %v3414_v1, %v8954_v26  ;;  %v3300_v58 = vsel %vm10885_vm10, %v3299_v2, %v8973_v49 }
 0x11d   : > { %v1343_v0 = vcombine.high %v1336_v11, %v1336_v11  ;;  %v3308_v1 = vmul.f32 %v3300_v58, %v8958_v62  ;;  %v2065_v2 = vrot.slane %v8725_v32, %v8252_v36 }
 0x11e   : > { %3111 = vrot.lane.b32.xlu1 %v7756_v13, %s8009_s24  ;;  %2998 = vrot.lane.b32.xlu0 %v2993_v19, %s8014_s30  ;;  %v3413_v19 = vsel %vm1441_vm8, %v3410_v46, %v8956_v5  ;;  %v3298_v13 = vsel %vm10885_vm10, %v3295_v34, %v8975_v6  ;;  %v7701_v34 = vpack.c.bf16 %v1222_v9, %v1215_v29  ;;  %vm789_vm10 = vcmask 138240  }
 0x11f   : > { %v3422_v5 = vmul.f32 %v3413_v19, %v8700_v60  ;;  %v3307_v40 = vmul.f32 %v3298_v13, %v8700_v60  ;;  %v7705_v21 = vpack.c.bf16 %v1343_v0, %v1336_v11  ;;  %v2069_v11 = vrot.slane %v8725_v32, %v8256_v38  ;;  %v9114_v32 = vld [vmem:[#allocation2 + $0x14] sm:$0xff] }
 0x120   : > { %v9051_v37 = vpop.permute.xlu1 %3174  ;;  %v9053_v3 = vpop.permute.xlu0 %2940  ;;  %v1253_v29 = vrot.slane %v7701_v34, 6  ;;  %v3315_v58 = vcombine.high %v3308_v1, %v3308_v1 }
 0x121   : > { %v3429_v19 = vcombine.high %v3422_v5, %v3422_v5  ;;  %v3314_v13 = vcombine.high %v3307_v40, %v3307_v40 }
 0x122   : > { %3230 = vrot.lane.b32.xlu1 %v3226_v28, %s8010_s26  ;;  %3113 = vrot.lane.b32.xlu0 %v7757_v31, %s8009_s24  ;;  %v10955_v28 = vrot.slane %v8644_v53, 4  ;;  %v1460_v31 = vcombine.high %v1453_v59, %v1453_v59 }
 0x124   : > { %v9070_v6 = vpop.permute.xlu1 %3059  ;;  %v9072_v35 = vpop.permute.xlu0 %2825  ;;  %v1657_v46 = vsel %vm10881_vm12, %v8644_v53, %v10955_v28  ;;  %v7709_v9 = vpack.c.bf16 %v1460_v31, %v1453_v59  ;;  %v3423_v28 = vmul.f32 %v3415_v61, %v8958_v62  ;;  %v10956_v59 = vrot.slane %v8706_v7, 4 }
 0x125   : > { %v1663_v60 = vmul.f32 %v1657_v46, %v9074_v27  ;;  %v7768_v62 = vpack.c.bf16 %v3429_v19, %v3422_v5  ;;  %v7764_v46 = vpack.c.bf16 %v3314_v13, %v3307_v40  ;;  %vm10920_vm12 = vcmask 146432  }
 0x126   : > { %1138 = vrot.lane.b32.xlu1 %v7697_v52, %s8009_s24  ;;  %3232 = vrot.lane.b32.xlu0 %v3227_v43, %s8010_s26  ;;  %v1878_v43 = vmul.f32 %v8684_v56, %v9074_v27  ;;  %v1766_v52 = vsel %vm10882_vm13, %v8706_v7, %v10956_v59  ;;  %v1491_v61 = vrot.slane %v7709_v9, 6  ;;  %v2072_v56 = vcombine.low %v2065_v2, %v2069_v11  ;;  %v683_v59 = vld [vmem:[#allocation2 + $0x18] sm:$0xf] }
 0x127   : > { %v1669_v0 = vcombine.high %v1663_v60, %v1663_v60  ;;  %v1772_v10 = vmul.f32 %v1766_v52, %v9074_v27  ;;  %vm10889_vm13 = vcmask 130048   ;;  %v3460_v5 = vrot.slane %v7768_v62, 6 }
 0x128   : > { %v9087_v47 = vpop.permute.xlu1 %3293  ;;  %v9089_v53 = vpop.permute.xlu0 %3408  ;;  %v2175_v40 = vrot.slane %v8992_v51, 4 }
 0x129   : > { %v7716_v7 = vpack.c.bf16 %v1669_v0, %v1663_v60  ;;  %v2078_v0 = vmul.f32 %v9114_v32, %v2072_v56  ;;  %v1778_v4 = vcombine.high %v1772_v10, %v1772_v10 }
 0x12a   : > { %1376 = vrot.lane.b32.xlu1 %v7705_v21, %s8016_s15  ;;  %1259 = vrot.lane.b32.xlu0 %v1253_v29, %s8010_s26  ;;  %v3430_v21 = vcombine.high %v3423_v28, %v3423_v28  ;;  %v1884_v29 = vcombine.high %v1878_v43, %v1878_v43 }
 0x12c   : > { %v9105_v31 = vpop.permute.xlu1 %657  ;;  %v656_v34 = vpop.permute.xlu0 %655  ;;  %v7769_v52 = vpack.c.bf16 %v3430_v21, %v3423_v28  ;;  %v7722_v62 = vpack.c.bf16 %v1884_v29, %v1878_v43  ;;  %v1696_v28 = vrot.slane %v7716_v7, 6 }
 0x12d   : > { %v661_v19 = vrot.slane %v656_v34, 4 }
 0x12e   : > { %3345 = vrot.lane.b32.xlu1 %v7764_v46, %s8016_s15  ;;  %1497 = vrot.lane.b32.xlu0 %v1491_v61, %s8008_s19  ;;  %v7765_v46 = vpack.c.bf16 %v3315_v58, %v3308_v1  ;;  %v10957_v61 = vrot.slane %v9105_v31, 4  ;;  %v10958_v58 = vrot.slane %v8735_v42, 4 }
 0x130   : > { %v9112_v13 = vpop.permute.xlu1 %898  ;;  %v897_v9 = vpop.permute.xlu0 %896  ;;  %v665_v60 = vsel %vm614_vm2, %v661_v19, %v10957_v61  ;;  %v1981_v21 = vsel %vm10888_vm14, %v8735_v42, %v10958_v58  ;;  %v10959_v19 = vrot.slane %v8798_v55, 4  ;;  %v807_v61 = vld [vmem:[#allocation2 + $0x18] sm:$0xf]  ;;  %v3461_v42 = vrot.slane %v7769_v52, 6 }
 0x131   : > { %v905_v2 = vrot.slane %v9112_v13, 4  ;;  %v904_v11 = vrot.slane %v897_v9, 4  ;;  %v667_v49 = vsel %vm10920_vm12, %v656_v34, %v665_v60  ;;  %v10961_v58 = vrot.slane %v8719_v14, 4 }
 0x132   : > { %3464 = vrot.lane.b32.xlu1 %v3460_v5, %s8008_s19  ;;  %3347 = vrot.lane.b32.xlu0 %v7765_v46, %s8016_s15  ;;  %v924_v5 = vld [vmem:[#allocation2 + $0x18] sm:$0xf]  ;;  %v737_v56 = vmul.f32 %v10959_v19, %v683_v59  ;;  %674 = vst [vmem:[#allocation4] sm:$0x33] %v667_v49  ;;  %vm1030_vm14 = vcmask 80896   ;;  %v2084_v49 = vcombine.high %v2078_v0, %v2078_v0  ;;  %v10963_v14 = vrot.slane %v8839_v45, 4 }
 0x133   : > { %v908_v1 = vsel %vm614_vm2, %v904_v11, %v905_v2  ;;  %v10960_v11 = vrot.slane %v8755_v33, 4  ;;  %v2286_v55 = vsel %vm614_vm2, %v10961_v58, %v2281_v8  ;;  %v7719_v59 = vpack.c.bf16 %v1778_v4, %v1772_v10 }
 0x134   : > { %v910_v43 = vsel %vm10889_vm13, %v897_v9, %v908_v1  ;;  %v9135_v34 = vpop.permute.xlu1 %778  ;;  %v777_v29 = vpop.permute.xlu0 %776  ;;  %v1911_v9 = vrot.slane %v7722_v62, 6  ;;  %v1987_v1 = vmul.f32 %v1981_v21, %v9074_v27  ;;  %v861_v8 = vmul.f32 %v10963_v14, %v807_v61  ;;  %v1162_v61 = vld [vmem:[#allocation2 + $0x18] sm:$0xf] }
 0x135   : > { %v2180_v7 = vsel %vm614_vm2, %v10960_v11, %v2175_v40  ;;  %918 = vst [vmem:[#allocation4 + $0x18] sm:$0x33] %v910_v43  ;;  %v785_v46 = vrot.slane %v9135_v34, 4  ;;  %v784_v60 = vrot.slane %v777_v29, 4  ;;  %v10962_v40 = vrot.slane %v8796_v63, 4 }
 0x136   : > { %1701 = vrot.lane.b32.xlu1 %v1696_v28, %s8017_s18  ;;  %3466 = vrot.lane.b32.xlu0 %v3461_v42, %s8008_s19  ;;  %v2181_v28 = vsel %vm1506_vm0, %v2180_v7, %v8992_v51  ;;  %v7686_v21 = vpack.c.bf16 %v737_v56, %v737_v56  ;;  %v2287_v19 = vsel %vm2282_vm15, %v2286_v55, %v8994_v44  ;;  %vm1562_vm13 = vcmask 596992  }
 0x137   : > { %v788_v33 = vsel %vm614_vm2, %v784_v60, %v785_v46  ;;  %v978_v52 = vmul.f32 %v10962_v40, %v924_v5  ;;  %v9163_v45 = vpack.c.bf16 %v2084_v49, %v2078_v0  ;;  %v1993_v5 = vcombine.high %v1987_v1, %v1987_v1  ;;  %v1518_v40 = vld [vmem:[#allocation2 + $0x4] sm:$0xff] }
 0x138   : > { %v790_v62 = vsel %vm789_vm10, %v777_v29, %v788_v33  ;;  %v9157_v4 = vpop.permute.xlu1 %1019  ;;  %v1018_v10 = vpop.permute.xlu0 %1017  ;;  %v2187_v51 = vmul.f32 %v2181_v28, %v9074_v27  ;;  %v7690_v56 = vpack.c.bf16 %v861_v8, %v861_v8  ;;  %v2293_v11 = vmul.f32 %v2287_v19, %v9074_v27  ;;  %v1400_v8 = vld [vmem:[#allocation2 + $0x18] sm:$0xf] }
 0x139   : > { %798 = vst [vmem:[#allocation4] sm:$0xcc] %v790_v62  ;;  %v1026_v43 = vrot.slane %v9157_v4, 4  ;;  %v1025_v63 = vrot.slane %v1018_v10, 4  ;;  %v7694_v44 = vpack.c.bf16 %v978_v52, %v978_v52  ;;  %v775_v42 = vrot.slane %v7686_v21, 6 }
 0x13a   : > { %1916 = vrot.lane.b32.xlu1 %v1911_v9, %s8019_s14  ;;  %1807 = vrot.lane.b32.xlu0 %v7719_v59, %s10899_s20  ;;  %v2496_v58 = vrot.slane %v9015_v24, 4  ;;  %v10964_v9 = vrot.slane %v8897_v25, 4  ;;  %v2390_v33 = vrot.slane %v9037_v12, 4  ;;  %v2111_v52 = vrot.slane %v9163_v45, 6  ;;  %v1045_v28 = vld [vmem:[#allocation2 + $0x18] sm:$0xf] }
 0x13b   : > { %v1029_v29 = vsel %vm614_vm2, %v1025_v63, %v1026_v43  ;;  %v7725_v14 = vpack.c.bf16 %v1993_v5, %v1987_v1  ;;  %v2193_v62 = vcombine.high %v2187_v51, %v2187_v51  ;;  %v1016_v25 = vrot.slane %v7694_v44, 6  ;;  %s8032_s20 = smov 48  }
 0x13c   : > { %v1031_v7 = vsel %vm1030_vm14, %v1018_v10, %v1029_v29  ;;  %v9172_v60 = vpop.permute.xlu1 %1554  ;;  %v1553_v0 = vpop.permute.xlu0 %1552  ;;  %v9178_v59 = vmul.f32 %v10964_v9, %v1162_v61  ;;  %v2710_v10 = vrot.slane %v9013_v48, 4  ;;  %v2299_v19 = vcombine.high %v2293_v11, %v2293_v11 }
 0x13d   : > { %1039 = vst [vmem:[#allocation4 + $0x18] sm:$0xcc] %v1031_v7  ;;  %v10890_v55 = vrot.slane %v9172_v60, 4  ;;  %v1558_v49 = vrot.slane %v1553_v0, 4  ;;  %v2605_v63 = vrot.slane %v9035_v15, 4  ;;  %v10965_v45 = vrot.slane %v8765_v30, 4 }
 0x13e   : > { %902 = vrot.lane.b32.xlu1 %v7690_v56, %s8012_s27  ;;  %782 = vrot.lane.b32.xlu0 %v775_v42, %s8013_s28  ;;  %v7702_v44 = vpack.c.bf16 %v9178_v59, %v9178_v59  ;;  %v10970_v59 = vrot.slane %v8825_v22, 4  ;;  %vm1385_vm15 = vcmask 15360  }
 0x13f   : > { %v1561_v21 = vsel %vm614_vm2, %v1558_v49, %v10890_v55  ;;  %v2501_v5 = vsel %vm614_vm2, %v10965_v45, %v2496_v58  ;;  %v10966_v49 = vrot.slane %v8895_v18, 4  ;;  %v10968_v55 = vrot.slane %v8809_v57, 4  ;;  %v1283_v58 = vld [vmem:[#allocation2 + $0x18] sm:$0xf] }
 0x140   : > { %v1563_v61 = vsel %vm1562_vm13, %v1553_v0, %v1561_v21  ;;  %v9190_v29 = vpop.permute.xlu1 %1136  ;;  %v1135_v1 = vpop.permute.xlu0 %1134  ;;  %v10967_v0 = vrot.slane %v8929_v23, 4  ;;  %v10969_v18 = vrot.slane %v8781_v41, 4  ;;  %v7734_v57 = vpack.c.bf16 %v2299_v19, %v2293_v11 }
 0x141   : > { %v1570_v56 = vmul.f32 %v1563_v61, %v1518_v40  ;;  %v1143_v7 = vrot.slane %v9190_v29, 4  ;;  %v1142_v9 = vrot.slane %v1135_v1, 4  ;;  %v9198_v42 = vmul.f32 %v10966_v49, %v1400_v8 }
 0x142   : > { %v1099_v21 = vmul.f32 %v10967_v0, %v1045_v28  ;;  %v2395_v30 = vsel %vm614_vm2, %v10968_v55, %v2390_v33  ;;  %2022 = vrot.lane.b32.xlu1 %v7725_v14, %s8020_s17  ;;  %v7731_v40 = vpack.c.bf16 %v2193_v62, %v2187_v51  ;;  %v2714_v8 = vsel %vm614_vm2, %v10969_v18, %v2710_v10 }
 0x143   : > { %v1576_v61 = vcombine.high %v1570_v56, %v1570_v56  ;;  %v1146_v23 = vsel %vm614_vm2, %v1142_v9, %v1143_v7  ;;  %1023 = vrot.lane.b32.xlu0 %v1016_v25, %s8014_s30  ;;  %v2502_v55 = vsel %vm1147_vm1, %v2501_v5, %v9015_v24  ;;  %v2609_v51 = vsel %vm614_vm2, %v10970_v59, %v2605_v63 }
 0x144   : > { %v1148_v33 = vsel %vm1147_vm1, %v1135_v1, %v1146_v23  ;;  %v9223_v41 = vpop.permute.xlu1 %1257  ;;  %v1256_v14 = vpop.permute.xlu0 %1255  ;;  %v7903_v28 = vld [vmem:[#allocation4 + $0x4] ss:$24 sps:$4 sm:$0xff]   ;;  %v7905_v62 = vld [vmem:[#allocation4] ss:$24 sps:$4 sm:$0xff]   ;;  %v2396_v45 = vsel %vm1268_vm11, %v2395_v30, %v9037_v12  ;;  %v10971_v24 = vrot.slane %v8927_v17, 4  ;;  %v7698_v19 = vpack.c.bf16 %v1099_v21, %v1099_v21 }
 0x145   : > { %v7711_v9 = vpack.c.bf16 %v1576_v61, %v1570_v56  ;;  %1156 = vst [vmem:[#allocation4 + $0x30] sm:$0x33] %v1148_v33  ;;  %v1264_v11 = vrot.slane %v9223_v41, 4  ;;  %v1263_v25 = vrot.slane %v1256_v14, 4  ;;  %v2944_v63 = vrot.slane %v9053_v3, 4  ;;  %3854 = vmatprep.subr.bf16.mxu0 %v7903_v28 }
 0x146   : > { %v1337_v22 = vmul.f32 %v10971_v24, %v1283_v58  ;;  %2222 = vrot.lane.b32.xlu1 %v7731_v40, %s8000_s22  ;;  %v2715_v1 = vsel %vm10892_vm4, %v2714_v8, %v9013_v48  ;;  %v2508_v5 = vmul.f32 %v2502_v55, %v9114_v32  ;;  %3855 = vmatpush1.bf16.msra.mxu0 %v7905_v62  ;;  %v3178_v49 = vrot.slane %v9051_v37, 4 }
 0x147   : > { %1606 = vst [vmem:[#allocation4 + $0x60] sm:$0x33] %v7711_v9  ;;  %v1267_v12 = vsel %vm614_vm2, %v1263_v25, %v1264_v11  ;;  %2116 = vrot.lane.b32.xlu0 %v2111_v52, %s8015_s12  ;;  %v2610_v17 = vsel %vm10891_vm3, %v2609_v51, %v9035_v15  ;;  %v2402_v56 = vmul.f32 %v9114_v32, %v2396_v45  ;;  %v10906_v58 = vmov 0  }
 0x148   : > { %v1269_v0 = vsel %vm1268_vm11, %v1256_v14, %v1267_v12  ;;  %v9244_v21 = vpop.permute.xlu1 %1374  ;;  %v1373_v30 = vpop.permute.xlu0 %1372  ;;  %3886 = vmatprep.mubr.bf16.mxu0 %v10906_v58  ;;  %3927 = vmatprep.mubr.bf16.mxu1 %v10906_v58  ;;  %v2326_v52 = vrot.slane %v7734_v57, 6  ;;  %vm10921_vm3 = vcmask 670720   ;;  %v7710_v15 = vpack.c.bf16 %v9198_v42, %v9198_v42 }
 0x149   : > { %1277 = vst [vmem:[#allocation4 + $0x30] sm:$0xcc] %v1269_v0  ;;  %v1381_v40 = vrot.slane %v9244_v21, 4  ;;  %v1380_v18 = vrot.slane %v1373_v30, 4  ;;  %7901 = vset.pattern.permute.xlu1 %v10906_v58  ;;  %7902 = vset.pattern.permute.xlu0 %v10906_v58  ;;  %v1254_v8 = vrot.slane %v7702_v44, 6  ;;  %v2722_v61 = vmul.f32 %v2715_v1, %v9074_v27 }
 0x14a   : > { %v10972_v23 = vrot.slane %v8859_v54, 4  ;;  %1140 = vrot.lane.b32.xlu1 %v7698_v19, %s8009_s24  ;;  %v2514_v55 = vcombine.high %v2508_v5, %v2508_v5  ;;  %v2616_v59 = vmul.f32 %v2610_v17, %v9114_v32  ;;  %v2829_v51 = vrot.slane %v9072_v35, 4 }
 0x14b   : > { %v1384_v42 = vsel %vm614_vm2, %v1380_v18, %v1381_v40  ;;  %2331 = vrot.lane.b32.xlu0 %v2326_v52, %s8021_s21  ;;  %v7706_v27 = vpack.c.bf16 %v1337_v22, %v1337_v22  ;;  %v2408_v44 = vcombine.high %v2402_v56, %v2402_v56  ;;  %v10973_v54 = vrot.slane %v8874_v16, 4 }
 0x14c   : > { %v2948_v57 = vsel %vm614_vm2, %v10972_v23, %v2944_v63  ;;  %v1386_v14 = vsel %vm1385_vm15, %v1373_v30, %v1384_v42  ;;  %v9272_v28 = vpop.permute.xlu1 %1495  ;;  %v1494_v62 = vpop.permute.xlu0 %1493  ;;  %v3063_v9 = vrot.slane %v9070_v6, 4  ;;  %v2729_v22 = vcombine.high %v2722_v61, %v2722_v61 }
 0x14d   : > { %v3182_v33 = vsel %vm614_vm2, %v10973_v54, %v3178_v49  ;;  %v2949_v45 = vsel %vm10893_vm6, %v2948_v57, %v9053_v3  ;;  %1394 = vst [vmem:[#allocation4 + $0x48] sm:$0x33] %v1386_v14  ;;  %v1502_v25 = vrot.slane %v9272_v28, 4  ;;  %v1501_v24 = vrot.slane %v1494_v62, 4 }
 0x14e   : > { %v3412_v19 = vrot.slane %v9089_v53, 4  ;;  %1378 = vrot.lane.b32.xlu1 %v7706_v27, %s8016_s15  ;;  %vm10894_vm4 = vcmask 662528   ;;  %v3514_v16 = vrot.slane %v8920_v39, %v8252_v36  ;;  %v7740_v1 = vpack.c.bf16 %v2514_v55, %v2508_v5 }
 0x14f   : > { %v2622_v12 = vcombine.high %v2616_v59, %v2616_v59  ;;  %v10974_v17 = vrot.slane %v8911_v20, 4  ;;  %v1505_v30 = vsel %vm614_vm2, %v1501_v24, %v1502_v25  ;;  %1261 = vrot.lane.b32.xlu0 %v1254_v8, %s8010_s26  ;;  %v7737_v52 = vpack.c.bf16 %v2408_v44, %v2402_v56 }
 0x150   : > { %v3183_v18 = vsel %vm10896_vm7, %v3182_v33, %v9051_v37  ;;  %v2956_v36 = vmul.f32 %v2949_v45, %v9114_v32  ;;  %v1507_v5 = vsel %vm1506_vm0, %v1494_v62, %v1505_v30  ;;  %v9295_v23 = vpop.permute.xlu1 %1699  ;;  %v1698_v57 = vpop.permute.xlu0 %1697  ;;  %v1492_v20 = vrot.slane %v7710_v15, 6 }
 0x151   : > { %v2833_v0 = vsel %vm614_vm2, %v10974_v17, %v2829_v51  ;;  %v10975_v55 = vrot.slane %v8917_v50, 4  ;;  %1515 = vst [vmem:[#allocation4 + $0x48] sm:$0xcc] %v1507_v5  ;;  %v1704_v56 = vrot.slane %v9295_v23, 4  ;;  %v1703_v8 = vrot.slane %v1698_v57, 4 }
 0x152   : > { %v7746_v27 = vpack.c.bf16 %v2729_v22, %v2722_v61  ;;  %v2834_v44 = vsel %vm848_vm5, %v2833_v0, %v9072_v35  ;;  %v10976_v54 = vrot.slane %v8954_v26, 4  ;;  %2437 = vrot.lane.b32.xlu1 %v7737_v52, %s7999_s25  ;;  %v3518_v50 = vrot.slane %v8920_v39, %v8256_v38  ;;  %v10977_v52 = vld [vmem:[#allocation11_spill] sm:$0xff] }
 0x153   : > { %v3067_v42 = vsel %vm614_vm2, %v10975_v55, %v3063_v9  ;;  %v2541_v33 = vrot.slane %v7740_v1, 6  ;;  %v3190_v14 = vmul.f32 %v3183_v18, %v9114_v32  ;;  %v3297_v62 = vrot.slane %v9087_v47, 4  ;;  %1499 = vrot.lane.b32.xlu0 %v1492_v20, %s8008_s19 }
 0x154   : > { %v3416_v15 = vsel %vm614_vm2, %v10976_v54, %v3412_v19  ;;  %v1706_v61 = vsel %vm614_vm2, %v1703_v8, %v1704_v56  ;;  %v7743_v45 = vpack.c.bf16 %v2622_v12, %v2616_v59  ;;  %v2963_v26 = vcombine.high %v2956_v36, %v2956_v36  ;;  %v9322_v17 = vpop.permute.xlu1 %1805  ;;  %v1804_v38 = vpop.permute.xlu0 %1803 }
 0x155   : > { %v3068_v24 = vsel %vm10895_vm9, %v3067_v42, %v9070_v6  ;;  %v1708_v22 = vsel %vm10921_vm3, %v1698_v57, %v1706_v61  ;;  %v2841_v39 = vmul.f32 %v2834_v44, %v9114_v32  ;;  %v3417_v1 = vsel %vm1441_vm8, %v3416_v15, %v9089_v53 }
 0x156   : > { %1715 = vst [vmem:[#allocation4 + $0x60] sm:$0xcc] %v1708_v22  ;;  %v10915_v0 = vrot.slane %v9322_v17, 4  ;;  %v1809_v30 = vrot.slane %v1804_v38, 4  ;;  %2651 = vrot.lane.b32.xlu1 %v7743_v45, %s8011_s23  ;;  %v3521_v59 = vcombine.low %v3514_v16, %v3518_v50  ;;  %v3197_v12 = vcombine.high %v3190_v14, %v3190_v14 }
 0x157   : > { %v10978_v18 = vrot.slane %v10977_v52, 4  ;;  %2546 = vrot.lane.b32.xlu0 %v2541_v33, %s8001_s29  ;;  %vm10922_vm5 = vcmask 654336   ;;  %v7754_v20 = vpack.c.bf16 %v2963_v26, %v2956_v36  ;;  %v3075_v55 = vmul.f32 %v3068_v24, %v9114_v32 }
 0x158   : > { %v1812_v57 = vsel %vm614_vm2, %v1809_v30, %v10915_v0  ;;  %v3424_v42 = vmul.f32 %v3417_v1, %v9114_v32  ;;  %v9341_v8 = vpop.permute.xlu1 %1914  ;;  %v1913_v44 = vpop.permute.xlu0 %1912  ;;  %v7906_v54 = vld [vmem:[#allocation4 + $0x34] ss:$24 sps:$4 sm:$0xff]   ;;  %v7908_v15 = vld [vmem:[#allocation4 + $0x30] ss:$24 sps:$4 sm:$0xff]   ;;  %v2760_v50 = vrot.slane %v7746_v27, 6  ;;  %v2848_v61 = vcombine.high %v2841_v39, %v2841_v39 }
 0x159   : > { %v3301_v5 = vsel %vm614_vm2, %v10978_v18, %v3297_v62  ;;  %v1814_v16 = vsel %vm10894_vm4, %v1804_v38, %v1812_v57  ;;  %v10916_v45 = vrot.slane %v9341_v8, 4  ;;  %v1918_v22 = vrot.slane %v1913_v44, 4  ;;  %3856 = vmatprep.subr.bf16.mxu0 %v7906_v54  ;;  %v2670_v18 = vld [vmem:[#allocation2 + $0x1c] sm:$0xf] }
 0x15a   : > { %1821 = vst [vmem:[#allocation4 + $0x78] sm:$0x33] %v1814_v16  ;;  %vm10979_vm6 = vcmask 580608   ;;  %3526 = vrot.lane.b32.xlu1 %v3521_v59, %s8015_s12  ;;  %v7762_v33 = vpack.c.bf16 %v3197_v12, %v3190_v14  ;;  %3857 = vmatpush1.bf16.msra.mxu0 %v7908_v15  ;;  %vm10923_vm4 = vcmask 605184   ;;  %v2994_v27 = vrot.slane %v7754_v20, 6 }
 0x15b   : > { %v3302_v36 = vsel %vm10979_vm6, %v3301_v5, %v9087_v47  ;;  %v1921_v26 = vsel %vm614_vm2, %v1918_v22, %v10916_v45  ;;  %2766 = vrot.lane.b32.xlu0 %v2760_v50, %s8013_s28  ;;  %v3082_v24 = vcombine.high %v3075_v55, %v3075_v55  ;;  %v3431_v38 = vcombine.high %v3424_v42, %v3424_v42 }
 0x15c   : > { %v1923_v1 = vsel %vm10922_vm5, %v1913_v44, %v1921_v26  ;;  %v9352_v30 = vpop.permute.xlu1 %2020  ;;  %v2019_v52 = vpop.permute.xlu0 %2018  ;;  %v7750_v59 = vpack.c.bf16 %v2848_v61, %v2841_v39  ;;  %v3309_v14 = vmul.f32 %v3302_v36, %v9114_v32  ;;  %v2723_v20 = vmul.f32 %v2710_v10, %v2670_v18  ;;  %v2789_v61 = vld [vmem:[#allocation2 + $0x1c] sm:$0xf] }
 0x15d   : > { %1930 = vst [vmem:[#allocation4 + $0x78] sm:$0xcc] %v1923_v1  ;;  %v10911_v12 = vrot.slane %v9352_v30, 4  ;;  %v2024_v5 = vrot.slane %v2019_v52, 4  ;;  %v3228_v16 = vrot.slane %v7762_v33, 6  ;;  %v7770_v44 = vpack.c.bf16 %v3431_v38, %v3424_v42 }
 0x15e   : > { %3000 = vrot.lane.b32.xlu1 %v2994_v27, %s8014_s30  ;;  %v7758_v50 = vpack.c.bf16 %v3082_v24, %v3075_v55  ;;  %v3316_v22 = vcombine.high %v3309_v14, %v3309_v14  ;;  %v2904_v27 = vld [vmem:[#allocation2 + $0x1c] sm:$0xf]  ;;  %v7747_v10 = vpack.c.bf16 %v2723_v20, %v2723_v20  ;;  %v2842_v42 = vmul.f32 %v2829_v51, %v2789_v61 }
 0x15f   : > { %v2027_v57 = vsel %vm614_vm2, %v2024_v5, %v10911_v12  ;;  %2881 = vrot.lane.b32.xlu0 %v7750_v59, %s8012_s27  ;;  %v3462_v55 = vrot.slane %v7770_v44, 6  ;;  %v3138_v18 = vld [vmem:[#allocation2 + $0x1c] sm:$0xf]  ;;  %v2957_v59 = vmul.f32 %v2944_v63, %v2904_v27  ;;  %vm10900_vm6 = vcmask 539648  }
 0x160   : > { %v2029_v39 = vsel %vm10923_vm4, %v2019_v52, %v2027_v57  ;;  %v9364_v54 = vpop.permute.xlu1 %2114  ;;  %v2113_v15 = vpop.permute.xlu0 %2112  ;;  %v3023_v5 = vld [vmem:[#allocation2 + $0x1c] sm:$0xf]  ;;  %v7766_v57 = vpack.c.bf16 %v3316_v22, %v3309_v14  ;;  %v3191_v3 = vmul.f32 %v3178_v49, %v3138_v18  ;;  %v7751_v51 = vpack.c.bf16 %v2842_v42, %v2842_v42 }
 0x161   : > { %2036 = vst [vmem:[#allocation4 + $0x90] sm:$0x33] %v2029_v39  ;;  %v10908_v36 = vrot.slane %v9364_v54, 4  ;;  %v2118_v26 = vrot.slane %v2113_v15, 4  ;;  %v3076_v63 = vmul.f32 %v3063_v9, %v3023_v5  ;;  %v3257_v61 = vld [vmem:[#allocation2 + $0x1c] sm:$0xf] }
 0x162   : > { %3234 = vrot.lane.b32.xlu1 %v3228_v16, %s8010_s26  ;;  %v3372_v27 = vld [vmem:[#allocation2 + $0x1c] sm:$0xf]  ;;  %v7763_v6 = vpack.c.bf16 %v3191_v3, %v3191_v3  ;;  %v3310_v9 = vmul.f32 %v3297_v62, %v3257_v61 }
 0x163   : > { %v2121_v48 = vsel %vm614_vm2, %v2118_v26, %v10908_v36  ;;  %3115 = vrot.lane.b32.xlu0 %v7758_v50, %s8009_s24  ;;  %v7755_v50 = vpack.c.bf16 %v2957_v59, %v2957_v59  ;;  %v7759_v49 = vpack.c.bf16 %v3076_v63, %v3076_v63 }
 0x164   : > { %v2123_v33 = vsel %vm1562_vm13, %v2113_v15, %v2121_v48  ;;  %v9375_v24 = vpop.permute.xlu1 %2220  ;;  %v2219_v38 = vpop.permute.xlu0 %2218  ;;  %v7909_v1 = vld [vmem:[#allocation4 + $0x64] ss:$24 sps:$4 sm:$0xff]   ;;  %v7911_v52 = vld [vmem:[#allocation4 + $0x60] ss:$24 sps:$4 sm:$0xff]   ;;  %v2761_v15 = vrot.slane %v7747_v10, 6  ;;  %v7767_v62 = vpack.c.bf16 %v3310_v9, %v3310_v9  ;;  %v3229_v53 = vrot.slane %v7763_v6, 6 }
 0x165   : > { %2130 = vst [vmem:[#allocation4 + $0x90] sm:$0xcc] %v2123_v33  ;;  %v10909_v20 = vrot.slane %v9375_v24, 4  ;;  %v2224_v16 = vrot.slane %v2219_v38, 4  ;;  %3858 = vmatprep.subr.bf16.mxu0 %v7909_v1  ;;  %v3425_v33 = vmul.f32 %v3412_v19, %v3372_v27 }
 0x166   : > { %3468 = vrot.lane.b32.xlu1 %v3462_v55, %s8008_s19  ;;  %3859 = vmatpush1.bf16.msra.mxu0 %v7911_v52  ;;  %v2995_v55 = vrot.slane %v7755_v50, 6 }
 0x167   : > { %v2227_v35 = vsel %vm614_vm2, %v2224_v16, %v10909_v20  ;;  %3349 = vrot.lane.b32.xlu0 %v7766_v57, %s8016_s15  ;;  %v7771_v19 = vpack.c.bf16 %v3425_v33, %v3425_v33  ;;  %v10980_v33 = vld [vmem:[#allocation6_spill] sm:$0xff] }
 0x168   : > { %v2229_v14 = vsel %vm1441_vm8, %v2219_v38, %v2227_v35  ;;  %v9390_v44 = vpop.permute.xlu1 %2329  ;;  %v2328_v39 = vpop.permute.xlu0 %2327  ;;  %v8023_v35 = vmov 1983009808  }
 0x169   : > { %2236 = vst [vmem:[#allocation4 + $0xa8] sm:$0x33] %v2229_v14  ;;  %v10905_v22 = vrot.slane %v9390_v44, 4  ;;  %v2333_v26 = vrot.slane %v2328_v39, 4  ;;  %v3992_v3 = vunpack.c.l.s4 %v8023_v35  ;;  %v3463_v50 = vrot.slane %v7771_v19, 6 }
 0x16a   : > { %2883 = vrot.lane.b32.xlu1 %v7751_v51, %s8012_s27 }
 0x16b   : > { %v2336_v37 = vsel %vm614_vm2, %v2333_v26, %v10905_v22  ;;  %2768 = vrot.lane.b32.xlu0 %v2761_v15, %s8013_s28 }
 0x16c   : > { %v2338_v48 = vsel %vm10900_vm6, %v2328_v39, %v2336_v37  ;;  %v9401_v10 = vpop.permute.xlu1 %2435  ;;  %v2434_v42 = vpop.permute.xlu0 %2433  ;;  %v3993_v37 = vunpack.c.0.s8 %v3992_v3 }
 0x16d   : > { %2345 = vst [vmem:[#allocation4 + $0xa8] sm:$0xcc] %v2338_v48  ;;  %v10904_v38 = vrot.slane %v9401_v10, 4  ;;  %v2439_v1 = vrot.slane %v2434_v42, 4 }
 0x16e   : > { %3117 = vrot.lane.b32.xlu1 %v7759_v49, %s8009_s24 }
 0x16f   : > { %v2442_v47 = vsel %vm614_vm2, %v2439_v1, %v10904_v38  ;;  %3002 = vrot.lane.b32.xlu0 %v2995_v55, %s8014_s30  ;;  %v9436_v1 = vsub.s32 %v3993_v37, %v10980_v33 }
 0x170   : > { %v2444_v52 = vsel %vm10896_vm7, %v2434_v42, %v2442_v47  ;;  %v9412_v18 = vpop.permute.xlu1 %2544  ;;  %v2543_v59 = vpop.permute.xlu0 %2542  ;;  %vm677_vm7 = vcmask 144388  }
 0x171   : > { %2451 = vst [vmem:[#allocation4 + $0xc0] sm:$0x33] %v2444_v52  ;;  %v10902_v5 = vrot.slane %v9412_v18, 4  ;;  %v2548_v57 = vrot.slane %v2543_v59, 4 }
 0x172   : > { %3351 = vrot.lane.b32.xlu1 %v7767_v62, %s8016_s15 }
 0x173   : > { %v2551_v16 = vsel %vm614_vm2, %v2548_v57, %v10902_v5  ;;  %3236 = vrot.lane.b32.xlu0 %v3229_v53, %s8010_s26  ;;  %v9444_v53 = vld [vmem:[#allocation3 + $0x2] sm:$0xf] }
 0x174   : > { %v2553_v63 = vsel %vm10895_vm9, %v2543_v59, %v2551_v16  ;;  %v9421_v51 = vpop.permute.xlu1 %2649  ;;  %v2648_v14 = vpop.permute.xlu0 %2647  ;;  %v7912_v39 = vld [vmem:[#allocation4 + $0x94] ss:$24 sps:$4 sm:$0xff]   ;;  %v7914_v15 = vld [vmem:[#allocation4 + $0x90] ss:$24 sps:$4 sm:$0xff]   ;;  %vm10917_vm9 = vcmask 1041408   ;;  %v4102_v35 = vshra.s32 %v9444_v53, 1 }
 0x175   : > { %2560 = vst [vmem:[#allocation4 + $0xc0] sm:$0xcc] %v2553_v63  ;;  %v10903_v61 = vrot.slane %v9421_v51, 4  ;;  %v2653_v26 = vrot.slane %v2648_v14, 4  ;;  %3860 = vmatprep.subr.bf16.mxu0 %v7912_v39  ;;  %v3621_v59 = vld [vmem:[%s10836_s7] sm:$0x3]  ;;  %vm9448_vm6 = vmor %vm677_vm7, %vm10917_vm9 }
 0x176   : > { %3861 = vmatpush1.bf16.msra.mxu0 %v7914_v15  ;;  %3624 = vperm.xlu1 %7901, %v3621_v59   ;;  %v4337_v3 = vshra.s32 %v9444_v53, 3  ;;  %v4686_v63 = vshra.s32 %v9444_v53, 6  ;;  %v4454_v39 = vshra.s32 %v9444_v53, 4  ;;  %v4568_v15 = vshra.s32 %v9444_v53, 5  ;;  %v10988_v5 = vld [vmem:[#allocation10_spill] sm:$0xff] }
 0x177   : > { %v2656_v27 = vsel %vm614_vm2, %v2653_v26, %v10903_v61  ;;  %3470 = vrot.lane.b32.xlu0 %v3463_v50, %s8008_s19  ;;  %v10983_v26 = vrot.slane %v9105_v31, 4  ;;  %vm10986_vm7 = vcmask 130048   ;;  %vm801_vm9 = vcmask 146438  }
 0x178   : > { %v2657_v6 = vsel %vm10920_vm12, %v2648_v14, %v2656_v27  ;;  %v9429_v49 = vpop.permute.xlu1 %2764  ;;  %v2763_v9 = vpop.permute.xlu0 %2762  ;;  %v4219_v14 = vshra.s32 %v9444_v53, 2 }
 0x179   : > { %2664 = vst [vmem:[#allocation4 + $0xd8] sm:$0x33] %v2657_v6  ;;  %v10901_v48 = vrot.slane %v9429_v49, 4  ;;  %v2770_v42 = vrot.slane %v2763_v9, 4  ;;  %v4103_v6 = vand.u32 1, %v4102_v35 }
 0x17b   : > { %v2774_v55 = vsel %vm614_vm2, %v2770_v42, %v10901_v48 }
 0x17c   : > { %v2775_v47 = vsel %vm789_vm10, %v2763_v9, %v2774_v55  ;;  %v9439_v62 = vpop.permute.xlu1 %780  ;;  %v660_v52 = vpop.permute.xlu0 %659 }
 0x17d   : > { %2783 = vst [vmem:[#allocation4 + $0xd8] sm:$0xcc] %v2775_v47  ;;  %v10912_v19 = vrot.slane %v9439_v62, 4  ;;  %v663_v16 = vrot.slane %v660_v52, 4  ;;  %v4687_v47 = vand.u32 1, %v4686_v63 }
 0x17f   : > { %v791_v50 = vsel %vm614_vm2, %v785_v46, %v10912_v19  ;;  %v668_v27 = vsel %vm614_vm2, %v10983_v26, %v663_v16  ;;  %v670_v37 = vsel %vm10920_vm12, %v660_v52, %v663_v16  ;;  %v4338_v46 = vand.u32 1, %v4337_v3 }
 0x180   : > { %v792_v9 = vsel %vm789_vm10, %v9135_v34, %v791_v50  ;;  %v669_v42 = vsel %vm10920_vm12, %v9105_v31, %v668_v27  ;;  %679 = vst.msk [vmem:[#allocation4 + $0x10] sm:$0x33] %vm9448_vm6, %v670_v37  ;;  %v9473_v55 = vpop.permute.xlu1 %1021  ;;  %v9475_v33 = vpop.permute.xlu0 %900  ;;  %v4104_v16 = vcvt.s32.f32 %v4103_v6  ;;  %v9479_v34 = vand.u32 1, %v4219_v14  ;;  %v10984_v14 = vld [vmem:[#allocation7_spill] sm:$0xff]  ;;  %v10985_v37 = vld [vmem:[#allocation8_spill] sm:$0xff] }
 0x181   : > { %799 = vst [vmem:[#allocation4 + $0x8] sm:$0xcc] %v792_v9  ;;  %675 = vst [vmem:[#allocation4 + $0x8] sm:$0x33] %v669_v42  ;;  %v10910_v52 = vrot.slane %v9473_v55, 4  ;;  %v10914_v59 = vrot.slane %v9475_v33, 4  ;;  %v4339_v35 = vcvt.s32.f32 %v4338_v46  ;;  %v4688_v31 = vcvt.s32.f32 %v4687_v47 }
 0x182   : > { %v9481_v50 = vand.u32 1, %v4454_v39  ;;  %v9483_v26 = vand.u32 1, %v4568_v15  ;;  %v4109_v27 = vrot.slane %v4104_v16, %v10984_v14  ;;  %v4113_v6 = vrot.slane %v4104_v16, %v10985_v37  ;;  %v10987_v47 = vld [vmem:[#allocation9_spill] sm:$0xff] }
 0x183   : > { %v1032_v3 = vsel %vm614_vm2, %v1026_v43, %v10910_v52  ;;  %v911_v63 = vsel %vm614_vm2, %v905_v2, %v10914_v59  ;;  %v4117_v48 = vrot.slane %v4104_v16, %v10987_v47  ;;  %v4121_v61 = vrot.slane %v4104_v16, %v10988_v5 }
 0x184   : > { %v1033_v39 = vsel %vm1030_vm14, %v9157_v4, %v1032_v3  ;;  %v912_v15 = vsel %vm10986_vm7, %v9112_v13, %v911_v63  ;;  %v9501_v9 = vpop.permute.xlu1 %3524  ;;  %v3523_v42 = vpop.permute.xlu0 %3522  ;;  %v7915_v43 = vld [vmem:[#allocation4 + $0xc4] ss:$24 sps:$4 sm:$0xff]   ;;  %v7917_v46 = vld [vmem:[#allocation4 + $0xc0] ss:$24 sps:$4 sm:$0xff]   ;;  %v4122_v22 = vcombine.low %v4109_v27, %v4113_v6  ;;  %v4344_v4 = vrot.slane %v4339_v35, %v10984_v14 }
 0x185   : > { %1040 = vst [vmem:[#allocation4 + $0x20] sm:$0xcc] %v1033_v39  ;;  %919 = vst [vmem:[#allocation4 + $0x20] sm:$0x33] %v912_v15  ;;  %v10913_v2 = vrot.slane %v9501_v9, 4  ;;  %v3528_v38 = vrot.slane %v3523_v42, 4  ;;  %3862 = vmatprep.subr.bf16.mxu0 %v7915_v43  ;;  %v4123_v13 = vcombine.low %v4117_v48, %v4121_v61  ;;  %v4348_v63 = vrot.slane %v4339_v35, %v10985_v37 }
 0x186   : > { %v3488_v3 = vld [vmem:[#allocation2 + $0x8] sm:$0xff]  ;;  %v4352_v58 = vrot.slane %v4339_v35, %v10987_v47  ;;  %v4356_v36 = vrot.slane %v4339_v35, %v10988_v5  ;;  %3863 = vmatpush1.bf16.msra.mxu0 %v7917_v46  ;;  %v4130_v39 = vrot.slane %v4122_v22, %v9436_v1  ;;  %v4693_v27 = vrot.slane %v4688_v31, %v10984_v14 }
 0x187   : > { %v3531_v16 = vsel %vm614_vm2, %v3528_v38, %v10913_v2  ;;  %v4697_v6 = vrot.slane %v4688_v31, %v10985_v37  ;;  %v4137_v43 = vrot.slane %v4123_v13, %v9436_v1  ;;  %v4357_v20 = vcombine.low %v4344_v4, %v4348_v63 }
 0x188   : > { %v3532_v15 = vsel %vm1562_vm13, %v3523_v42, %v3531_v16  ;;  %v2878_v61 = vpop.permute.xlu1 %2877  ;;  %v1557_v48 = vpop.permute.xlu0 %1556  ;;  %v4358_v52 = vcombine.low %v4352_v58, %v4356_v36  ;;  %v4701_v38 = vrot.slane %v4688_v31, %v10987_v47  ;;  %v4705_v59 = vrot.slane %v4688_v31, %v10988_v5 }
 0x189   : > { %v3539_v35 = vmul.f32 %v3532_v15, %v3488_v3  ;;  %v2885_v12 = vrot.slane %v2878_v61, 4  ;;  %v1560_v19 = vrot.slane %v1557_v48, 4  ;;  %v4138_v46 = vcombine.low %v4130_v39, %v4137_v43  ;;  %v7985_v43 = vld [vmem:[#allocation2 + $0xc] sm:$0xff] }
 0x18a   : > { %v4365_v22 = vrot.slane %v4357_v20, %v9436_v1  ;;  %v4372_v2 = vrot.slane %v4358_v52, %v9436_v1  ;;  %v10989_v42 = vrot.slane %v9172_v60, 4  ;;  %v4706_v58 = vcombine.low %v4693_v27, %v4697_v6 }
 0x18b   : > { %v3545_v0 = vcombine.high %v3539_v35, %v3539_v35  ;;  %v1566_v4 = vsel %vm1562_vm13, %v1557_v48, %v1560_v19  ;;  %4139 = vrot.lane.b32.xlu0 %v4138_v46, %s8008_s19  ;;  %v4707_v39 = vcombine.low %v4701_v38, %v4705_v59  ;;  %v4221_v6 = vcvt.s32.f32 %v9479_v34 }
 0x18c   : > { %v1564_v16 = vsel %vm614_vm2, %v10989_v42, %v1560_v19  ;;  %v1572_v3 = vmul.f32 %v9114_v32, %v1566_v4  ;;  %v2997_v13 = vpop.permute.xlu1 %2996  ;;  %v9529_v63 = vpop.permute.xlu0 %2879  ;;  %v7918_v20 = vld [vmem:[#allocation4 + $0xc] ss:$24 sps:$4 sm:$0xff]   ;;  %v7920_v52 = vld [vmem:[#allocation4 + $0x8] ss:$24 sps:$4 sm:$0xff]   ;;  %v4373_v31 = vcombine.low %v4365_v22, %v4372_v2  ;;  %v4570_v2 = vcvt.s32.f32 %v9483_v26 }
 0x18d   : > { %v1565_v36 = vsel %vm1562_vm13, %v9172_v60, %v1564_v16  ;;  %v7772_v15 = vpack.c.bf16 %v3545_v0, %v3539_v35  ;;  %v3004_v45 = vrot.slane %v2997_v13, 4  ;;  %v2886_v19 = vrot.slane %v9529_v63, 4  ;;  %3895 = vmatprep.subr.bf16.mxu1 %v7918_v20 }
 0x18e   : > { %v1571_v42 = vmul.f32 %v7985_v43, %v1565_v36  ;;  %v1578_v27 = vcombine.high %v1572_v3, %v1572_v3  ;;  %v4714_v60 = vrot.slane %v4706_v58, %v9436_v1  ;;  %v4721_v32 = vrot.slane %v4707_v39, %v9436_v1  ;;  %3896 = vmatpush1.bf16.msra.mxu1 %v7920_v52 }
 0x18f   : > { %3575 = vst [vmem:[#allocation4 + $0x138] sm:$0x33] %v7772_v15  ;;  %v2889_v59 = vsel %vm614_vm2, %v2885_v12, %v2886_v19  ;;  %v4456_v0 = vcvt.s32.f32 %v9481_v50  ;;  %4374 = vrot.lane.b32.xlu0 %v4373_v31, %s8010_s26  ;;  %v4226_v16 = vrot.slane %v4221_v6, %v10984_v14  ;;  %v4230_v50 = vrot.slane %v4221_v6, %v10985_v37 }
 0x190   : > { %v1577_v48 = vcombine.high %v1571_v42, %v1571_v42  ;;  %v7713_v35 = vpack.c.bf16 %v1578_v27, %v1572_v3  ;;  %v2890_v38 = vsel %vm10986_vm7, %v2878_v61, %v2889_v59  ;;  %v3112_v46 = vpop.permute.xlu1 %3111  ;;  %v9542_v22 = vpop.permute.xlu0 %2998  ;;  %v4722_v34 = vcombine.low %v4714_v60, %v4721_v32 }
 0x191   : > { %2898 = vst [vmem:[#allocation4 + $0xf0] sm:$0x33] %v2890_v38  ;;  %v3119_v58 = vrot.slane %v3112_v46, 4  ;;  %v3005_v12 = vrot.slane %v9542_v22, 4  ;;  %v4234_v26 = vrot.slane %v4221_v6, %v10987_v47  ;;  %v4238_v61 = vrot.slane %v4221_v6, %v10988_v5 }
 0x192   : > { %v7712_v4 = vpack.c.bf16 %v1577_v48, %v1571_v42  ;;  %1608 = vst.msk [vmem:[#allocation4 + $0x70] sm:$0x33] %vm9448_vm6, %v7713_v35  ;;  %v4461_v36 = vrot.slane %v4456_v0, %v10984_v14  ;;  %v4465_v3 = vrot.slane %v4456_v0, %v10985_v37  ;;  %v4239_v52 = vcombine.low %v4226_v16, %v4230_v50 }
 0x193   : > { %v3008_v20 = vsel %vm614_vm2, %v3004_v45, %v3005_v12  ;;  %v4469_v31 = vrot.slane %v4456_v0, %v10987_v47  ;;  %v4473_v39 = vrot.slane %v4456_v0, %v10988_v5  ;;  %4723 = vrot.lane.b32.xlu0 %v4722_v34, %s8012_s27  ;;  %v4240_v27 = vcombine.low %v4234_v26, %v4238_v61 }
 0x194   : > { %1607 = vst [vmem:[#allocation4 + $0x68] sm:$0x33] %v7712_v4  ;;  %v3009_v15 = vsel %vm1030_vm14, %v2997_v13, %v3008_v20  ;;  %v3231_v43 = vpop.permute.xlu1 %3230  ;;  %v9560_v42 = vpop.permute.xlu0 %3113  ;;  %v4474_v60 = vcombine.low %v4461_v36, %v4465_v3  ;;  %v4575_v32 = vrot.slane %v4570_v2, %v10984_v14  ;;  %v4247_v48 = vrot.slane %v4239_v52, %v9436_v1 }
 0x195   : > { %3017 = vst [vmem:[#allocation4 + $0xf0] sm:$0xcc] %v3009_v15  ;;  %v3238_v6 = vrot.slane %v3231_v43, 4  ;;  %v10918_v45 = vrot.slane %v9560_v42, 4  ;;  %v4475_v59 = vcombine.low %v4469_v31, %v4473_v39  ;;  %v4254_v0 = vrot.slane %v4240_v27, %v9436_v1 }
 0x196   : > { %v4482_v13 = vrot.slane %v4474_v60, %v9436_v1  ;;  %v4579_v35 = vrot.slane %v4570_v2, %v10985_v37  ;;  %v4583_v38 = vrot.slane %v4570_v2, %v10987_v47  ;;  %v4587_v4 = vrot.slane %v4570_v2, %v10988_v5 }
 0x197   : > { %v3123_v34 = vsel %vm614_vm2, %v3119_v58, %v10918_v45  ;;  %v4489_v16 = vrot.slane %v4475_v59, %v9436_v1  ;;  %v5153_v50 = vshra.s32 %v9444_v53, 10  ;;  %v4255_v3 = vcombine.low %v4247_v48, %v4254_v0 }
 0x198   : > { %v3124_v26 = vsel %vm1147_vm1, %v3112_v46, %v3123_v34  ;;  %v9577_v61 = vpop.permute.xlu1 %1138  ;;  %v9579_v36 = vpop.permute.xlu0 %3232  ;;  %v4588_v20 = vcombine.low %v4575_v32, %v4579_v35  ;;  %v4804_v52 = vshra.s32 %v9444_v53, 7  ;;  %v4589_v15 = vcombine.low %v4583_v38, %v4587_v4 }
 0x199   : > { %3132 = vst [vmem:[#allocation4 + $0x108] sm:$0x33] %v3124_v26  ;;  %v1144_v31 = vrot.slane %v9577_v61, 4  ;;  %v10919_v58 = vrot.slane %v9579_v36, 4  ;;  %v4490_v39 = vcombine.low %v4482_v13, %v4489_v16  ;;  %4256 = vrot.lane.b32.xlu1 %v4255_v3, %s8016_s15  ;;  %v5154_v46 = vand.u32 1, %v5153_v50 }
 0x19a   : > { %v4596_v2 = vrot.slane %v4588_v20, %v9436_v1  ;;  %v4805_v27 = vand.u32 1, %v4804_v52  ;;  %v5502_v60 = vshra.s32 %v9444_v53, 13  ;;  %v4603_v59 = vrot.slane %v4589_v15, %v9436_v1 }
 0x19b   : > { %v1149_v32 = vsel %vm614_vm2, %v1143_v7, %v1144_v31  ;;  %v3242_v48 = vsel %vm614_vm2, %v3238_v6, %v10919_v58  ;;  %4491 = vrot.lane.b32.xlu0 %v4490_v39, %s8009_s24  ;;  %v5037_v0 = vshra.s32 %v9444_v53, 9  ;;  %v5155_v34 = vcvt.s32.f32 %v5154_v46 }
 0x19c   : > { %v1150_v13 = vsel %vm1147_vm1, %v9190_v29, %v1149_v32  ;;  %v3243_v35 = vsel %vm1268_vm11, %v3231_v43, %v3242_v48  ;;  %v9601_v38 = vpop.permute.xlu1 %1376  ;;  %v4806_v16 = vcvt.s32.f32 %v4805_v27  ;;  %v9604_v6 = vpop.permute.xlu0 %1259  ;;  %v4604_v4 = vcombine.low %v4596_v2, %v4603_v59 }
 0x19d   : > { %1157 = vst [vmem:[#allocation4 + $0x38] sm:$0x33] %v1150_v13  ;;  %3251 = vst [vmem:[#allocation4 + $0x108] sm:$0xcc] %v3243_v35  ;;  %v1382_v7 = vrot.slane %v9601_v38, 4  ;;  %v5503_v50 = vand.u32 1, %v5502_v60  ;;  %v5160_v29 = vrot.slane %v5155_v34, %v10984_v14  ;;  %v5164_v43 = vrot.slane %v5155_v34, %v10985_v37 }
 0x19e   : > { %v5038_v26 = vand.u32 1, %v5037_v0  ;;  %v1265_v3 = vrot.slane %v9604_v6, 4  ;;  %vm800_vm7 = vcmask 1043458   ;;  %v5168_v20 = vrot.slane %v5155_v34, %v10987_v47  ;;  %4605 = vrot.lane.b32.xlu1 %v4604_v4, %s8014_s30 }
 0x19f   : > { %v1387_v52 = vsel %vm614_vm2, %v1381_v40, %v1382_v7  ;;  %v5172_v39 = vrot.slane %v5155_v34, %v10988_v5  ;;  %v4811_v15 = vrot.slane %v4806_v16, %v10984_v14  ;;  %v4815_v2 = vrot.slane %v4806_v16, %v10985_v37  ;;  %vm9662_vm12 = vmor %vm801_vm9, %vm800_vm7 }
 0x1a0   : > { %v1388_v46 = vsel %vm1385_vm15, %v9244_v21, %v1387_v52  ;;  %v1270_v27 = vsel %vm614_vm2, %v1264_v11, %v1265_v3  ;;  %v3346_v60 = vpop.permute.xlu1 %3345  ;;  %v5173_v32 = vcombine.low %v5160_v29, %v5164_v43  ;;  %v4819_v40 = vrot.slane %v4806_v16, %v10987_v47  ;;  %v9629_v0 = vpop.permute.xlu0 %1497 }
 0x1a1   : > { %1395 = vst [vmem:[#allocation4 + $0x50] sm:$0x33] %v1388_v46  ;;  %v1271_v48 = vsel %vm1268_vm11, %v9223_v41, %v1270_v27  ;;  %v3353_v59 = vrot.slane %v3346_v60, 4  ;;  %v5174_v13 = vcombine.low %v5168_v20, %v5172_v39  ;;  %v4823_v21 = vrot.slane %v4806_v16, %v10988_v5  ;;  %v3609_v20 = vld [vmem:[#allocation4 + $0xf0] sm:$0xff] }
 0x1a2   : > { %1278 = vst [vmem:[#allocation4 + $0x38] sm:$0xcc] %v1271_v48  ;;  %v1503_v35 = vrot.slane %v9629_v0, 4  ;;  %v5181_v34 = vrot.slane %v5173_v32, %v9436_v1  ;;  %v4824_v11 = vcombine.low %v4811_v15, %v4815_v2  ;;  %v5504_v4 = vcvt.s32.f32 %v5503_v50 }
 0x1a3   : > { %v5188_v29 = vrot.slane %v5174_v13, %v9436_v1  ;;  %v4825_v43 = vcombine.low %v4819_v40, %v4823_v21  ;;  %v5039_v52 = vcvt.s32.f32 %v5038_v26  ;;  %v5737_v46 = vshra.s32 %v9444_v53, 15 }
 0x1a4   : > { %v1508_v41 = vsel %vm614_vm2, %v1502_v25, %v1503_v35  ;;  %v3465_v16 = vpop.permute.xlu1 %3464  ;;  %v3612_v39 = vld [vmem:[#allocation4 + $0x108] sm:$0xff]  ;;  %v4832_v32 = vrot.slane %v4824_v11, %v9436_v1  ;;  %v5509_v50 = vrot.slane %v5504_v4, %v10984_v14  ;;  %v5513_v15 = vrot.slane %v5504_v4, %v10985_v37  ;;  %v9646_v40 = vpop.permute.xlu0 %3347 }
 0x1a5   : > { %v7921_v27 = vld [vmem:[#allocation4 + $0xf4] ss:$24 sps:$4 sm:$0xff]   ;;  %v1509_v26 = vsel %vm1506_vm0, %v9272_v28, %v1508_v41  ;;  %v3472_v2 = vrot.slane %v3465_v16, 4  ;;  %v7561_v48 = vcombine.low %v3609_v20, %v3612_v39  ;;  %v5189_v13 = vcombine.low %v5181_v34, %v5188_v29 }
 0x1a6   : > { %1516 = vst [vmem:[#allocation4 + $0x50] sm:$0xcc] %v1509_v26  ;;  %v3354_v25 = vrot.slane %v9646_v40, 4  ;;  %3864 = vmatprep.subr.bf16.mxu0 %v7921_v27  ;;  %v4839_v21 = vrot.slane %v4825_v43, %v9436_v1  ;;  %v5517_v11 = vrot.slane %v5504_v4, %v10987_v47  ;;  %v5521_v45 = vrot.slane %v5504_v4, %v10988_v5 }
 0x1a7   : > { %3865 = vmatpush1.bf16.msra.mxu0 %v7561_v48  ;;  %5190 = vrot.lane.b32.xlu0 %v5189_v13, %s7999_s25  ;;  %v5522_v58 = vcombine.low %v5509_v50, %v5513_v15  ;;  %v5044_v28 = vrot.slane %v5039_v52, %v10984_v14  ;;  %v5048_v41 = vrot.slane %v5039_v52, %v10985_v37  ;;  %v5738_v20 = vand.u32 1, %v5737_v46  ;;  %s8033_s25 = smov 46  }
 0x1a8   : > { %v3357_v34 = vsel %vm614_vm2, %v3353_v59, %v3354_v25  ;;  %v1702_v29 = vpop.permute.xlu1 %1701  ;;  %v4840_v39 = vcombine.low %v4832_v32, %v4839_v21  ;;  %v5523_v43 = vcombine.low %v5517_v11, %v5521_v45  ;;  %v5052_v27 = vrot.slane %v5039_v52, %v10987_v47  ;;  %v9666_v26 = vpop.permute.xlu0 %3466 }
 0x1a9   : > { %v3358_v4 = vsel %vm1385_vm15, %v3346_v60, %v3357_v34  ;;  %v1705_v15 = vrot.slane %v1702_v29, 4  ;;  %v5530_v46 = vrot.slane %v5522_v58, %v9436_v1  ;;  %v5056_v59 = vrot.slane %v5039_v52, %v10988_v5 }
 0x1aa   : > { %3366 = vst [vmem:[#allocation4 + $0x120] sm:$0x33] %v3358_v4  ;;  %v3473_v45 = vrot.slane %v9666_v26, 4  ;;  %4841 = vrot.lane.b32.xlu1 %v4840_v39, %s8013_s28  ;;  %v5537_v60 = vrot.slane %v5523_v43, %v9436_v1  ;;  %v5057_v32 = vcombine.low %v5044_v28, %v5048_v41  ;;  %v5739_v48 = vcvt.s32.f32 %v5738_v20  ;;  %v3586_v43 = vld [vmem:[#allocation4 + $0x38] sm:$0xff] }
 0x1ab   : > { %v1709_v13 = vsel %vm614_vm2, %v1704_v56, %v1705_v15  ;;  %v1711_v21 = vsel %vm10921_vm3, %v1702_v29, %v1705_v15  ;;  %v5058_v11 = vcombine.low %v5052_v27, %v5056_v59  ;;  %v5270_v58 = vshra.s32 %v9444_v53, 11 }
 0x1ac   : > { %v1710_v52 = vsel %vm10921_vm3, %v9295_v23, %v1709_v13  ;;  %1717 = vst.msk [vmem:[#allocation4 + $0x70] sm:$0xcc] %vm9662_vm12, %v1711_v21  ;;  %v3476_v28 = vsel %vm614_vm2, %v3472_v2, %v3473_v45  ;;  %v1917_v41 = vpop.permute.xlu1 %1916  ;;  %vm3835_vm9 = vcmask 1045504   ;;  %v5538_v20 = vcombine.low %v5530_v46, %v5537_v60  ;;  %v1808_v39 = vpop.permute.xlu0 %1807 }
 0x1ad   : > { %v5065_v56 = vrot.slane %v5057_v32, %v9436_v1  ;;  %1716 = vst [vmem:[#allocation4 + $0x68] sm:$0xcc] %v1710_v52  ;;  %v3477_v34 = vsel %vm1506_vm0, %v3465_v16, %v3476_v28  ;;  %v1920_v29 = vrot.slane %v1917_v41, 4  ;;  %v3589_v27 = vld [vmem:[#allocation4 + $0x50] sm:$0xff]  ;;  %v5072_v4 = vrot.slane %v5058_v11, %v9436_v1 }
 0x1ae   : > { %v7923_v23 = vld [vmem:[#allocation4 + $0x3c] ss:$24 sps:$4 sm:$0xff]   ;;  %v5744_v15 = vrot.slane %v5739_v48, %v10984_v14  ;;  %3485 = vst [vmem:[#allocation4 + $0x120] sm:$0xcc] %v3477_v34  ;;  %v1811_v59 = vrot.slane %v1808_v39, 4  ;;  %v7539_v2 = vcombine.low %v3586_v43, %v3589_v27  ;;  %5539 = vrot.lane.b32.xlu0 %v5538_v20, %s8015_s12  ;;  %v5748_v46 = vrot.slane %v5739_v48, %v10985_v37  ;;  %s11039_s12 = smov 55  }
 0x1af   : > { %v5752_v60 = vrot.slane %v5739_v48, %v10987_v47  ;;  %v10992_v16 = vrot.slane %v9341_v8, 4  ;;  %v1926_v13 = vsel %vm10922_vm5, %v1917_v41, %v1920_v29  ;;  %3897 = vmatprep.subr.bf16.mxu1 %v7923_v23  ;;  %v5073_v21 = vcombine.low %v5065_v56, %v5072_v4 }
 0x1b0   : > { %v5756_v11 = vrot.slane %v5739_v48, %v10988_v5  ;;  %1932 = vst.msk [vmem:[#allocation4 + $0x88] sm:$0xcc] %vm9662_vm12, %v1926_v13  ;;  %v10993_v28 = vrot.slane %v9322_v17, 4  ;;  %vm10994_vm7 = vcmask 662528   ;;  %v903_v43 = vpop.permute.xlu1 %902  ;;  %3898 = vmatpush1.bf16.msra.mxu1 %v7539_v2  ;;  %v5757_v27 = vcombine.low %v5744_v15, %v5748_v46  ;;  %v783_v48 = vpop.permute.xlu0 %782 }
 0x1b1   : > { %v1924_v32 = vsel %vm614_vm2, %v10992_v16, %v1920_v29  ;;  %v1817_v34 = vsel %vm10994_vm7, %v1808_v39, %v1811_v59  ;;  %vm10995_vm3 = vmmov %vm10994_vm7  ;;  %5074 = vrot.lane.b32.xlu1 %v5073_v21, %s8001_s29  ;;  %v5271_v29 = vand.u32 1, %v5270_v58  ;;  %v787_v23 = vrot.slane %v783_v48, 4  ;;  %v3618_v21 = vld [vmem:[#allocation4 + $0x138] sm:$0x33] }
 0x1b2   : > { %v1925_v52 = vsel %vm10922_vm5, %v9341_v8, %v1924_v32  ;;  %v1815_v20 = vsel %vm614_vm2, %v10993_v28, %v1811_v59  ;;  %1823 = vst.msk [vmem:[#allocation4 + $0x88] sm:$0x33] %vm9448_vm6, %v1817_v34  ;;  %v907_v8 = vrot.slane %v903_v43, 4  ;;  %vm3831_vm5 = vcmask 883712  }
 0x1b3   : > { %1931 = vst [vmem:[#allocation4 + $0x80] sm:$0xcc] %v1925_v52  ;;  %v1816_v41 = vsel %vm10995_vm3, %v9322_v17, %v1815_v20  ;;  %v5758_v56 = vcombine.low %v5752_v60, %v5756_v11  ;;  %v5765_v39 = vrot.slane %v5757_v27, %v9436_v1  ;;  %v5388_v4 = vshra.s32 %v9444_v53, 12 }
 0x1b4   : > { %1822 = vst [vmem:[#allocation4 + $0x80] sm:$0x33] %v1816_v41  ;;  %v5619_v15 = vshra.s32 %v9444_v53, 14  ;;  %v10996_v17 = vrot.slane %v9475_v33, 4  ;;  %v5272_v46 = vcvt.s32.f32 %v5271_v29  ;;  %v6170_v16 = vshra.s32 %v9444_v53, 19  ;;  %v2023_v13 = vpop.permute.xlu1 %2022 }
 0x1b5   : > { %v5772_v2 = vrot.slane %v5758_v56, %v9436_v1  ;;  %vm10997_vm3 = vcmask 130048   ;;  %v10998_v60 = vrot.slane %v9439_v62, 4  ;;  %v5389_v11 = vand.u32 1, %v5388_v4  ;;  %v1024_v34 = vpop.permute.xlu0 %1023  ;;  %v3615_v43 = vld [vmem:[#allocation4 + $0x120] sm:$0xff] }
 0x1b6   : > { %v913_v59 = vsel %vm614_vm2, %v10996_v17, %v907_v8  ;;  %v5620_v52 = vand.u32 1, %v5619_v15  ;;  %v2026_v20 = vrot.slane %v2023_v13, 4  ;;  %v7925_v27 = vld [vmem:[#allocation4 + $0x124] ss:$24 sps:$4 sm:$0x3f]   ;;  %v1028_v8 = vrot.slane %v1024_v34, 4 }
 0x1b7   : > { %v914_v58 = vsel %vm10997_vm3, %v9475_v33, %v913_v59  ;;  %v793_v32 = vsel %vm614_vm2, %v10998_v60, %v787_v23  ;;  %v5773_v41 = vcombine.low %v5765_v39, %v5772_v2  ;;  %v5277_v33 = vrot.slane %v5272_v46, %v10984_v14  ;;  %7573 = vmatprep.subr.msk.bf16.mxu0 %vm3835_vm9, %v7925_v27 }
 0x1b8   : > { %920 = vst.msk [vmem:[#allocation4 + $0x28] sm:$0x33] %vm9448_vm6, %v914_v58  ;;  %v794_v28 = vsel %vm789_vm10, %v9439_v62, %v793_v32  ;;  %v7567_v48 = vcombine.low %v3615_v43, %v3618_v21  ;;  %v5281_v56 = vrot.slane %v5272_v46, %v10985_v37  ;;  %v5285_v29 = vrot.slane %v5272_v46, %v10987_v47  ;;  %v2223_v58 = vpop.permute.xlu1 %2222  ;;  %v9750_v32 = vld [vmem:[%s10835_s6] sm:$0x1] }
 0x1b9   : > { %803 = vst.msk [vmem:[#allocation4 + $0x10] sm:$0xcc] %vm9662_vm12, %v794_v28  ;;  %v10999_v23 = vrot.slane %v9352_v30, 4  ;;  %v2032_v4 = vsel %vm10923_vm4, %v2023_v13, %v2026_v20  ;;  %5774 = vrot.lane.b32.xlu0 %v5773_v41, %s8019_s14  ;;  %v5289_v39 = vrot.slane %v5272_v46, %v10988_v5  ;;  %v5390_v15 = vcvt.s32.f32 %v5389_v11  ;;  %v2117_v21 = vpop.permute.xlu0 %2116  ;;  %v3592_v11 = vld [vmem:[#allocation4 + $0x68] sm:$0xff]  ;;  %s8025_s14 = smov 47  }
 0x1ba   : > { %2038 = vst.msk [vmem:[#allocation4 + $0xa0] sm:$0x33] %vm9448_vm6, %v2032_v4  ;;  %v11000_v59 = vrot.slane %v9473_v55, 4  ;;  %v3837_v60 = vsel %vm3835_vm9, %v7567_v48, 0  ;;  %v5290_v46 = vcombine.low %v5277_v33, %v5281_v56  ;;  %v2226_v13 = vrot.slane %v2223_v58, 4 }
 0x1bb   : > { %v2030_v62 = vsel %vm614_vm2, %v10999_v23, %v2026_v20  ;;  %3867 = vmatpush1.bf16.msra.mxu0 %v3837_v60  ;;  %v3595_v28 = vld [vmem:[#allocation4 + $0x80] sm:$0xff]  ;;  %v5291_v34 = vcombine.low %v5285_v29, %v5289_v39  ;;  %v5395_v43 = vrot.slane %v5390_v15, %v10984_v14  ;;  %v2120_v27 = vrot.slane %v2117_v21, 4 }
 0x1bc   : > { %v2031_v17 = vsel %vm10923_vm4, %v9352_v30, %v2030_v62  ;;  %v1034_v2 = vsel %vm614_vm2, %v11000_v59, %v1028_v8  ;;  %v7927_v20 = vld [vmem:[#allocation4 + $0x6c] ss:$24 sps:$4 sm:$0xff]   ;;  %v7545_v41 = vcombine.low %v3592_v11, %v3595_v28  ;;  %v5298_v33 = vrot.slane %v5290_v46, %v9436_v1  ;;  %v1141_v59 = vpop.permute.xlu1 %1140 }
 0x1bd   : > { %2037 = vst [vmem:[#allocation4 + $0x98] sm:$0x33] %v2031_v17  ;;  %v1035_v30 = vsel %vm1030_vm14, %v9473_v55, %v1034_v2  ;;  %v5399_v8 = vrot.slane %v5390_v15, %v10985_v37  ;;  %v11001_v55 = vrot.slane %v9375_v24, 4  ;;  %v2232_v56 = vsel %vm1441_vm8, %v2223_v58, %v2226_v13  ;;  %3899 = vmatprep.subr.bf16.mxu1 %v7927_v20  ;;  %v2332_v60 = vpop.permute.xlu0 %2331 }
 0x1be   : > { %1041 = vst.msk [vmem:[#allocation4 + $0x28] sm:$0xcc] %vm9662_vm12, %v1035_v30  ;;  %v5305_v29 = vrot.slane %v5291_v34, %v9436_v1  ;;  %v5403_v23 = vrot.slane %v5390_v15, %v10987_v47  ;;  %v11002_v4 = vrot.slane %v9364_v54, 4  ;;  %v2126_v17 = vsel %vm1562_vm13, %v2117_v21, %v2120_v27  ;;  %3900 = vmatpush1.bf16.msra.mxu1 %v7545_v41 }
 0x1bf   : > { %v2230_v48 = vsel %vm614_vm2, %v11001_v55, %v2226_v13  ;;  %2238 = vst.msk [vmem:[#allocation4 + $0xb8] sm:$0x33] %vm9448_vm6, %v2232_v56  ;;  %7574 = vmatmul.mubr.msk.bf16.vlgmr.msra.gmra.mrb[0].mxu0 %vm3831_vm5, %v9750_v32  ;;  %v5621_v2 = vcvt.s32.f32 %v5620_v52  ;;  %v11003_v46 = vmov 0   ;;  %v5407_v13 = vrot.slane %v5390_v15, %v10988_v5 }
 0x1c0   : > { %v2231_v62 = vsel %vm1441_vm8, %v9375_v24, %v2230_v48  ;;  %v2124_v39 = vsel %vm614_vm2, %v11002_v4, %v2120_v27  ;;  %2132 = vst.msk [vmem:[#allocation4 + $0xa0] sm:$0xcc] %vm9662_vm12, %v2126_v17  ;;  %v1145_v24 = vrot.slane %v1141_v59, 4  ;;  %3968 = vmatprep.mubr.bf16.mxu0 %v11003_v46  ;;  %v5306_v30 = vcombine.low %v5298_v33, %v5305_v29 }
 0x1c1   : > { %2237 = vst [vmem:[#allocation4 + $0xb0] sm:$0x33] %v2231_v62  ;;  %v2125_v58 = vsel %vm1562_vm13, %v9364_v54, %v2124_v39  ;;  %v2335_v21 = vrot.slane %v2332_v60, 4  ;;  %v5408_v11 = vcombine.low %v5395_v43, %v5399_v8  ;;  %v5626_v28 = vrot.slane %v5621_v2, %v10984_v14  ;;  %v1379_v8 = vpop.permute.xlu1 %1378 }
 0x1c2   : > { %2131 = vst [vmem:[#allocation4 + $0x98] sm:$0xcc] %v2125_v58  ;;  %v5630_v52 = vrot.slane %v5621_v2, %v10985_v37  ;;  %v1151_v54 = vsel %vm614_vm2, %v1144_v31, %v1145_v24  ;;  %5307 = vrot.lane.b32.xlu1 %v5306_v30, %s8021_s21  ;;  %v5409_v20 = vcombine.low %v5403_v23, %v5407_v13  ;;  %v11004_v43 = vrot.slane %v9390_v44, 4  ;;  %s11026_s21 = smov 119  }
 0x1c3   : > { %v5634_v34 = vrot.slane %v5621_v2, %v10987_v47  ;;  %v5638_v27 = vrot.slane %v5621_v2, %v10988_v5  ;;  %v1152_v15 = vsel %vm1147_vm1, %v9577_v61, %v1151_v54  ;;  %vm11005_vm7 = vcmask 539648   ;;  %v1262_v61 = vpop.permute.xlu0 %1261 }
 0x1c4   : > { %v2339_v41 = vsel %vm614_vm2, %v11004_v43, %v2335_v21  ;;  %v2341_v33 = vsel %vm11005_vm7, %v2332_v60, %v2335_v21  ;;  %v5416_v55 = vrot.slane %v5408_v11, %v9436_v1  ;;  %1158 = vst.msk [vmem:[#allocation4 + $0x40] sm:$0x33] %vm9448_vm6, %v1152_v15  ;;  %vm11006_vm3 = vmmov %vm11005_vm7  ;;  %v1383_v48 = vrot.slane %v1379_v8, 4 }
 0x1c5   : > { %v2340_v31 = vsel %vm11006_vm3, %v9390_v44, %v2339_v41  ;;  %2347 = vst.msk [vmem:[#allocation4 + $0xb8] sm:$0xcc] %vm9662_vm12, %v2341_v33  ;;  %v7929_v56 = vld [vmem:[#allocation4 + $0x10] ss:$24 sps:$4 sm:$0xff]   ;;  %v7931_v29 = vld [vmem:[#allocation4 + $0x14] ss:$24 sps:$4 sm:$0xff]   ;;  %v5423_v23 = vrot.slane %v5409_v20, %v9436_v1  ;;  %v5639_v62 = vcombine.low %v5626_v28, %v5630_v52  ;;  %v5640_v39 = vcombine.low %v5634_v34, %v5638_v27 }
 0x1c6   : > { %2346 = vst [vmem:[#allocation4 + $0xb0] sm:$0xcc] %v2340_v31  ;;  %v1266_v4 = vrot.slane %v1262_v61, 4  ;;  %v6171_v17 = vand.u32 1, %v6170_v16  ;;  %v4922_v59 = vshra.s32 %v9444_v53, 8  ;;  %v1389_v44 = vsel %vm614_vm2, %v1382_v7, %v1383_v48  ;;  %3936 = vmatprep.subr.bf16.mxu0 %v7931_v29  ;;  %v2438_v16 = vpop.permute.xlu1 %2437 }
 0x1c7   : > { %v5424_v2 = vcombine.low %v5416_v55, %v5423_v23  ;;  %v5647_v58 = vrot.slane %v5639_v62, %v9436_v1  ;;  %v6515_v24 = vshra.s32 %v9444_v53, 22  ;;  %v1390_v60 = vsel %vm1385_vm15, %v9601_v38, %v1389_v44  ;;  %3937 = vmatpush1.bf16.msra.mxu0 %v7929_v56  ;;  %v1500_v53 = vpop.permute.xlu0 %1499 }
 0x1c8   : > { %v1272_v30 = vsel %vm614_vm2, %v1265_v3, %v1266_v4  ;;  %v5654_v13 = vrot.slane %v5640_v39, %v9436_v1  ;;  %v6172_v21 = vcvt.s32.f32 %v6171_v17  ;;  %1396 = vst.msk [vmem:[#allocation4 + $0x58] sm:$0x33] %vm9448_vm6, %v1390_v60  ;;  %v2441_v11 = vrot.slane %v2438_v16, 4 }
 0x1c9   : > { %v1273_v7 = vsel %vm1268_vm11, %v9604_v6, %v1272_v30  ;;  %5425 = vrot.lane.b32.xlu0 %v5424_v2, %s8000_s22  ;;  %v4923_v38 = vand.u32 1, %v4922_v59  ;;  %v6516_v28 = vand.u32 1, %v6515_v24  ;;  %v1504_v3 = vrot.slane %v1500_v53, 4  ;;  %v3598_v29 = vld [vmem:[#allocation4 + $0x98] sm:$0xff]  ;;  %s8024_s22 = smov 110  }
 0x1ca   : > { %1279 = vst.msk [vmem:[#allocation4 + $0x40] sm:$0xcc] %vm9662_vm12, %v1273_v7  ;;  %v5655_v52 = vcombine.low %v5647_v58, %v5654_v13  ;;  %v6177_v54 = vrot.slane %v6172_v21, %v10984_v14  ;;  %v6181_v20 = vrot.slane %v6172_v21, %v10985_v37  ;;  %v11007_v34 = vrot.slane %v9401_v10, 4  ;;  %v2652_v8 = vpop.permute.xlu1 %2651 }
 0x1cb   : > { %vm11008_vm7 = vcmask 531456   ;;  %v6185_v15 = vrot.slane %v6172_v21, %v10987_v47  ;;  %v6189_v43 = vrot.slane %v6172_v21, %v10988_v5  ;;  %v1510_v33 = vsel %vm614_vm2, %v1503_v35, %v1504_v3  ;;  %v2547_v56 = vpop.permute.xlu0 %2546 }
 0x1cc   : > { %v2445_v27 = vsel %vm614_vm2, %v11007_v34, %v2441_v11  ;;  %v2447_v6 = vsel %vm11008_vm7, %v2438_v16, %v2441_v11  ;;  %vm11009_vm3 = vmmov %vm11008_vm7  ;;  %5656 = vrot.lane.b32.xlu1 %v5655_v52, %s8020_s17  ;;  %v6190_v55 = vcombine.low %v6177_v54, %v6181_v20  ;;  %v4924_v31 = vcvt.s32.f32 %v4923_v38  ;;  %v3489_v52 = vld [vmem:[#allocation2 + $0x10] sm:$0xff]  ;;  %s11028_s17 = smov 127  }
 0x1cd   : > { %v2446_v41 = vsel %vm11009_vm3, %v9401_v10, %v2445_v27  ;;  %2453 = vst.msk [vmem:[#allocation4 + $0xd0] sm:$0x33] %vm9448_vm6, %v2447_v6  ;;  %v1511_v48 = vsel %vm1506_vm0, %v9629_v0, %v1510_v33  ;;  %v2655_v61 = vrot.slane %v2652_v8, 4  ;;  %v3601_v10 = vld [vmem:[#allocation4 + $0xb0] sm:$0xff]  ;;  %v6191_v62 = vcombine.low %v6185_v15, %v6189_v43 }
 0x1ce   : > { %2452 = vst [vmem:[#allocation4 + $0xc8] sm:$0x33] %v2446_v41  ;;  %v7932_v23 = vld [vmem:[#allocation4 + $0x9c] ss:$24 sps:$4 sm:$0xff]   ;;  %v9842_v4 = vcvt.s32.f32 %v6516_v28  ;;  %1517 = vst.msk [vmem:[#allocation4 + $0x58] sm:$0xcc] %vm9662_vm12, %v1511_v48  ;;  %v7551_v39 = vcombine.low %v3598_v29, %v3601_v10  ;;  %v6198_v17 = vrot.slane %v6190_v55, %v9436_v1  ;;  %v4929_v59 = vrot.slane %v4924_v31, %v10984_v14  ;;  %v3527_v21 = vpop.permute.xlu1 %3526 }
 0x1cf   : > { %v2550_v35 = vrot.slane %v2547_v56, 4  ;;  %v11010_v44 = vrot.slane %v9421_v51, 4  ;;  %vm11011_vm7 = vcmask 146432   ;;  %3901 = vmatprep.subr.bf16.mxu1 %v7932_v23  ;;  %v6205_v58 = vrot.slane %v6191_v62, %v9436_v1  ;;  %v9867_v38 = vpop.permute.xlu0 %2766 }
 0x1d0   : > { %v2660_v2 = vsel %vm11011_vm7, %v2652_v8, %v2655_v61  ;;  %v4933_v24 = vrot.slane %v4924_v31, %v10985_v37  ;;  %vm11012_vm3 = vmmov %vm11011_vm7  ;;  %v11013_v30 = vrot.slane %v9412_v18, 4  ;;  %vm11014_vm4 = vcmask 523264   ;;  %3902 = vmatpush1.bf16.msra.mxu1 %v7551_v39 }
 0x1d1   : > { %v2658_v0 = vsel %vm614_vm2, %v11010_v44, %v2655_v61  ;;  %2666 = vst.msk [vmem:[#allocation4 + $0xe8] sm:$0x33] %vm9448_vm6, %v2660_v2  ;;  %v2556_v13 = vsel %vm11014_vm4, %v2547_v56, %v2550_v35  ;;  %v4937_v7 = vrot.slane %v4924_v31, %v10987_v47  ;;  %vm11015_vm7 = vmmov %vm11014_vm4  ;;  %v3530_v53 = vrot.slane %v3527_v21, 4  ;;  %v7939_v2 = vld [vmem:[#allocation4 + $0x74] ss:$24 sps:$4 sm:$0xff]  }
 0x1d2   : > { %v2659_v60 = vsel %vm11012_vm3, %v9421_v51, %v2658_v0  ;;  %v2554_v16 = vsel %vm614_vm2, %v11013_v30, %v2550_v35  ;;  %2562 = vst.msk [vmem:[#allocation4 + $0xd0] sm:$0xcc] %vm9662_vm12, %v2556_v13  ;;  %v3490_v51 = vld [vmem:[#allocation2 + $0x18] sm:$0xff]  ;;  %v6206_v28 = vcombine.low %v6198_v17, %v6205_v58  ;;  %v4941_v3 = vrot.slane %v4924_v31, %v10988_v5  ;;  %v9889_v48 = vpop.permute.xlu1 %3000 }
 0x1d3   : > { %2665 = vst [vmem:[#allocation4 + $0xe0] sm:$0x33] %v2659_v60  ;;  %v2555_v11 = vsel %vm11015_vm7, %v9412_v18, %v2554_v16  ;;  %v2772_v54 = vrot.slane %v9867_v38, 4  ;;  %v4942_v20 = vcombine.low %v4929_v59, %v4933_v24  ;;  %v6522_v34 = vrot.slane %v9842_v4, %v10984_v14  ;;  %v9895_v23 = vpop.permute.xlu0 %2881  ;;  %v9906_v24 = vld [vmem:[#allocation3 + $0x2] sm:$0xf] }
 0x1d4   : > { %2561 = vst [vmem:[#allocation4 + $0xc8] sm:$0xcc] %v2555_v11  ;;  %v6526_v18 = vrot.slane %v9842_v4, %v10985_v37  ;;  %v11016_v27 = vrot.slane %v9501_v9, 4  ;;  %v3535_v15 = vsel %vm1562_vm13, %v3527_v21, %v3530_v53  ;;  %6207 = vrot.lane.b32.xlu0 %v6206_v28, %s8008_s19  ;;  %v4943_v43 = vcombine.low %v4937_v7, %v4941_v3  ;;  %s8026_s19 = smov 126  }
 0x1d5   : > { %v6530_v41 = vrot.slane %v9842_v4, %v10987_v47  ;;  %v3541_v8 = vmul.f32 %v3535_v15, %v3490_v51  ;;  %v11017_v55 = vrot.slane %v9429_v49, 4  ;;  %v4950_v61 = vrot.slane %v4942_v20, %v9436_v1  ;;  %v7936_v62 = vld [vmem:[#allocation4 + $0x44] ss:$24 sps:$4 sm:$0xff]  }
 0x1d6   : > { %v3533_v6 = vsel %vm614_vm2, %v11016_v27, %v3530_v53  ;;  %v3006_v10 = vrot.slane %v9889_v48, 4  ;;  %v4957_v35 = vrot.slane %v4943_v43, %v9436_v1  ;;  %v2887_v17 = vrot.slane %v9895_v23, 4  ;;  %3938 = vmatprep.subr.bf16.mxu0 %v7936_v62  ;;  %v9916_v13 = vpop.permute.xlu1 %3234  ;;  %v7937_v53 = vld [vmem:[#allocation4 + $0x70] ss:$24 sps:$4 sm:$0xff]  }
 0x1d7   : > { %v3534_v33 = vsel %vm1562_vm13, %v9501_v9, %v3533_v6  ;;  %v2776_v31 = vsel %vm614_vm2, %v11017_v55, %v2772_v54  ;;  %v7934_v9 = vld [vmem:[#allocation4 + $0x40] ss:$24 sps:$4 sm:$0xff]   ;;  %v3547_v39 = vcombine.high %v3541_v8, %v3541_v8  ;;  %v6534_v59 = vrot.slane %v9842_v4, %v10988_v5  ;;  %v9921_v51 = vpop.permute.xlu0 %3115 }
 0x1d8   : > { %v3540_v56 = vmul.f32 %v3534_v33, %v3489_v52  ;;  %v2777_v29 = vsel %vm789_vm10, %v9429_v49, %v2776_v31  ;;  %v6535_v44 = vcombine.low %v6522_v34, %v6526_v18  ;;  %v3010_v49 = vsel %vm614_vm2, %v3005_v12, %v3006_v10  ;;  %3939 = vmatpush1.bf16.msra.mxu0 %v7934_v9  ;;  %v7942_v34 = vld [vmem:[#allocation4 + $0xa4] ss:$24 sps:$4 sm:$0xff]  }
 0x1d9   : > { %2784 = vst [vmem:[#allocation4 + $0xe0] sm:$0xcc] %v2777_v29  ;;  %v4958_v58 = vcombine.low %v4950_v61, %v4957_v35  ;;  %v5970_v60 = vshra.s32 %v9906_v24, 17  ;;  %v7774_v30 = vpack.c.bf16 %v3547_v39, %v3541_v8  ;;  %v3011_v16 = vsel %vm1030_vm14, %v9542_v22, %v3010_v49  ;;  %3940 = vmatprep.subr.bf16.mxu0 %v7939_v2 }
 0x1da   : > { %v3546_v0 = vcombine.high %v3540_v56, %v3540_v56  ;;  %v2891_v4 = vsel %vm614_vm2, %v2886_v19, %v2887_v17  ;;  %v6536_v12 = vcombine.low %v6530_v41, %v6534_v59  ;;  %3018 = vst [vmem:[#allocation4 + $0xf8] sm:$0xcc] %v3011_v16  ;;  %vm11018_vm4 = vcmask 130048   ;;  %v9945_v33 = vpop.permute.xlu1 %3468  ;;  %v7940_v59 = vld [vmem:[#allocation4 + $0xa0] ss:$24 sps:$4 sm:$0xff]  }
 0x1db   : > { %v2892_v7 = vsel %vm11018_vm4, %v9529_v63, %v2891_v4  ;;  %v3240_v11 = vrot.slane %v9916_v13, 4  ;;  %4959 = vrot.lane.b32.xlu1 %v4958_v58, %s8011_s23  ;;  %v6543_v22 = vrot.slane %v6535_v44, %v9436_v1  ;;  %3577 = vst.msk [vmem:[#allocation4 + $0x148] sm:$0x33] %vm9448_vm6, %v7774_v30  ;;  %v3121_v19 = vrot.slane %v9921_v51, 4  ;;  %v3604_v8 = vld [vmem:[#allocation4 + $0xc8] sm:$0xff]  ;;  %v9950_v29 = vpop.permute.xlu0 %3349  ;;  %vm11021_vm3 = vmmov %vm11018_vm4 }
 0x1dc   : > { %v7773_v21 = vpack.c.bf16 %v3546_v0, %v3540_v56  ;;  %2899 = vst [vmem:[#allocation4 + $0xf8] sm:$0x33] %v2892_v7  ;;  %v6550_v28 = vrot.slane %v6536_v12, %v9436_v1  ;;  %v5971_v3 = vand.u32 1, %v5970_v60  ;;  %v5855_v63 = vshra.s32 %v9906_v24, 16  ;;  %3941 = vmatpush1.bf16.msra.mxu0 %v7937_v53 }
 0x1dd   : > { %v11019_v52 = vrot.slane %v9579_v36, 4  ;;  %v6399_v18 = vshra.s32 %v9906_v24, 21  ;;  %v6631_v27 = vshra.s32 %v9906_v24, 23  ;;  %v6286_v6 = vshra.s32 %v9906_v24, 20  ;;  %3942 = vmatprep.subr.bf16.mxu0 %v7942_v34 }
 0x1de   : > { %3576 = vst [vmem:[#allocation4 + $0x140] sm:$0x33] %v7773_v21  ;;  %v11020_v43 = vrot.slane %v9560_v42, 4  ;;  %v6551_v55 = vcombine.low %v6543_v22, %v6550_v28  ;;  %v5972_v31 = vcvt.s32.f32 %v5971_v3  ;;  %v3474_v56 = vrot.slane %v9945_v33, 4  ;;  %v2884_v4 = vpop.permute.xlu1 %2883 }
 0x1df   : > { %v3244_v20 = vsel %vm614_vm2, %v11019_v52, %v3240_v11  ;;  %v5856_v62 = vand.u32 1, %v5855_v63  ;;  %v6400_v35 = vand.u32 1, %v6399_v18  ;;  %v3355_v39 = vrot.slane %v9950_v29, 4  ;;  %v2769_v22 = vpop.permute.xlu0 %2768 }
 0x1e0   : > { %v3245_v15 = vsel %vm1268_vm11, %v9579_v36, %v3244_v20  ;;  %v3125_v41 = vsel %vm614_vm2, %v11020_v43, %v3121_v19  ;;  %v3607_v36 = vld [vmem:[#allocation4 + $0xe0] sm:$0xff]  ;;  %6552 = vrot.lane.b32.xlu0 %v6551_v55, %s8009_s24  ;;  %v5977_v0 = vrot.slane %v5972_v31, %v10984_v14  ;;  %v3478_v49 = vsel %vm614_vm2, %v3473_v45, %v3474_v56  ;;  %s11029_s24 = smov 120  }
 0x1e1   : > { %3252 = vst [vmem:[#allocation4 + $0x110] sm:$0xcc] %v3245_v15  ;;  %v3126_v61 = vsel %vm1147_vm1, %v9560_v42, %v3125_v41  ;;  %v7943_v9 = vld [vmem:[#allocation4 + $0xcc] ss:$24 sps:$4 sm:$0xff]   ;;  %v7557_v44 = vcombine.low %v3604_v8, %v3607_v36  ;;  %v5981_v42 = vrot.slane %v5972_v31, %v10985_v37  ;;  %v5985_v2 = vrot.slane %v5972_v31, %v10987_v47 }
 0x1e2   : > { %3133 = vst [vmem:[#allocation4 + $0x110] sm:$0x33] %v3126_v61  ;;  %3903 = vmatprep.subr.bf16.mxu1 %v7943_v9  ;;  %v5989_v58 = vrot.slane %v5972_v31, %v10988_v5  ;;  %v5857_v60 = vcvt.s32.f32 %v5856_v62  ;;  %v3479_v30 = vsel %vm1506_vm0, %v9666_v26, %v3478_v49  ;;  %v3359_v16 = vsel %vm614_vm2, %v3354_v25, %v3355_v39  ;;  %v3118_v43 = vpop.permute.xlu1 %3117 }
 0x1e3   : > { %3904 = vmatpush1.bf16.msra.mxu1 %v7557_v44  ;;  %3943 = vmatpush1.bf16.msra.mxu0 %v7940_v59  ;;  %v5990_v12 = vcombine.low %v5977_v0, %v5981_v42  ;;  %v6401_v45 = vcvt.s32.f32 %v6400_v35  ;;  %3486 = vst [vmem:[#allocation4 + $0x128] sm:$0xcc] %v3479_v30  ;;  %v3360_v21 = vsel %vm1385_vm15, %v9646_v40, %v3359_v16  ;;  %v2888_v7 = vrot.slane %v2884_v4, 4  ;;  %v3003_v31 = vpop.permute.xlu0 %3002  ;;  %v3610_v61 = vld [vmem:[#allocation4 + $0xf8] sm:$0xff] }
 0x1e4   : > { %v5991_v53 = vcombine.low %v5985_v2, %v5989_v58  ;;  %v5862_v26 = vrot.slane %v5857_v60, %v10984_v14  ;;  %3367 = vst [vmem:[#allocation4 + $0x128] sm:$0x33] %v3360_v21  ;;  %v2773_v28 = vrot.slane %v2769_v22, 4  ;;  %v5866_v25 = vrot.slane %v5857_v60, %v10985_v37 }
 0x1e5   : > { %v5998_v3 = vrot.slane %v5990_v12, %v9436_v1  ;;  %v5870_v63 = vrot.slane %v5857_v60, %v10987_v47  ;;  %v2893_v52 = vsel %vm614_vm2, %v2887_v17, %v2888_v7  ;;  %v5874_v40 = vrot.slane %v5857_v60, %v10988_v5 }
 0x1e6   : > { %v6005_v20 = vrot.slane %v5991_v53, %v9436_v1  ;;  %v6406_v34 = vrot.slane %v6401_v45, %v10984_v14  ;;  %v2894_v18 = vsel %vm11021_vm3, %v9895_v23, %v2893_v52  ;;  %v2778_v15 = vsel %vm614_vm2, %v2772_v54, %v2773_v28  ;;  %v3352_v60 = vpop.permute.xlu1 %3351 }
 0x1e7   : > { %v5875_v41 = vcombine.low %v5862_v26, %v5866_v25  ;;  %v6410_v8 = vrot.slane %v6401_v45, %v10985_v37  ;;  %2900 = vst.msk [vmem:[#allocation4 + $0x100] sm:$0x33] %vm9448_vm6, %v2894_v18  ;;  %v2779_v17 = vsel %vm789_vm10, %v9867_v38, %v2778_v15  ;;  %v3122_v55 = vrot.slane %v3118_v43, 4  ;;  %v3237_v4 = vpop.permute.xlu0 %3236 }
 0x1e8   : > { %v6006_v23 = vcombine.low %v5998_v3, %v6005_v20  ;;  %v5876_v62 = vcombine.low %v5870_v63, %v5874_v40  ;;  %2785 = vst.msk [vmem:[#allocation4 + $0xe8] sm:$0xcc] %vm9662_vm12, %v2779_v17  ;;  %v3007_v54 = vrot.slane %v3003_v31, 4  ;;  %v6414_v44 = vrot.slane %v6401_v45, %v10987_v47 }
 0x1e9   : > { %v3613_v36 = vld [vmem:[#allocation4 + $0x110] sm:$0xff]  ;;  %v5883_v59 = vrot.slane %v5875_v41, %v9436_v1  ;;  %v3127_v38 = vsel %vm614_vm2, %v3121_v19, %v3122_v55  ;;  %v6418_v42 = vrot.slane %v6401_v45, %v10988_v5  ;;  %v6632_v49 = vand.u32 1, %v6631_v27 }
 0x1ea   : > { %v7945_v9 = vld [vmem:[#allocation4 + $0xfc] ss:$24 sps:$4 sm:$0xff]   ;;  %v7563_v35 = vcombine.low %v3610_v61, %v3613_v36  ;;  %6007 = vrot.lane.b32.xlu1 %v6006_v23, %s8017_s18  ;;  %v5890_v0 = vrot.slane %v5876_v62, %v9436_v1  ;;  %v3128_v2 = vsel %vm1147_vm1, %v9921_v51, %v3127_v38  ;;  %v3012_v58 = vsel %vm614_vm2, %v3006_v10, %v3007_v54  ;;  %s11022_s18 = smov 81  }
 0x1eb   : > { %3905 = vmatprep.subr.bf16.mxu1 %v7945_v9  ;;  %v6419_v19 = vcombine.low %v6406_v34, %v6410_v8  ;;  %v6287_v30 = vand.u32 1, %v6286_v6  ;;  %3134 = vst.msk [vmem:[#allocation4 + $0x118] sm:$0x33] %vm9448_vm6, %v3128_v2  ;;  %v3013_v16 = vsel %vm1030_vm14, %v9889_v48, %v3012_v58  ;;  %v3356_v27 = vrot.slane %v3352_v60, 4  ;;  %v3471_v20 = vpop.permute.xlu0 %3470 }
 0x1ec   : > { %3906 = vmatpush1.bf16.msra.mxu1 %v7563_v35  ;;  %v7947_v12 = vld [vmem:[#allocation4 + $0x12c] ss:$24 sps:$4 sm:$0x3f]   ;;  %v5891_v51 = vcombine.low %v5883_v59, %v5890_v0  ;;  %v6420_v45 = vcombine.low %v6414_v44, %v6418_v42  ;;  %3019 = vst.msk [vmem:[#allocation4 + $0x100] sm:$0xcc] %vm9662_vm12, %v3013_v16  ;;  %v3241_v10 = vrot.slane %v3237_v4, 4  ;;  %v6633_v22 = vcvt.s32.f32 %v6632_v49 }
 0x1ed   : > { %v7949_v21 = vld [vmem:[#allocation4 + $0x128] ss:$24 sps:$4 sm:$0x3f]   ;;  %v6427_v7 = vrot.slane %v6419_v19, %v9436_v1  ;;  %v6288_v6 = vcvt.s32.f32 %v6287_v30  ;;  %v3361_v53 = vsel %vm614_vm2, %v3355_v39, %v3356_v27  ;;  %7575 = vmatprep.subr.msk.bf16.mxu1 %vm3835_vm9, %v7947_v12  ;;  %v6860_v26 = vshra.s32 %v9906_v24, 25 }
 0x1ee   : > { %5892 = vrot.lane.b32.xlu0 %v5891_v51, %s11022_s18  ;;  %v6434_v48 = vrot.slane %v6420_v45, %v9436_v1  ;;  %v6976_v28 = vshra.s32 %v9906_v24, 26  ;;  %v3362_v3 = vsel %vm1385_vm15, %v9950_v29, %v3361_v53  ;;  %v3246_v25 = vsel %vm614_vm2, %v3240_v11, %v3241_v10 }
 0x1ef   : > { %v3843_v63 = vsel %vm3835_vm9, %v7949_v21, 0  ;;  %v6638_v39 = vrot.slane %v6633_v22, %v10984_v14  ;;  %3368 = vst.msk [vmem:[#allocation4 + $0x130] sm:$0x33] %vm9448_vm6, %v3362_v3  ;;  %v3247_v52 = vsel %vm1268_vm11, %v9916_v13, %v3246_v25  ;;  %v7950_v40 = vld [vmem:[#allocation4 + $0xd0] ss:$24 sps:$4 sm:$0xff]   ;;  %v6642_v29 = vrot.slane %v6633_v22, %v10985_v37 }
 0x1f0   : > { %3908 = vmatpush1.bf16.msra.mxu1 %v3843_v63  ;;  %v7952_v34 = vld [vmem:[#allocation4 + $0xd4] ss:$24 sps:$4 sm:$0xff]   ;;  %v6435_v18 = vcombine.low %v6427_v7, %v6434_v48  ;;  %v6646_v15 = vrot.slane %v6633_v22, %v10987_v47  ;;  %3253 = vst.msk [vmem:[#allocation4 + $0x118] sm:$0xcc] %vm9662_vm12, %v3247_v52  ;;  %v3475_v11 = vrot.slane %v3471_v20, 4  ;;  %v6650_v43 = vrot.slane %v6633_v22, %v10988_v5 }
 0x1f1   : > { %v6293_v57 = vrot.slane %v6288_v6, %v10984_v14  ;;  %v6297_v41 = vrot.slane %v6288_v6, %v10985_v37  ;;  %3944 = vmatprep.subr.bf16.mxu0 %v7952_v34  ;;  %v6651_v13 = vcombine.low %v6638_v39, %v6642_v29  ;;  %v6301_v8 = vrot.slane %v6288_v6, %v10987_v47 }
 0x1f2   : > { %6436 = vrot.lane.b32.xlu1 %v6435_v18, %s8010_s26  ;;  %v6305_v17 = vrot.slane %v6288_v6, %v10988_v5  ;;  %v6861_v55 = vand.u32 1, %v6860_v26  ;;  %v3480_v31 = vsel %vm614_vm2, %v3474_v56, %v3475_v11  ;;  %3945 = vmatpush1.bf16.msra.mxu0 %v7950_v40  ;;  %v6652_v61 = vcombine.low %v6646_v15, %v6650_v43  ;;  %s8027_s26 = smov 118  }
 0x1f3   : > { %7576 = vmatmul.mubr.msk.bf16.vlgmr.msra.gmra.mrb[0].mxu1 %vm3831_vm5, %v9750_v32  ;;  %v6306_v36 = vcombine.low %v6293_v57, %v6297_v41  ;;  %v6977_v9 = vand.u32 1, %v6976_v28  ;;  %v3481_v23 = vsel %vm1506_vm0, %v9945_v33, %v3480_v31  ;;  %v6659_v62 = vrot.slane %v6651_v13, %v9436_v1 }
 0x1f4   : > { %v6307_v54 = vcombine.low %v6301_v8, %v6305_v17  ;;  %v6862_v35 = vcvt.s32.f32 %v6861_v55  ;;  %7230 = vmatprep.mubr.bf16.mxu1 %v11003_v46  ;;  %3487 = vst.msk [vmem:[#allocation4 + $0x130] sm:$0xcc] %vm9662_vm12, %v3481_v23  ;;  %v6666_v56 = vrot.slane %v6652_v61, %v9436_v1  ;;  %v6747_v38 = vshra.s32 %v9906_v24, 24 }
 0x1f5   : > { %v6314_v59 = vrot.slane %v6306_v36, %v9436_v1  ;;  %v6978_v44 = vcvt.s32.f32 %v6977_v9  ;;  %v3625_v43 = vpop.permute.xlu1 %3624  ;;  %vm11023_vm12 = vcmask 146432   ;;  %vm11025_vm6 = vcmask 1041408  }
 0x1f6   : > { %v6321_v0 = vrot.slane %v6307_v54, %v9436_v1  ;;  %v6867_v33 = vrot.slane %v6862_v35, %v10984_v14  ;;  %v6871_v42 = vrot.slane %v6862_v35, %v10985_v37  ;;  %v6875_v49 = vrot.slane %v6862_v35, %v10987_v47 }
 0x1f7   : > { %v6667_v2 = vcombine.low %v6659_v62, %v6666_v56  ;;  %v6879_v58 = vrot.slane %v6862_v35, %v10988_v5  ;;  %v6983_v50 = vrot.slane %v6978_v44, %v10984_v14  ;;  %v6987_v60 = vrot.slane %v6978_v44, %v10985_v37  ;;  %v7953_v19 = vld [vmem:[#allocation4 + $0x100] ss:$24 sps:$4 sm:$0xff]   ;;  %v7955_v30 = vld [vmem:[#allocation4 + $0x104] ss:$24 sps:$4 sm:$0xff]  }
 0x1f8   : > { %v6880_v16 = vcombine.low %v6867_v33, %v6871_v42  ;;  %v6991_v27 = vrot.slane %v6978_v44, %v10987_v47  ;;  %v6995_v4 = vrot.slane %v6978_v44, %v10988_v5  ;;  %v6322_v12 = vcombine.low %v6314_v59, %v6321_v0  ;;  %3946 = vmatprep.subr.bf16.mxu0 %v7955_v30 }
 0x1f9   : > { %6668 = vrot.lane.b32.xlu1 %v6667_v2, %s8014_s30  ;;  %v6881_v51 = vcombine.low %v6875_v49, %v6879_v58  ;;  %v6996_v45 = vcombine.low %v6983_v50, %v6987_v60  ;;  %v6748_v10 = vand.u32 1, %v6747_v38  ;;  %3947 = vmatpush1.bf16.msra.mxu0 %v7953_v19  ;;  %vm11031_vm7 = vcmask 531456   ;;  %s8030_s30 = smov 62  }
 0x1fa   : > { %v6888_v21 = vrot.slane %v6880_v16, %v9436_v1  ;;  %v6997_v7 = vcombine.low %v6991_v27, %v6995_v4  ;;  %vm11033_vm4 = vcmask 539648  }
 0x1fb   : > { %v6895_v22 = vrot.slane %v6881_v51, %v9436_v1  ;;  %v7004_v6 = vrot.slane %v6996_v45, %v9436_v1  ;;  %v6749_v53 = vcvt.s32.f32 %v6748_v10  ;;  %v7956_v48 = vld [vmem:[#allocation4 + $0x134] ss:$24 sps:$4 sm:$0x3f]   ;;  %v7958_v28 = vld [vmem:[#allocation4 + $0x130] ss:$24 sps:$4 sm:$0x3f]  }
 0x1fc   : > { %v7011_v26 = vrot.slane %v6997_v7, %v9436_v1  ;;  %7577 = vmatprep.subr.msk.bf16.mxu0 %vm3835_vm9, %v7956_v48  ;;  %v3849_v40 = vsel %vm3835_vm9, %v7958_v28, 0 }
 0x1fd   : > { %6323 = vrot.lane.b32.xlu1 %v6322_v12, %s8016_s15  ;;  %v6896_v3 = vcombine.low %v6888_v21, %v6895_v22  ;;  %v6754_v25 = vrot.slane %v6749_v53, %v10984_v14  ;;  %v6758_v63 = vrot.slane %v6749_v53, %v10985_v37  ;;  %v6762_v39 = vrot.slane %v6749_v53, %v10987_v47  ;;  %v10089_v55 = vpop.permute.xlu0 %4139  ;;  %s8031_s15 = smov 54  }
 0x1fe   : > { %v7012_v52 = vcombine.low %v7004_v6, %v7011_v26  ;;  %v6766_v20 = vrot.slane %v6749_v53, %v10988_v5  ;;  %3949 = vmatpush1.bf16.msra.mxu0 %v3849_v40 }
 0x1ff   : > { %6897 = vrot.lane.b32.xlu0 %v6896_v3, %s8013_s28  ;;  %v6767_v34 = vcombine.low %v6754_v25, %v6758_v63  ;;  %s11037_s28 = smov 63  }
 0x200   : > { %v6768_v18 = vcombine.low %v6762_v39, %v6766_v20 }
 0x201   : > { %7013 = vrot.lane.b32.xlu1 %v7012_v52, %s8011_s23  ;;  %v6775_v29 = vrot.slane %v6767_v34, %v9436_v1  ;;  %7578 = vmatmul.mubr.msk.bf16.vlgmr.msra.gmra.mrb[4].mxu0 %vm3831_vm5, %v9750_v32  ;;  %v10091_v23 = vpop.permute.xlu0 %4374  ;;  %vm11024_vm5 = vcmask 662528   ;;  %s8028_s23 = smov 112  }
 0x202   : > { %v6782_v15 = vrot.slane %v6768_v18, %v9436_v1 }
 0x204   : > { %v6783_v11 = vcombine.low %v6775_v29, %v6782_v15  ;;  %v4141_v29 = vrot.slane %v10089_v55, 6 }
 0x205   : > { %v10093_v62 = vpop.permute.xlu0 %4723 }
 0x206   : > { %6784 = vrot.lane.b32.xlu0 %v6783_v11, %s8012_s27  ;;  %s8029_s27 = smov 111  }
 0x20b   : > { %v10095_v32 = vpop.permute.xlu1 %4256 }
 0x20d   : > { %v10097_v54 = vpop.permute.xlu0 %4491 }
 0x20e   : > { %v10941_v6 = vrot.slane %v10097_v54, 6 }
 0x210   : > { %v10099_v35 = vpop.permute.xlu1 %4605  ;;  %v4494_v3 = vsel %vm1147_vm1, %v10941_v6, %v10097_v54 }
 0x219   : > { %v10101_v56 = vpop.permute.xlu0 %5190 }
 0x21c   : > { %v10103_v59 = vpop.permute.xlu1 %4841 }
 0x220   : > { %v10105_v44 = vpop.permute.xlu0 %5539 }
 0x223   : > { %v10107_v38 = vpop.permute.xlu1 %5074 }
 0x22b   : > { %v10109_v0 = vpop.permute.xlu0 %5774 }
 0x234   : > { %v10111_v33 = vpop.permute.xlu1 %5307 }
 0x23b   : > { %v10113_v42 = vpop.permute.xlu0 %5425 }
 0x23c   : > { %v10930_v48 = vrot.slane %v10113_v42, 6 }
 0x23e   : > { %v10115_v19 = vpop.permute.xlu1 %5656  ;;  %v5428_v40 = vsel %vm1441_vm8, %v10930_v48, %v10113_v42  ;;  %vm4017_vm8 = vcmask 142338  }
 0x23f   : > { %vm4018_vm9 = vmor %vm4017_vm8, %vm11025_vm6  ;;  %vm11061_vm6 = vcmask 1039360  }
 0x246   : > { %v10117_v27 = vpop.permute.xlu0 %6207 }
 0x24d   : > { %v10121_v10 = vpop.permute.xlu1 %4959 }
 0x24e   : > { %v10937_v22 = vrot.slane %v10121_v10, 6 }
 0x250   : > { %v4963_v53 = vsel %vm11023_vm12, %v10937_v22, %v10121_v10  ;;  %vm11035_vm12 = vcmask 654336  }
 0x252   : > { %v10123_v21 = vpop.permute.xlu0 %6552 }
 0x260   : > { %v10135_v26 = vpop.permute.xlu0 %5892 }
 0x261   : > { %v10928_v39 = vrot.slane %v10135_v26, 6 }
 0x292   : > { %v3888_v57 = vpop.f32.mrb[0].mxu0 }
 0x293   : > { %v3889_v41 = vadd.f32 %v3888_v57, %v3625_v43  ;;  %v3890_v13 = vpop.f32.mrb[1].mxu0 }
 0x294   : > { %v3891_v8 = vadd.f32 %v3890_v13, %v3625_v43  ;;  %v3892_v17 = vpop.f32.mrb[2].mxu0 }
 0x295   : > { %v3977_v31 = vmax.f32 %v3889_v41, 0.0  ;;  %v3893_v61 = vpop.f32.mrb[3].mxu0  ;;  %v5896_v41 = vsel %vm11024_vm5, %v10928_v39, %v10135_v26  ;;  %v10929_v17 = vrot.slane %v10095_v32, 6  ;;  %vm11036_vm5 = vcmask 670720  }
 0x296   : > { %v3978_v36 = vmax.f32 %v3891_v8, 0.0 }
 0x298   : > { %v3989_v9 = vcombine.low %v3977_v31, %v3978_v36 }
 0x29a   : > { %v3997_v51 = vrot.slane %v3989_v9, %v9436_v1 }
 0x2c6   : > { %v3929_v49 = vpop.f32.mrb[0].mxu1 }
 0x2c7   : > { %v3930_v2 = vadd.f32 %v3929_v49, %v3625_v43  ;;  %v3931_v58 = vpop.f32.mrb[1].mxu1 }
 0x2c8   : > { %v3932_v50 = vadd.f32 %v3931_v58, %v3625_v43  ;;  %v3933_v60 = vpop.f32.mrb[2].mxu1 }
 0x2c9   : > { %v3979_v30 = vmax.f32 %v3930_v2, 0.0  ;;  %v3934_v16 = vpop.f32.mrb[3].mxu1 }
 0x2ca   : > { %v3980_v4 = vmax.f32 %v3932_v50, 0.0 }
 0x2cc   : > { %v3990_v12 = vcombine.low %v3979_v30, %v3980_v4 }
 0x2ce   : > { %v4004_v45 = vrot.slane %v3990_v12, %v9436_v1 }
 0x2d0   : > { %v10125_v7 = vcombine.low %v3997_v51, %v4004_v45  ;;  %v4376_v45 = vrot.slane %v10091_v23, 6 }
 0x2d2   : > { %4016 = vst [vmem:[#allocation5] sm:$0xff] %v10125_v7  ;;  %v4966_v25 = vmul.f32 %v4963_v53, %v10125_v7  ;;  %v4497_v52 = vmul.f32 %v4494_v3, %v10125_v7  ;;  %v5431_v18 = vmul.f32 %v5428_v40, %v10125_v7  ;;  %v5899_v50 = vmul.f32 %v5896_v41, %v10125_v7 }
 0x2d3   : > { %v4260_v53 = vsel %vm1385_vm15, %v10929_v17, %v10095_v32 }
 0x2d4   : > { %v3970_v28 = vpop.f32.mrb[4].mxu0  ;;  %v4970_v15 = vcombine.high %v4966_v25, %v4966_v25  ;;  %v4977_v57 = vrot.slane %v4966_v25, %v9436_v1  ;;  %v4508_v8 = vrot.slane %v4497_v52, %v9436_v1  ;;  %v4501_v61 = vcombine.high %v4497_v52, %v4497_v52 }
 0x2d5   : > { %v3972_v63 = vpop.f32.mrb[5].mxu0  ;;  %v3971_v11 = vadd.f32 %v3970_v28, %v3625_v43  ;;  %v5435_v36 = vcombine.high %v5431_v18, %v5431_v18  ;;  %v5442_v2 = vrot.slane %v5431_v18, %v9436_v1  ;;  %v5903_v52 = vcombine.high %v5899_v50, %v5899_v50 }
 0x2d6   : > { %v3974_v20 = vpop.f32.mrb[6].mxu0  ;;  %v3973_v13 = vadd.f32 %v3972_v63, %v3625_v43  ;;  %v4516_v49 = vcombine.high %v4508_v8, %v4508_v8  ;;  %v4984_v58 = vrot.slane %v4970_v15, %v9436_v1  ;;  %v4515_v60 = vrot.slane %v4501_v61, %v9436_v1 }
 0x2d7   : > { %v3975_v34 = vpop.f32.mrb[7].mxu0  ;;  %v3981_v31 = vmax.f32 %v3971_v11, 0.0  ;;  %v4142_v43 = vsel %vm1506_vm0, %v4141_v29, %v10089_v55  ;;  %v4985_v30 = vcombine.high %v4977_v57, %v4977_v57  ;;  %v5449_v28 = vrot.slane %v5435_v36, %v9436_v1 }
 0x2d8   : > { %v3982_v9 = vmax.f32 %v3973_v13, 0.0  ;;  %v7786_v4 = vpack.c.bf16 %v4516_v49, %v4508_v8  ;;  %v4517_v12 = vcombine.high %v4515_v60, %v4515_v60  ;;  %v4145_v51 = vmul.f32 %v4142_v43, %v10125_v7 }
 0x2d9   : > { %v5450_v25 = vcombine.high %v5442_v2, %v5442_v2  ;;  %v4986_v63 = vcombine.high %v4984_v58, %v4984_v58  ;;  %v7798_v40 = vpack.c.bf16 %v4985_v30, %v4977_v57  ;;  %v5910_v34 = vrot.slane %v5899_v50, %v9436_v1 }
 0x2da   : > { %v4006_v16 = vcombine.low %v3981_v31, %v3982_v9  ;;  %4548 = vrot.lane.b32.xlu1 %v7786_v4, %s11026_s21  ;;  %v7787_v20 = vpack.c.bf16 %v4517_v12, %v4515_v60  ;;  %v4156_v18 = vrot.slane %v4145_v51, %v9436_v1  ;;  %v4263_v15 = vmul.f32 %v4260_v53, %v10125_v7 }
 0x2db   : > { %v4377_v11 = vsel %vm1268_vm11, %v4376_v45, %v10091_v23  ;;  %v5451_v41 = vcombine.high %v5449_v28, %v5449_v28  ;;  %v7810_v13 = vpack.c.bf16 %v5450_v25, %v5442_v2  ;;  %v5917_v57 = vrot.slane %v5903_v52, %v9436_v1 }
 0x2dc   : > { %v4013_v3 = vrot.slane %v4006_v16, %v9436_v1  ;;  %4550 = vrot.lane.b32.xlu0 %v7787_v20, %s11026_s21  ;;  %v7799_v8 = vpack.c.bf16 %v4986_v63, %v4984_v58  ;;  %v5918_v31 = vcombine.high %v5910_v34, %v5910_v34  ;;  %v4164_v61 = vcombine.high %v4156_v18, %v4156_v18 }
 0x2dd   : > { %v4274_v36 = vrot.slane %v4263_v15, %v9436_v1  ;;  %v4380_v9 = vmul.f32 %v4377_v11, %v10125_v7  ;;  %v5919_v49 = vcombine.high %v5917_v57, %v5917_v57  ;;  %v7811_v50 = vpack.c.bf16 %v5451_v41, %v5449_v28 }
 0x2de   : > { %4019 = vst.msk [vmem:[#allocation5 + $0x8] sm:$0xf] %vm4018_vm9, %v4013_v3  ;;  %5017 = vrot.lane.b32.xlu1 %v7798_v40, %s8024_s22  ;;  %v7822_v60 = vpack.c.bf16 %v5918_v31, %v5910_v34  ;;  %v7777_v43 = vpack.c.bf16 %v4164_v61, %v4156_v18  ;;  %v10924_v16 = vrot.slane %v10123_v21, 6  ;;  %v10940_v40 = vrot.slane %v10099_v35, 6 }
 0x2df   : > { %v4282_v30 = vcombine.high %v4274_v36, %v4274_v36  ;;  %v4391_v2 = vrot.slane %v4380_v9, %v9436_v1  ;;  %v7823_v58 = vpack.c.bf16 %v5919_v49, %v5917_v57  ;;  %v4149_v34 = vcombine.high %v4145_v51, %v4145_v51 }
 0x2e0   : > { %5019 = vrot.lane.b32.xlu0 %v7799_v8, %s8024_s22  ;;  %v4196_v12 = vrot.slane %v7777_v43, 7  ;;  %v6555_v28 = vsel %vm1147_vm1, %v10924_v16, %v10123_v21  ;;  %v4609_v18 = vsel %vm1030_vm14, %v10940_v40, %v10099_v35  ;;  %v10926_v11 = vrot.slane %v10093_v62, 6  ;;  %vm11030_vm1 = vmmov %vm11021_vm3 }
 0x2e1   : > { %v7780_v53 = vpack.c.bf16 %v4282_v30, %v4274_v36  ;;  %v4399_v3 = vcombine.high %v4391_v2, %v4391_v2  ;;  %v4022_v41 = vand.u32 1, %v9906_v24  ;;  %v6087_v57 = vshra.s32 %v9906_v24, 18  ;;  %vm11038_vm8 = vmmov %vm11030_vm1 }
 0x2e2   : > { %5482 = vrot.lane.b32.xlu1 %v7810_v13, %s11027_s11  ;;  %v4612_v13 = vmul.f32 %v4609_v18, %v10125_v7  ;;  %v4163_v8 = vrot.slane %v4149_v34, %v9436_v1  ;;  %v4267_v31 = vcombine.high %v4263_v15, %v4263_v15  ;;  %v4727_v51 = vsel %vm11030_vm1, %v10926_v11, %v10093_v62 }
 0x2e3   : > { %v4314_v63 = vrot.slane %v7780_v53, 6  ;;  %v7783_v52 = vpack.c.bf16 %v4399_v3, %v4391_v2  ;;  %v4023_v61 = vcvt.s32.f32 %v4022_v41  ;;  %v6088_v49 = vand.u32 1, %v6087_v57 }
 0x2e4   : > { %5484 = vrot.lane.b32.xlu0 %v7811_v50, %s11027_s11  ;;  %v4623_v36 = vrot.slane %v4612_v13, %v9436_v1  ;;  %v4165_v50 = vcombine.high %v4163_v8, %v4163_v8  ;;  %v4384_v43 = vcombine.high %v4380_v9, %v4380_v9  ;;  %v10925_v30 = vrot.slane %v10101_v56, 6 }
 0x2e5   : > { %v10193_v4 = vld [vmem:[#allocation5 + $0x2] sm:$0xff]  ;;  %v4431_v20 = vrot.slane %v7783_v52, 5  ;;  %v10936_v24 = vrot.slane %v10103_v59, 6  ;;  %v4730_v2 = vmul.f32 %v4727_v51, %v10125_v7  ;;  %v10927_v15 = vrot.slane %v10105_v44, 6 }
 0x2e6   : > { %5950 = vrot.lane.b32.xlu1 %v7822_v60, %s8025_s14  ;;  %v10201_v25 = vmul.f32 %v6555_v28, %v10193_v4  ;;  %v4281_v60 = vrot.slane %v4267_v31, %v9436_v1  ;;  %v4032_v53 = vrot.slane %v4023_v61, %v10985_v37  ;;  %v4631_v3 = vcombine.high %v4623_v36, %v4623_v36 }
 0x2e7   : > { %v6089_v28 = vcvt.s32.f32 %v6088_v49  ;;  %v5193_v9 = vsel %vm11031_vm7, %v10925_v30, %v10101_v56  ;;  %v4845_v34 = vsel %vm789_vm10, %v10936_v24, %v10103_v59  ;;  %v4741_v18 = vrot.slane %v4730_v2, %v9436_v1 }
 0x2e8   : > { %5952 = vrot.lane.b32.xlu0 %v7823_v58, %s8025_s14  ;;  %v4616_v58 = vcombine.high %v4612_v13, %v4612_v13  ;;  %v4283_v52 = vcombine.high %v4281_v60, %v4281_v60  ;;  %v10242_v41 = vsel %vm1562_vm13, %v10927_v15, %v10105_v44  ;;  %v10935_v13 = vrot.slane %v10107_v38, 6 }
 0x2e9   : > { %v10931_v57 = vrot.slane %v10111_v33, 6  ;;  %v4036_v31 = vrot.slane %v4023_v61, %v10987_v47  ;;  %v4040_v51 = vrot.slane %v4023_v61, %v10988_v5  ;;  %v6098_v15 = vrot.slane %v6089_v28, %v10985_v37 }
 0x2ea   : > { %4199 = vrot.lane.b32.xlu1 %v4196_v12, %s11028_s17  ;;  %v4028_v12 = vrot.slane %v4023_v61, %v10984_v14  ;;  %v7781_v30 = vpack.c.bf16 %v4283_v52, %v4281_v60  ;;  %v6102_v39 = vrot.slane %v6089_v28, %v10987_v47  ;;  %v6106_v17 = vrot.slane %v6089_v28, %v10988_v5 }
 0x2eb   : > { %v4749_v48 = vcombine.high %v4741_v18, %v4741_v18  ;;  %vm11032_vm13 = vcmask 523264   ;;  %v4042_v60 = vcombine.low %v4036_v31, %v4040_v51  ;;  %v5311_v37 = vsel %vm11033_vm4, %v10931_v57, %v10111_v33 }
 0x2ec   : > { %v10249_v49 = vcombine.low %v4028_v12, %v4032_v53  ;;  %v5077_v61 = vsel %vm11032_vm13, %v10935_v13, %v10107_v38  ;;  %v10934_v53 = vrot.slane %v10115_v19, 6  ;;  %v5314_v52 = vmul.f32 %v5311_v37, %v10125_v7 }
 0x2ed   : > { %v5080_v5 = vmul.f32 %v5077_v61, %v10125_v7  ;;  %v10933_v57 = vrot.slane %v10109_v0, 6  ;;  %vm11034_vm3 = vcmask 605184   ;;  %v11042_v23 = vrot.slane %v10121_v10, 6 }
 0x2ee   : > { %4317 = vrot.lane.b32.xlu1 %v4314_v63, %s8026_s19  ;;  %v7778_v63 = vpack.c.bf16 %v4165_v50, %v4163_v8  ;;  %v4630_v8 = vrot.slane %v4616_v58, %v9436_v1  ;;  %v7789_v50 = vpack.c.bf16 %v4631_v3, %v4623_v36  ;;  %v4734_v58 = vcombine.high %v4730_v2, %v4730_v2  ;;  %v10269_v3 = vpop.permute.xlu1 %6007 }
 0x2ef   : > { %v4049_v12 = vrot.slane %v10249_v49, %v9436_v1  ;;  %v11044_v10 = vrot.slane %v10113_v42, 6  ;;  %vm4327_vm9 = vcmask 1031168   ;;  %vm11062_vm1 = vcmask 982016  }
 0x2f0   : > { %v4197_v16 = vrot.slane %v7778_v63, 7  ;;  %v4632_v36 = vcombine.high %v4630_v8, %v4630_v8  ;;  %v4663_v47 = vrot.slane %v7789_v50, 7  ;;  %v6108_v63 = vcombine.low %v6102_v39, %v6106_v17 }
 0x2f1   : > { %v4748_v51 = vrot.slane %v4734_v58, %v9436_v1  ;;  %v5196_v39 = vmul.f32 %v5193_v9, %v10125_v7  ;;  %v5325_v9 = vrot.slane %v5314_v52, %v9436_v1  ;;  %vm4676_vm7 = vcmask 965632  }
 0x2f2   : > { %4434 = vrot.lane.b32.xlu1 %v4431_v20, %s11029_s24  ;;  %v4398_v20 = vrot.slane %v4384_v43, %v9436_v1  ;;  %v6094_v43 = vrot.slane %v6089_v28, %v10984_v14  ;;  %4201 = vrot.lane.b32.xlu0 %v4197_v16, %s11028_s17  ;;  %v4848_v14 = vmul.f32 %v4845_v34, %v10125_v7  ;;  %v4315_v16 = vrot.slane %v7781_v30, 6  ;;  %v10278_v17 = vpop.permute.xlu1 %6436 }
 0x2f3   : > { %v7792_v34 = vpack.c.bf16 %v4749_v48, %v4741_v18  ;;  %v7790_v31 = vpack.c.bf16 %v4632_v36, %v4630_v8  ;;  %v5091_v30 = vrot.slane %v5080_v5, %v9436_v1  ;;  %v4056_v18 = vrot.slane %v4042_v60, %v9436_v1 }
 0x2f4   : > { %v4400_v11 = vcombine.high %v4398_v20, %v4398_v20  ;;  %v6107_v28 = vcombine.low %v6094_v43, %v6098_v15  ;;  %v4859_v49 = vrot.slane %v4848_v14, %v9436_v1  ;;  %v4852_v50 = vcombine.high %v4848_v14, %v4848_v14 }
 0x2f5   : > { %v4781_v61 = vrot.slane %v7792_v34, 6  ;;  %v5099_v36 = vcombine.high %v5091_v30, %v5091_v30  ;;  %v5207_v58 = vrot.slane %v5196_v39, %v9436_v1  ;;  %v6122_v14 = vrot.slane %v6108_v63, %v9436_v1 }
 0x2f6   : > { %v7784_v2 = vpack.c.bf16 %v4400_v11, %v4398_v20  ;;  %4666 = vrot.lane.b32.xlu1 %v4663_v47, %s8027_s26  ;;  %4319 = vrot.lane.b32.xlu0 %v4315_v16, %s8026_s19  ;;  %v5084_v11 = vcombine.high %v5080_v5, %v5080_v5  ;;  %v4750_v20 = vcombine.high %v4748_v51, %v4748_v51  ;;  %v4664_v5 = vrot.slane %v7790_v31, 7 }
 0x2f7   : > { %v4867_v43 = vcombine.high %v4859_v49, %v4859_v49  ;;  %v4866_v48 = vrot.slane %v4852_v50, %v9436_v1  ;;  %v6115_v8 = vrot.slane %v6107_v28, %v9436_v1  ;;  %v5200_v47 = vcombine.high %v5196_v39, %v5196_v39 }
 0x2f8   : > { %v4432_v15 = vrot.slane %v7784_v2, 5  ;;  %v7793_v16 = vpack.c.bf16 %v4750_v20, %v4748_v51  ;;  %v5098_v60 = vrot.slane %v5084_v11, %v9436_v1  ;;  %v7801_v34 = vpack.c.bf16 %v5099_v36, %v5091_v30  ;;  %v10297_v51 = vpop.permute.xlu0 %6897  ;;  %v10300_v30 = vpop.permute.xlu1 %6668 }
 0x2f9   : > { %v7795_v37 = vpack.c.bf16 %v4867_v43, %v4859_v49  ;;  %v4868_v2 = vcombine.high %v4866_v48, %v4866_v48  ;;  %v5215_v50 = vcombine.high %v5207_v58, %v5207_v58  ;;  %v4057_v63 = vcombine.low %v4049_v12, %v4056_v18 }
 0x2fa   : > { %4784 = vrot.lane.b32.xlu1 %v4781_v61, %s8028_s23  ;;  %4436 = vrot.lane.b32.xlu0 %v4432_v15, %s11029_s24  ;;  %v5545_v61 = vmul.f32 %v10242_v41, %v10125_v7  ;;  %v5660_v49 = vsel %vm11034_vm3, %v10934_v53, %v10115_v19  ;;  %v10932_v31 = vrot.slane %v10269_v3, 6  ;;  %v5318_v39 = vcombine.high %v5314_v52, %v5314_v52 }
 0x2fb   : > { %v4899_v28 = vrot.slane %v7795_v37, 5  ;;  %v5663_v11 = vmul.f32 %v5660_v49, %v10125_v7  ;;  %v5214_v41 = vrot.slane %v5200_v47, %v9436_v1  ;;  %v6123_v12 = vcombine.low %v6115_v8, %v6122_v14 }
 0x2fc   : > { %v5333_v15 = vcombine.high %v5325_v9, %v5325_v9  ;;  %v4782_v20 = vrot.slane %v7793_v16, 6  ;;  %v5100_v43 = vcombine.high %v5098_v60, %v5098_v60  ;;  %v7796_v18 = vpack.c.bf16 %v4868_v2, %v4866_v48  ;;  %v10320_v2 = vpop.permute.xlu0 %6784 }
 0x2fd   : > { %v5131_v36 = vrot.slane %v7801_v34, 7  ;;  %v7804_v37 = vpack.c.bf16 %v5215_v50, %v5207_v58  ;;  %v5556_v52 = vrot.slane %v5545_v61, %v9436_v1  ;;  %v5778_v49 = vsel %vm11035_vm12, %v10933_v57, %v10109_v0  ;;  %v10323_v50 = vpop.permute.xlu1 %6323 }
 0x2fe   : > { %4668 = vrot.lane.b32.xlu0 %v4664_v5, %s8027_s26  ;;  %4902 = vrot.lane.b32.xlu1 %v4899_v28, %s8029_s27  ;;  %v4059_v5 = vmul.f32 %v4057_v63, %v10125_v7  ;;  %v6011_v8 = vsel %vm11036_vm5, %v10932_v31, %v10269_v3  ;;  %v5332_v14 = vrot.slane %v5318_v39, %v9436_v1  ;;  %v4900_v63 = vrot.slane %v7796_v18, 5 }
 0x2ff   : > { %v5674_v48 = vrot.slane %v5663_v11, %v9436_v1  ;;  %v5216_v58 = vcombine.high %v5214_v41, %v5214_v41  ;;  %v7807_v47 = vpack.c.bf16 %v5333_v15, %v5325_v9  ;;  %v6125_v16 = vmul.f32 %v6123_v12, %v10193_v4 }
 0x300   : > { %v5549_v28 = vcombine.high %v5545_v61, %v5545_v61  ;;  %v5781_v34 = vmul.f32 %v5778_v49, %v10125_v7  ;;  %v7802_v31 = vpack.c.bf16 %v5100_v43, %v5098_v60  ;;  %v5247_v39 = vrot.slane %v7804_v37, 6 }
 0x301   : > { %v5564_v57 = vcombine.high %v5556_v52, %v5556_v52  ;;  %v4061_v53 = vcombine.high %v4059_v5, %v4059_v5  ;;  %v5667_v13 = vcombine.high %v5663_v11, %v5663_v11  ;;  %v5334_v9 = vcombine.high %v5332_v14, %v5332_v14 }
 0x302   : > { %4786 = vrot.lane.b32.xlu0 %v4782_v20, %s8028_s23  ;;  %5134 = vrot.lane.b32.xlu1 %v5131_v36, %s8001_s29  ;;  %v6014_v20 = vmul.f32 %v6011_v8, %v10125_v7  ;;  %v10938_v36 = vrot.slane %v10323_v50, 6  ;;  %v5682_v15 = vcombine.high %v5674_v48, %v5674_v48  ;;  %v10939_v12 = vrot.slane %v10320_v2, 6 }
 0x303   : > { %v7805_v61 = vpack.c.bf16 %v5216_v58, %v5214_v41  ;;  %v4068_v18 = vrot.slane %v4059_v5, %v9436_v1  ;;  %v5365_v60 = vrot.slane %v7807_v47, 5  ;;  %v5563_v43 = vrot.slane %v5549_v28, %v9436_v1 }
 0x304   : > { %v5792_v11 = vrot.slane %v5781_v34, %v9436_v1  ;;  %v6127_v37 = vcombine.high %v6125_v16, %v6125_v16  ;;  %v6134_v7 = vrot.slane %v6125_v16, %v9436_v1  ;;  %v5132_v49 = vrot.slane %v7802_v31, 7 }
 0x305   : > { %v7813_v8 = vpack.c.bf16 %v5564_v57, %v5556_v52  ;;  %v5681_v24 = vrot.slane %v5667_v13, %v9436_v1  ;;  %v6025_v22 = vrot.slane %v6014_v20, %v9436_v1  ;;  %v6326_v41 = vsel %vm1385_vm15, %v10938_v36, %v10323_v50 }
 0x306   : > { %4904 = vrot.lane.b32.xlu0 %v4900_v63, %s8029_s27  ;;  %5250 = vrot.lane.b32.xlu1 %v5247_v39, %s11037_s28  ;;  %v7816_v5 = vpack.c.bf16 %v5682_v15, %v5674_v48  ;;  %v6787_v58 = vsel %vm11038_vm8, %v10939_v12, %v10320_v2  ;;  %v5248_v47 = vrot.slane %v7805_v61, 6  ;;  %v7808_v13 = vpack.c.bf16 %v5334_v9, %v5332_v14 }
 0x307   : > { %v5565_v57 = vcombine.high %v5563_v43, %v5563_v43  ;;  %v5800_v31 = vcombine.high %v5792_v11, %v5792_v11  ;;  %v5785_v52 = vcombine.high %v5781_v34, %v5781_v34  ;;  %v4076_v16 = vcombine.high %v4068_v18, %v4068_v18 }
 0x308   : > { %v5596_v28 = vrot.slane %v7813_v8, 7  ;;  %v6142_v63 = vcombine.high %v6134_v7, %v6134_v7  ;;  %v4075_v48 = vrot.slane %v4061_v53, %v9436_v1  ;;  %v6141_v39 = vrot.slane %v6127_v37, %v9436_v1 }
 0x309   : > { %v5683_v15 = vcombine.high %v5681_v24, %v5681_v24  ;;  %v6018_v36 = vcombine.high %v6014_v20, %v6014_v20  ;;  %v6033_v12 = vcombine.high %v6025_v22, %v6025_v22  ;;  %v7775_v40 = vpack.c.bf16 %v4076_v16, %v4068_v18 }
 0x30a   : > { %5136 = vrot.lane.b32.xlu0 %v5132_v49, %s8001_s29  ;;  %5368 = vrot.lane.b32.xlu1 %v5365_v60, %s8030_s30  ;;  %v5714_v49 = vrot.slane %v7816_v5, 6  ;;  %v7828_v14 = vpack.c.bf16 %v6142_v63, %v6134_v7  ;;  %v4077_v9 = vcombine.high %v4075_v48, %v4075_v48  ;;  %v6143_v61 = vcombine.high %v6141_v39, %v6141_v39 }
 0x30b   : > { %v10351_v34 = vmul.f32 %v6326_v41, %v10193_v4  ;;  %v5366_v60 = vrot.slane %v7808_v13, 5  ;;  %v7814_v8 = vpack.c.bf16 %v5565_v57, %v5563_v43  ;;  %v5799_v53 = vrot.slane %v5785_v52, %v9436_v1  ;;  %4098 = vst [vmem:[#allocation4] sm:$0x11] %v7775_v40  ;;  %v4453_v52 = vld [vmem:[#allocation5 + $0x8] sm:$0x3] }
 0x30c   : > { %v7819_v37 = vpack.c.bf16 %v5800_v31, %v5792_v11  ;;  %v6162_v20 = vrot.slane %v7828_v14, 6  ;;  %v7776_v6 = vpack.c.bf16 %v4077_v9, %v4075_v48  ;;  %v7829_v18 = vpack.c.bf16 %v6143_v61, %v6141_v39  ;;  %v4101_v11 = vld [vmem:[#allocation5 + $0x8] sm:$0x3] }
 0x30d   : > { %v6032_v41 = vrot.slane %v6018_v36, %v9436_v1  ;;  %v7825_v5 = vpack.c.bf16 %v6033_v12, %v6025_v22  ;;  %v6340_v43 = vrot.slane %v10351_v34, %v9436_v1  ;;  %v10360_v40 = vmul.f32 %v6787_v58, %v10193_v4  ;;  %v4336_v12 = vld [vmem:[#allocation5 + $0x8] sm:$0x3] }
 0x30e   : > { %5252 = vrot.lane.b32.xlu0 %v5248_v47, %s11037_s28  ;;  %5599 = vrot.lane.b32.xlu1 %v5596_v28, %s11039_s12  ;;  %6166 = vst [vmem:[#allocation4 + $0x60] sm:$0x44] %v6162_v20  ;;  %4099 = vst [vmem:[#allocation4 + $0x8] sm:$0x11] %v7776_v6  ;;  %v6163_v7 = vrot.slane %v7829_v18, 6  ;;  %v5597_v47 = vrot.slane %v7814_v8, 7  ;;  %v7817_v13 = vpack.c.bf16 %v5683_v15, %v5681_v24 }
 0x30f   : > { %v5832_v57 = vrot.slane %v7819_v37, 5  ;;  %v5801_v31 = vcombine.high %v5799_v53, %v5799_v53  ;;  %v6034_v6 = vcombine.high %v6032_v41, %v6032_v41  ;;  %v6065_v36 = vrot.slane %v7825_v5, 7  ;;  %v4567_v39 = vld [vmem:[#allocation5 + $0x8] sm:$0x3] }
 0x310   : > { %6167 = vst [vmem:[#allocation4 + $0x68] sm:$0x44] %v6163_v7  ;;  %v4146_v22 = vmul.f32 %v4141_v29, %v4101_v11  ;;  %v6348_v58 = vcombine.high %v6340_v43, %v6340_v43  ;;  %v6801_v16 = vrot.slane %v10360_v40, %v9436_v1  ;;  %v5715_v24 = vrot.slane %v7817_v13, 6  ;;  %v4921_v15 = vld [vmem:[#allocation5 + $0x8] sm:$0x3] }
 0x311   : > { %v7820_v28 = vpack.c.bf16 %v5801_v31, %v5799_v53  ;;  %v4381_v63 = vmul.f32 %v4376_v45, %v4336_v12  ;;  %v11040_v48 = vrot.slane %v10097_v54, 6  ;;  %v7826_v61 = vpack.c.bf16 %v6034_v6, %v6032_v41  ;;  %v4803_v53 = vld [vmem:[#allocation5 + $0x8] sm:$0x3] }
 0x312   : > { %5370 = vrot.lane.b32.xlu0 %v5366_v60, %s8030_s30  ;;  %5717 = vrot.lane.b32.xlu1 %v5714_v49, %s8031_s15  ;;  %v4172_v29 = vrot.slane %v4146_v22, %v9436_v1  ;;  %v7833_v49 = vpack.c.bf16 %v6348_v58, %v6340_v43  ;;  %v6809_v14 = vcombine.high %v6801_v16, %v6801_v16  ;;  %v11041_v60 = vrot.slane %v10099_v35, 6  ;;  %v5387_v37 = vld [vmem:[#allocation5 + $0x8] sm:$0x3] }
 0x313   : > { %v4498_v55 = vmul.f32 %v11040_v48, %v4453_v52  ;;  %v5833_v9 = vrot.slane %v7820_v28, 5  ;;  %v4967_v45 = vmul.f32 %v11042_v23, %v4921_v15  ;;  %v4407_v54 = vrot.slane %v4381_v63, %v9436_v1  ;;  %v4218_v41 = vld [vmem:[#allocation5 + $0x8] sm:$0x3] }
 0x314   : > { %v4613_v8 = vmul.f32 %v11041_v60, %v4567_v39  ;;  %v7845_v18 = vpack.c.bf16 %v6809_v14, %v6801_v16  ;;  %v6066_v7 = vrot.slane %v7826_v61, 7  ;;  %v7779_v5 = vpack.c.bf16 %v4172_v29, %v4172_v29  ;;  %v5036_v13 = vld [vmem:[#allocation5 + $0x8] sm:$0x3] }
 0x315   : > { %v4524_v20 = vrot.slane %v4498_v55, %v9436_v1  ;;  %v11043_v35 = vrot.slane %v10103_v59, 6  ;;  %v5432_v11 = vmul.f32 %v11044_v10, %v5387_v37  ;;  %v4993_v31 = vrot.slane %v4967_v45, %v9436_v1  ;;  %v4685_v28 = vld [vmem:[#allocation5 + $0x8] sm:$0x3] }
 0x316   : > { %5601 = vrot.lane.b32.xlu0 %v5597_v47, %s11039_s12  ;;  %5835 = vrot.lane.b32.xlu1 %v5832_v57, %s8032_s20  ;;  %v4639_v47 = vrot.slane %v4613_v8, %v9436_v1  ;;  %v5854_v57 = vld [vmem:[#allocation5 + $0x8] sm:$0x3]  ;;  %v7785_v22 = vpack.c.bf16 %v4407_v54, %v4407_v54  ;;  %v11045_v12 = vrot.slane %v10095_v32, 6  ;;  %v11046_v52 = vrot.slane %v10107_v38, 6 }
 0x317   : > { %v4849_v43 = vmul.f32 %v11043_v35, %v4803_v53  ;;  %v7788_v6 = vpack.c.bf16 %v4524_v20, %v4524_v20  ;;  %v11047_v58 = vrot.slane %v10135_v26, 6  ;;  %v5269_v63 = vld [vmem:[#allocation5 + $0x8] sm:$0x3]  ;;  %v5458_v48 = vrot.slane %v5432_v11, %v9436_v1 }
 0x318   : > { %v4264_v59 = vmul.f32 %v11045_v12, %v4218_v41  ;;  %v5081_v42 = vmul.f32 %v11046_v52, %v5036_v13  ;;  %v7791_v55 = vpack.c.bf16 %v4639_v47, %v4639_v47  ;;  %v7800_v29 = vpack.c.bf16 %v4993_v31, %v4993_v31  ;;  %v5501_v61 = vld [vmem:[#allocation5 + $0x8] sm:$0x3]  ;;  %v10420_v47 = vpop.permute.xlu1 %7013 }
 0x319   : > { %v5900_v16 = vmul.f32 %v11047_v58, %v5854_v57  ;;  %v4433_v39 = vrot.slane %v7785_v22, 5  ;;  %v11048_v32 = vrot.slane %v10093_v62, 6  ;;  %v11049_v15 = vrot.slane %v10111_v33, 6 }
 0x31a   : > { %5719 = vrot.lane.b32.xlu0 %v5715_v24, %s8031_s15  ;;  %6068 = vrot.lane.b32.xlu1 %v6065_v36, %s8033_s25  ;;  %v4198_v36 = vrot.slane %v7779_v5, 7  ;;  %v4875_v24 = vrot.slane %v4849_v43, %v9436_v1  ;;  %v5107_v14 = vrot.slane %v5081_v42, %v9436_v1  ;;  %v7812_v23 = vpack.c.bf16 %v5458_v48, %v5458_v48 }
 0x31b   : > { %v4731_v38 = vmul.f32 %v11048_v32, %v4685_v28  ;;  %v5315_v26 = vmul.f32 %v11049_v15, %v5269_v63  ;;  %v5926_v60 = vrot.slane %v5900_v16, %v9436_v1  ;;  %v4665_v45 = vrot.slane %v7791_v55, 7 }
 0x31c   : > { %v7797_v8 = vpack.c.bf16 %v4875_v24, %v4875_v24  ;;  %v11050_v62 = vrot.slane %v10101_v56, 6  ;;  %v11051_v33 = vrot.slane %v10105_v44, 6  ;;  %v7803_v5 = vpack.c.bf16 %v5107_v14, %v5107_v14  ;;  %v5969_v56 = vld [vmem:[#allocation5 + $0x8] sm:$0x3] }
 0x31d   : > { %v4757_v37 = vrot.slane %v4731_v38, %v9436_v1  ;;  %v5341_v20 = vrot.slane %v5315_v26, %v9436_v1  ;;  %v7824_v41 = vpack.c.bf16 %v5926_v60, %v5926_v60  ;;  %v6209_v10 = vrot.slane %v10117_v27, 6 }
 0x31e   : > { %5837 = vrot.lane.b32.xlu0 %v5833_v9, %s8032_s20  ;;  %6380 = vrot.lane.b32.xlu1 %v7833_v49, %s8026_s19  ;;  %v4290_v49 = vrot.slane %v4264_v59, %v9436_v1  ;;  %v5152_v9 = vld [vmem:[#allocation5 + $0x8] sm:$0x3]  ;;  %v5546_v53 = vmul.f32 %v11051_v33, %v5501_v61  ;;  %v4901_v35 = vrot.slane %v7797_v8, 5  ;;  %v6438_v11 = vrot.slane %v10278_v17, 6 }
 0x31f   : > { %v5197_v54 = vmul.f32 %v11050_v62, %v5152_v9  ;;  %v11052_v44 = vrot.slane %v10115_v19, 6  ;;  %v11053_v57 = vrot.slane %v10109_v0, 6  ;;  %v7794_v22 = vpack.c.bf16 %v4757_v37, %v4757_v37 }
 0x320   : > { %v7782_v43 = vpack.c.bf16 %v4290_v49, %v4290_v49  ;;  %v7809_v12 = vpack.c.bf16 %v5341_v20, %v5341_v20  ;;  %v5133_v59 = vrot.slane %v7803_v5, 7  ;;  %v6210_v42 = vsel %vm1506_vm0, %v6209_v10, %v10117_v27 }
 0x321   : > { %v6439_v19 = vsel %vm1268_vm11, %v6438_v11, %v10278_v17  ;;  %v11054_v0 = vrot.slane %v10269_v3, 6  ;;  %v6213_v16 = vmul.f32 %v6210_v42, %v10193_v4  ;;  %v6333_v48 = vcombine.high %v10351_v34, %v10351_v34 }
 0x322   : > { %6070 = vrot.lane.b32.xlu0 %v6066_v7, %s8033_s25  ;;  %6841 = vrot.lane.b32.xlu1 %v7845_v18, %s8028_s23  ;;  %v5618_v18 = vld [vmem:[#allocation5 + $0x8] sm:$0x3]  ;;  %v4316_v52 = vrot.slane %v7782_v43, 6  ;;  %v5367_v32 = vrot.slane %v7809_v12, 5  ;;  %v6442_v3 = vmul.f32 %v6439_v19, %v10193_v4  ;;  %v6670_v38 = vrot.slane %v10300_v30, 6 }
 0x323   : > { %v5736_v7 = vld [vmem:[#allocation5 + $0x8] sm:$0x3]  ;;  %v5664_v13 = vmul.f32 %v11052_v44, %v5618_v18  ;;  %v6015_v58 = vmul.f32 %v11054_v0, %v5969_v56  ;;  %v6217_v49 = vcombine.high %v6213_v16, %v6213_v16  ;;  %v6224_v61 = vrot.slane %v6213_v16, %v9436_v1 }
 0x324   : > { %v5782_v31 = vmul.f32 %v11053_v57, %v5736_v7  ;;  %v6347_v60 = vrot.slane %v6333_v48, %v9436_v1  ;;  %v6671_v37 = vsel %vm1030_vm14, %v6670_v38, %v10300_v30  ;;  %v6899_v20 = vrot.slane %v10297_v51, 6 }
 0x325   : > { %v5690_v28 = vrot.slane %v5664_v13, %v9436_v1  ;;  %v6041_v26 = vrot.slane %v6015_v58, %v9436_v1  ;;  %vm11055_vm0 = vcmask 973824   ;;  %v6453_v5 = vrot.slane %v6442_v3, %v9436_v1 }
 0x326   : > { %4552 = vrot.lane.b32.xlu0 %v7788_v6, %s11026_s21  ;;  %4203 = vrot.lane.b32.xlu1 %v4198_v36, %s11028_s17  ;;  %v5223_v6 = vrot.slane %v5197_v54, %v9436_v1  ;;  %v5572_v36 = vrot.slane %v5546_v53, %v9436_v1  ;;  %v5808_v63 = vrot.slane %v5782_v31, %v9436_v1  ;;  %vm5027_vm11 = vcmask 900096  }
 0x327   : > { %v7818_v8 = vpack.c.bf16 %v5690_v28, %v5690_v28  ;;  %v6794_v54 = vcombine.high %v10360_v40, %v10360_v40  ;;  %v6446_v53 = vcombine.high %v6442_v3, %v6442_v3  ;;  %v6349_v43 = vcombine.high %v6347_v60, %v6347_v60 }
 0x328   : > { %v7806_v55 = vpack.c.bf16 %v5223_v6, %v5223_v6  ;;  %v7827_v56 = vpack.c.bf16 %v6041_v26, %v6041_v26  ;;  %v6231_v44 = vrot.slane %v6217_v49, %v9436_v1  ;;  %v6232_v13 = vcombine.high %v6224_v61, %v6224_v61 }
 0x329   : > { %v5716_v57 = vrot.slane %v7818_v8, 6  ;;  %v6808_v6 = vrot.slane %v6794_v54, %v9436_v1  ;;  %v6900_v12 = vsel %vm789_vm10, %v6899_v20, %v10297_v51  ;;  %v6460_v42 = vrot.slane %v6446_v53, %v9436_v1 }
 0x32a   : > { %5021 = vrot.lane.b32.xlu0 %v7800_v29, %s8024_s22  ;;  %4438 = vrot.lane.b32.xlu1 %v4433_v39, %s11029_s24  ;;  %v7815_v29 = vpack.c.bf16 %v5572_v36, %v5572_v36  ;;  %v4783_v39 = vrot.slane %v7794_v22, 6  ;;  %v6674_v22 = vmul.f32 %v6671_v37, %v10193_v4  ;;  %v6461_v19 = vcombine.high %v6453_v5, %v6453_v5 }
 0x32b   : > { %v6562_v16 = vcombine.high %v10201_v25, %v10201_v25  ;;  %v6067_v28 = vrot.slane %v7827_v56, 7  ;;  %v7015_v49 = vrot.slane %v10420_v47, 6  ;;  %vm11056_vm10 = vcmask 457728  }
 0x32c   : > { %v5598_v62 = vrot.slane %v7815_v29, 7  ;;  %v6810_v29 = vcombine.high %v6808_v6, %v6808_v6  ;;  %v6678_v3 = vcombine.high %v6674_v22, %v6674_v22  ;;  %v6685_v26 = vrot.slane %v6674_v22, %v9436_v1 }
 0x32d   : > { %vm5960_vm14 = vcmask 384000   ;;  %v7836_v8 = vpack.c.bf16 %v6461_v19, %v6453_v5  ;;  %vm11057_vm15 = vcmask 146432   ;;  %vm4794_vm13 = vcmask 916480  }
 0x32e   : > { %5486 = vrot.lane.b32.xlu0 %v7812_v23, %s11027_s11  ;;  %4670 = vrot.lane.b32.xlu1 %v4665_v45, %s8027_s26  ;;  %v7821_v23 = vpack.c.bf16 %v5808_v63, %v5808_v63  ;;  %v5249_v45 = vrot.slane %v7806_v55, 6  ;;  %v6233_v63 = vcombine.high %v6231_v44, %v6231_v44  ;;  %v7830_v55 = vpack.c.bf16 %v6232_v13, %v6224_v61  ;;  %s7435_s11 = sshll.u32 %s11081_s16, 1 }
 0x32f   : > { %v6692_v5 = vrot.slane %v6678_v3, %v9436_v1  ;;  %vm4912_vm4 = vcmask 908288   ;;  %vm11063_vm3 = vcmask 523264   ;;  %vm11064_vm12 = vcmask 515072  }
 0x330   : > { %v5834_v31 = vrot.slane %v7821_v23, 5  ;;  %v6576_v23 = vrot.slane %v6562_v16, %v9436_v1  ;;  %v6264_v54 = vrot.slane %v7830_v55, 5  ;;  %v7831_v53 = vpack.c.bf16 %v6233_v63, %v6231_v44 }
 0x331   : > { %v6694_v22 = vcombine.high %v6692_v5, %v6692_v5  ;;  %vm5378_vm5 = vcmask 506880   ;;  %vm11065_vm8 = vcmask 449536  }
 0x332   : > { %5954 = vrot.lane.b32.xlu0 %v7824_v41, %s8025_s14  ;;  %4906 = vrot.lane.b32.xlu1 %v4901_v35, %s8029_s27 }
 0x336   : > { %4321 = vrot.lane.b32.xlu0 %v4316_v52, %s8026_s19  ;;  %5138 = vrot.lane.b32.xlu1 %v5133_v59, %s8001_s29 }
 0x33a   : > { %4788 = vrot.lane.b32.xlu0 %v4783_v39, %s8028_s23  ;;  %5372 = vrot.lane.b32.xlu1 %v5367_v32, %s8030_s30  ;;  %v7834_v39 = vpack.c.bf16 %v6349_v43, %v6347_v60  ;;  %v6493_v43 = vrot.slane %v7836_v8, 7  ;;  %v11058_v8 = vrot.slane %v10123_v21, 6 }
 0x33e   : > { %5254 = vrot.lane.b32.xlu0 %v5249_v45, %s11037_s28  ;;  %5603 = vrot.lane.b32.xlu1 %v5598_v62, %s11039_s12  ;;  %v6903_v62 = vmul.f32 %v6900_v12, %v10193_v4 }
 0x340   : > { %v6907_v56 = vcombine.high %v6903_v62, %v6903_v62  ;;  %v6914_v44 = vrot.slane %v6903_v62, %v9436_v1 }
 0x342   : > { %5721 = vrot.lane.b32.xlu0 %v5716_v57, %s8031_s15  ;;  %5839 = vrot.lane.b32.xlu1 %v5834_v31, %s8032_s20  ;;  %v6578_v57 = vcombine.high %v6576_v23, %v6576_v23  ;;  %v6922_v19 = vcombine.high %v6914_v44, %v6914_v44 }
 0x344   : > { %v7848_v55 = vpack.c.bf16 %v6922_v19, %v6914_v44 }
 0x346   : > { %6382 = vrot.lane.b32.xlu0 %v7834_v39, %s8026_s19  ;;  %6072 = vrot.lane.b32.xlu1 %v6067_v28, %s8033_s25  ;;  %v6285_v39 = vld [vmem:[#allocation5 + $0xa] sm:$0x3] }
 0x34a   : > { %6267 = vrot.lane.b32.xlu1 %v6264_v54, %s11028_s17  ;;  %v6954_v54 = vrot.slane %v7848_v55, 7 }
 0x34c   : > { %v4549_v24 = vpop.permute.xlu1 %4548 }
 0x34d   : > { %v4554_v14 = vrot.slane %v4549_v24, 4 }
 0x34e   : > { %v10449_v15 = vpop.permute.xlu0 %4550  ;;  %6496 = vrot.lane.b32.xlu1 %v6493_v43, %s11029_s24 }
 0x34f   : > { %v4555_v34 = vrot.slane %v10449_v15, 4 }
 0x350   : > { %v5018_v9 = vpop.permute.xlu1 %5017 }
 0x351   : > { %v4557_v33 = vsel %vm614_vm2, %v4554_v14, %v4555_v34  ;;  %v5023_v40 = vrot.slane %v5018_v9, 4 }
 0x352   : > { %v4559_v18 = vsel %vm11055_vm0, %v4549_v24, %v4557_v33  ;;  %v10468_v7 = vpop.permute.xlu0 %5019  ;;  %v6569_v24 = vrot.slane %v10201_v25, %v9436_v1  ;;  %v6462_v25 = vcombine.high %v6460_v42, %v6460_v42  ;;  %v7846_v33 = vpack.c.bf16 %v6810_v29, %v6808_v6  ;;  %v6514_v29 = vld [vmem:[#allocation5 + $0xa] sm:$0x3] }
 0x353   : > { %4564 = vst [vmem:[#allocation4 + $0x18] sm:$0x11] %v4559_v18  ;;  %v5024_v41 = vrot.slane %v10468_v7, 4  ;;  %v7016_v18 = vsel %vm11057_vm15, %v7015_v49, %v10420_v47  ;;  %v6265_v6 = vrot.slane %v7831_v53, 5  ;;  %vm5727_vm0 = vcmask 441344  }
 0x354   : > { %v5483_v35 = vpop.permute.xlu1 %5482  ;;  %v6577_v45 = vcombine.high %v6569_v24, %v6569_v24  ;;  %6843 = vrot.lane.b32.xlu0 %v7846_v33, %s8028_s23  ;;  %v7019_v31 = vmul.f32 %v7016_v18, %v10193_v4  ;;  %v6169_v4 = vld [vmem:[#allocation5 + $0xa] sm:$0x3]  ;;  %vm6078_vm15 = vcmask 375808  }
 0x355   : > { %v5026_v36 = vsel %vm614_vm2, %v5023_v40, %v5024_v41  ;;  %v5488_v0 = vrot.slane %v5483_v35, 4  ;;  %v6398_v33 = vld [vmem:[#allocation5 + $0xa] sm:$0x3] }
 0x356   : > { %v5028_v59 = vsel %vm5027_vm11, %v5018_v9, %v5026_v36  ;;  %v10485_v52 = vpop.permute.xlu0 %5484  ;;  %v7839_v13 = vpack.c.bf16 %v6577_v45, %v6569_v24  ;;  %v7837_v36 = vpack.c.bf16 %v6462_v25, %v6460_v42  ;;  %v7023_v16 = vcombine.high %v7019_v31, %v7019_v31 }
 0x357   : > { %5033 = vst [vmem:[#allocation4 + $0x30] sm:$0x11] %v5028_v59  ;;  %v5489_v58 = vrot.slane %v10485_v52, 4  ;;  %v6921_v59 = vrot.slane %v6907_v56, %v9436_v1  ;;  %v7030_v28 = vrot.slane %v7019_v31, %v9436_v1  ;;  %v7840_v24 = vpack.c.bf16 %v6578_v57, %v6576_v23  ;;  %v6746_v57 = vld [vmem:[#allocation5 + $0xa] sm:$0x3] }
 0x358   : > { %v5951_v48 = vpop.permute.xlu1 %5950  ;;  %6269 = vrot.lane.b32.xlu0 %v6265_v6, %s11028_s17  ;;  %v6494_v63 = vrot.slane %v7837_v36, 7  ;;  %v6559_v23 = vmul.f32 %v11058_v8, %v6514_v29  ;;  %v11059_v45 = vrot.slane %v10323_v50, 6  ;;  %v6443_v27 = vmul.f32 %v6438_v11, %v6398_v33  ;;  %v6630_v50 = vld [vmem:[#allocation5 + $0xa] sm:$0x3] }
 0x359   : > { %v5491_v32 = vsel %vm614_vm2, %v5488_v0, %v5489_v58  ;;  %v5956_v61 = vrot.slane %v5951_v48, 4  ;;  %v6609_v0 = vrot.slane %v7839_v13, 6  ;;  %v7038_v3 = vcombine.high %v7030_v28, %v7030_v28  ;;  %v6975_v13 = vld [vmem:[#allocation5 + $0xa] sm:$0x3] }
 0x35a   : > { %v5493_v14 = vsel %vm11056_vm10, %v5483_v35, %v5491_v32  ;;  %v10501_v9 = vpop.permute.xlu0 %5952  ;;  %v6693_v35 = vcombine.high %v6685_v26, %v6685_v26  ;;  %v7037_v32 = vrot.slane %v7023_v16, %v9436_v1  ;;  %v6330_v62 = vmul.f32 %v11059_v45, %v6285_v39 }
 0x35b   : > { %5498 = vst [vmem:[#allocation4 + $0x48] sm:$0x11] %v5493_v14  ;;  %v5957_v60 = vrot.slane %v10501_v9, 4  ;;  %6612 = vrot.lane.b32.xlu1 %v6609_v0, %s11026_s21  ;;  %v7843_v14 = vpack.c.bf16 %v6694_v22, %v6692_v5  ;;  %v6469_v17 = vrot.slane %v6443_v27, %v9436_v1  ;;  %v6675_v11 = vmul.f32 %v6670_v38, %v6630_v50  ;;  %v6859_v22 = vld [vmem:[#allocation5 + $0xa] sm:$0x3] }
 0x35c   : > { %v7842_v12 = vpack.c.bf16 %v6693_v35, %v6685_v26  ;;  %6498 = vrot.lane.b32.xlu0 %v6494_v63, %s11029_s24  ;;  %v6610_v26 = vrot.slane %v7840_v24, 6  ;;  %v4200_v25 = vpop.permute.xlu1 %4199  ;;  %v7039_v53 = vcombine.high %v7037_v32, %v7037_v32  ;;  %v6356_v21 = vrot.slane %v6330_v62, %v9436_v1 }
 0x35d   : > { %v5959_v37 = vsel %vm614_vm2, %v5956_v61, %v5957_v60  ;;  %v6214_v61 = vmul.f32 %v6209_v10, %v6169_v4  ;;  %v6726_v18 = vrot.slane %v7843_v14, 5  ;;  %v6585_v35 = vrot.slane %v6559_v23, %v9436_v1 }
 0x35e   : > { %v5961_v40 = vsel %vm5960_vm14, %v5951_v48, %v5959_v37  ;;  %v6725_v42 = vrot.slane %v7842_v12, 5  ;;  %v6923_v48 = vcombine.high %v6921_v59, %v6921_v59  ;;  %v7851_v37 = vpack.c.bf16 %v7038_v3, %v7030_v28 }
 0x35f   : > { %5966 = vst [vmem:[#allocation4 + $0x60] sm:$0x11] %v5961_v40  ;;  %v6240_v10 = vrot.slane %v6214_v61, %v9436_v1  ;;  %v7852_v44 = vpack.c.bf16 %v7039_v53, %v7037_v32  ;;  %v7835_v31 = vpack.c.bf16 %v6356_v21, %v6356_v21  ;;  %v7841_v36 = vpack.c.bf16 %v6585_v35, %v6585_v35 }
 0x360   : > { %6614 = vrot.lane.b32.xlu0 %v6610_v26, %s11026_s21  ;;  %6728 = vrot.lane.b32.xlu1 %v6725_v42, %s8027_s26  ;;  %v7849_v40 = vpack.c.bf16 %v6923_v48, %v6921_v59  ;;  %v4318_v5 = vpop.permute.xlu1 %4317  ;;  %v7070_v43 = vrot.slane %v7851_v37, 6  ;;  %v7020_v12 = vmul.f32 %v7015_v49, %v6975_v13  ;;  %v11060_v59 = vrot.slane %v10320_v2, 6 }
 0x361   : > { %v7832_v6 = vpack.c.bf16 %v6240_v10, %v6240_v10  ;;  %v7071_v0 = vrot.slane %v7852_v44, 6  ;;  %v7838_v28 = vpack.c.bf16 %v6469_v17, %v6469_v17  ;;  %v6701_v30 = vrot.slane %v6675_v11, %v9436_v1  ;;  %v7105_v11 = vld [vmem:[%s10838_s9] sm:$0x3] }
 0x362   : > { %v6955_v56 = vrot.slane %v7849_v40, 7  ;;  %v6791_v19 = vmul.f32 %v11060_v59, %v6746_v57  ;;  %v6904_v38 = vmul.f32 %v6899_v20, %v6859_v22  ;;  %v6611_v24 = vrot.slane %v7841_v36, 6 }
 0x363   : > { %v6266_v63 = vrot.slane %v7832_v6, 5  ;;  %v7046_v47 = vrot.slane %v7020_v12, %v9436_v1  ;;  %v4205_v4 = vrot.slane %v4200_v25, 4  ;;  %v6495_v48 = vrot.slane %v7838_v28, 7 }
 0x364   : > { %6730 = vrot.lane.b32.xlu0 %v6726_v18, %s8027_s26  ;;  %6957 = vrot.lane.b32.xlu1 %v6954_v54, %s8029_s27  ;;  %v4435_v16 = vpop.permute.xlu1 %4434  ;;  %v6817_v49 = vrot.slane %v6791_v19, %v9436_v1  ;;  %v10559_v2 = vpop.permute.xlu0 %4201  ;;  %v7844_v55 = vpack.c.bf16 %v6701_v30, %v6701_v30  ;;  %v6930_v29 = vrot.slane %v6904_v38, %v9436_v1  ;;  %v4323_v14 = vrot.slane %v4318_v5, 4 }
 0x365   : > { %v4206_v42 = vrot.slane %v10559_v2, 4  ;;  %v7853_v39 = vpack.c.bf16 %v7046_v47, %v7046_v47  ;;  %v4440_v53 = vrot.slane %v4435_v16, 4  ;;  %vm5845_vm10 = vcmask 392192  }
 0x366   : > { %v7847_v32 = vpack.c.bf16 %v6817_v49, %v6817_v49  ;;  %v6727_v45 = vrot.slane %v7844_v55, 5  ;;  %v7850_v62 = vpack.c.bf16 %v6930_v29, %v6930_v29 }
 0x367   : > { %v4208_v51 = vsel %vm614_vm2, %v4205_v4, %v4206_v42  ;;  %v7072_v54 = vrot.slane %v7853_v39, 6 }
 0x368   : > { %6959 = vrot.lane.b32.xlu0 %v6955_v56, %s8029_s27  ;;  %7073 = vrot.lane.b32.xlu1 %v7070_v43, %s8024_s22  ;;  %v4667_v20 = vpop.permute.xlu1 %4666  ;;  %v4210_v3 = vsel %vm11061_vm6, %v4200_v25, %v4208_v51  ;;  %v10569_v26 = vpop.permute.xlu0 %4319  ;;  %v6956_v40 = vrot.slane %v7850_v62, 7  ;;  %vm11066_vm6 = vcmask 973824  }
 0x369   : > { %4215 = vst [vmem:[#allocation4] sm:$0x22] %v4210_v3  ;;  %v4324_v61 = vrot.slane %v10569_v26, 4 }
 0x36b   : > { %v4326_v8 = vsel %vm614_vm2, %v4323_v14, %v4324_v61 }
 0x36c   : > { %7075 = vrot.lane.b32.xlu0 %v7071_v0, %s8024_s22  ;;  %6384 = vrot.lane.b32.xlu1 %v7835_v31, %s8026_s19  ;;  %v4785_v23 = vpop.permute.xlu1 %4784  ;;  %v4328_v25 = vsel %vm4327_vm9, %v4318_v5, %v4326_v8  ;;  %v10578_v33 = vpop.permute.xlu0 %4436  ;;  %v4672_v5 = vrot.slane %v4667_v20, 4  ;;  %s546_s19 = scalar_lea.vmem %s10839_s10, %s7435_s11 }
 0x36d   : > { %4333 = vst [vmem:[#allocation4] sm:$0x44] %v4328_v25  ;;  %v4441_v37 = vrot.slane %v10578_v33, 4  ;;  %v4790_v13 = vrot.slane %v4785_v23, 4 }
 0x36f   : > { %v4443_v18 = vsel %vm614_vm2, %v4440_v53, %v4441_v37 }
 0x370   : > { %6271 = vrot.lane.b32.xlu0 %v6266_v63, %s11028_s17  ;;  %6616 = vrot.lane.b32.xlu1 %v6611_v24, %s11026_s21  ;;  %v4445_v27 = vsel %vm11062_vm1, %v4435_v16, %v4443_v18  ;;  %v10587_v10 = vpop.permute.xlu0 %4668  ;;  %v4903_v21 = vpop.permute.xlu1 %4902  ;;  %vm11067_vm1 = vcmask 1039360  }
 0x371   : > { %4450 = vst [vmem:[#allocation4] sm:$0x88] %v4445_v27  ;;  %v4673_v50 = vrot.slane %v10587_v10, 4  ;;  %v4908_v22 = vrot.slane %v4903_v21, 4 }
 0x373   : > { %v4675_v35 = vsel %vm614_vm2, %v4672_v5, %v4673_v50 }
 0x374   : > { %6500 = vrot.lane.b32.xlu0 %v6495_v48, %s11029_s24  ;;  %6845 = vrot.lane.b32.xlu1 %v7847_v32, %s8028_s23  ;;  %v4677_v43 = vsel %vm4676_vm7, %v4667_v20, %v4675_v35  ;;  %v10595_v56 = vpop.permute.xlu0 %4786  ;;  %v5135_v44 = vpop.permute.xlu1 %5134 }
 0x375   : > { %4682 = vst [vmem:[#allocation4 + $0x18] sm:$0x22] %v4677_v43  ;;  %v4791_v57 = vrot.slane %v10595_v56, 4  ;;  %v5140_v28 = vrot.slane %v5135_v44, 4 }
 0x377   : > { %v4793_v17 = vsel %vm614_vm2, %v4790_v13, %v4791_v57 }
 0x378   : > { %6732 = vrot.lane.b32.xlu0 %v6727_v45, %s8027_s26  ;;  %7077 = vrot.lane.b32.xlu1 %v7072_v54, %s8024_s22  ;;  %v4795_v31 = vsel %vm4794_vm13, %v4785_v23, %v4793_v17  ;;  %v10605_v6 = vpop.permute.xlu0 %4904  ;;  %v5251_v36 = vpop.permute.xlu1 %5250 }
 0x379   : > { %4800 = vst [vmem:[#allocation4 + $0x18] sm:$0x44] %v4795_v31  ;;  %v4909_v12 = vrot.slane %v10605_v6, 4  ;;  %v5256_v49 = vrot.slane %v5251_v36, 4 }
 0x37b   : > { %v4911_v59 = vsel %vm614_vm2, %v4908_v22, %v4909_v12 }
 0x37c   : > { %6961 = vrot.lane.b32.xlu0 %v6956_v40, %s8029_s27  ;;  %v4913_v19 = vsel %vm4912_vm4, %v4903_v21, %v4911_v59  ;;  %v10612_v0 = vpop.permute.xlu0 %5136  ;;  %v5369_v16 = vpop.permute.xlu1 %5368 }
 0x37d   : > { %4918 = vst [vmem:[#allocation4 + $0x18] sm:$0x88] %v4913_v19  ;;  %v5141_v30 = vrot.slane %v10612_v0, 4  ;;  %v5374_v32 = vrot.slane %v5369_v16, 4 }
 0x37f   : > { %v5143_v38 = vsel %vm614_vm2, %v5140_v28, %v5141_v30 }
 0x380   : > { %7108 = vperm.xlu0 %7902, %v7105_v11   ;;  %v5144_v63 = vsel %vm11063_vm3, %v5135_v44, %v5143_v38  ;;  %v10619_v24 = vpop.permute.xlu0 %5252  ;;  %v5600_v47 = vpop.permute.xlu1 %5599  ;;  %vm11068_vm3 = vcmask 982016  }
 0x381   : > { %5149 = vst [vmem:[#allocation4 + $0x30] sm:$0x22] %v5144_v63  ;;  %v5257_v4 = vrot.slane %v10619_v24, 4  ;;  %v5605_v62 = vrot.slane %v5600_v47, 4 }
 0x383   : > { %v5259_v48 = vsel %vm614_vm2, %v5256_v49, %v5257_v4 }
 0x384   : > { %v5261_v55 = vsel %vm11064_vm12, %v5251_v36, %v5259_v48  ;;  %v10626_v51 = vpop.permute.xlu0 %5370  ;;  %v7959_v20 = vld [vmem:[#allocation4] ss:$24 sps:$4 sm:$0xff]   ;;  %v7961_v29 = vld [vmem:[#allocation4 + $0x4] ss:$24 sps:$4 sm:$0xff]   ;;  %v5718_v39 = vpop.permute.xlu1 %5717  ;;  %vm11069_vm12 = vcmask 457728  }
 0x385   : > { %5266 = vst [vmem:[#allocation4 + $0x30] sm:$0x44] %v5261_v55  ;;  %v5375_v3 = vrot.slane %v10626_v51, 4  ;;  %7198 = vmatprep.subr.bf16.mxu1 %v7961_v29  ;;  %v5723_v27 = vrot.slane %v5718_v39, 4 }
 0x386   : > { %7199 = vmatpush1.bf16.msra.mxu1 %v7959_v20 }
 0x387   : > { %v5377_v14 = vsel %vm614_vm2, %v5374_v32, %v5375_v3 }
 0x388   : > { %v5379_v8 = vsel %vm5378_vm5, %v5369_v16, %v5377_v14  ;;  %v10633_v23 = vpop.permute.xlu0 %5601  ;;  %v5836_v45 = vpop.permute.xlu1 %5835 }
 0x389   : > { %5384 = vst [vmem:[#allocation4 + $0x30] sm:$0x88] %v5379_v8  ;;  %v5606_v54 = vrot.slane %v10633_v23, 4  ;;  %v5841_v13 = vrot.slane %v5836_v45, 4 }
 0x38b   : > { %v5608_v25 = vsel %vm614_vm2, %v5605_v62, %v5606_v54 }
 0x38c   : > { %v5610_v53 = vsel %vm11065_vm8, %v5600_v47, %v5608_v25  ;;  %v10640_v18 = vpop.permute.xlu0 %5719  ;;  %v6069_v40 = vpop.permute.xlu1 %6068  ;;  %vm11071_vm8 = vcmask 515072  }
 0x38d   : > { %5615 = vst [vmem:[#allocation4 + $0x48] sm:$0x22] %v5610_v53  ;;  %v5724_v21 = vrot.slane %v10640_v18, 4  ;;  %v6074_v59 = vrot.slane %v6069_v40, 4 }
 0x38f   : > { %v5726_v5 = vsel %vm614_vm2, %v5723_v27, %v5724_v21 }
 0x390   : > { %v5728_v35 = vsel %vm5727_vm0, %v5718_v39, %v5726_v5  ;;  %v10647_v43 = vpop.permute.xlu0 %5837  ;;  %v10649_v44 = vpop.permute.xlu1 %6380 }
 0x391   : > { %5733 = vst [vmem:[#allocation4 + $0x48] sm:$0x44] %v5728_v35  ;;  %v5842_v17 = vrot.slane %v10647_v43, 4 }
 0x393   : > { %v5844_v11 = vsel %vm614_vm2, %v5841_v13, %v5842_v17 }
 0x394   : > { %v5846_v31 = vsel %vm5845_vm10, %v5836_v45, %v5844_v11  ;;  %v10656_v36 = vpop.permute.xlu0 %6070  ;;  %v10658_v22 = vpop.permute.xlu1 %6841 }
 0x395   : > { %5851 = vst [vmem:[#allocation4 + $0x48] sm:$0x88] %v5846_v31  ;;  %v6075_v19 = vrot.slane %v10656_v36, 4 }
 0x397   : > { %v6077_v16 = vsel %vm614_vm2, %v6074_v59, %v6075_v19 }
 0x398   : > { %v6079_v28 = vsel %vm6078_vm15, %v6069_v40, %v6077_v16  ;;  %v4553_v38 = vpop.permute.xlu0 %4552  ;;  %v4204_v63 = vpop.permute.xlu1 %4203 }
 0x399   : > { %6084 = vst [vmem:[#allocation4 + $0x60] sm:$0x22] %v6079_v28  ;;  %v4556_v47 = vrot.slane %v4553_v38, 4  ;;  %v4207_v49 = vrot.slane %v4204_v63, 4 }
 0x39b   : > { %v4560_v48 = vsel %vm614_vm2, %v4555_v34, %v4556_v47  ;;  %v4211_v55 = vsel %vm614_vm2, %v4206_v42, %v4207_v49 }
 0x39c   : > { %v4561_v20 = vsel %vm11066_vm6, %v10449_v15, %v4560_v48  ;;  %v5022_v29 = vpop.permute.xlu0 %5021  ;;  %v4212_v39 = vsel %vm11067_vm1, %v10559_v2, %v4211_v55  ;;  %v7962_v32 = vld [vmem:[#allocation4 + $0x30] ss:$24 sps:$4 sm:$0xff]   ;;  %v7964_v14 = vld [vmem:[#allocation4 + $0x34] ss:$24 sps:$4 sm:$0xff]   ;;  %v4439_v8 = vpop.permute.xlu1 %4438  ;;  %vm11072_vm6 = vcmask 449536  }
 0x39d   : > { %4565 = vst [vmem:[#allocation4 + $0x20] sm:$0x11] %v4561_v20  ;;  %v5025_v45 = vrot.slane %v5022_v29, 4  ;;  %4216 = vst [vmem:[#allocation4 + $0x8] sm:$0x22] %v4212_v39  ;;  %v4442_v62 = vrot.slane %v4439_v8, 4  ;;  %7200 = vmatprep.subr.bf16.mxu1 %v7964_v14 }
 0x39e   : > { %7201 = vmatpush1.bf16.msra.mxu1 %v7962_v32 }
 0x39f   : > { %v5029_v34 = vsel %vm614_vm2, %v5024_v41, %v5025_v45  ;;  %v4446_v15 = vsel %vm614_vm2, %v4441_v37, %v4442_v62 }
 0x3a0   : > { %v5030_v2 = vsel %vm5027_vm11, %v10468_v7, %v5029_v34  ;;  %v5487_v42 = vpop.permute.xlu0 %5486  ;;  %v4447_v25 = vsel %vm11068_vm3, %v10578_v33, %v4446_v15  ;;  %v4671_v53 = vpop.permute.xlu1 %4670  ;;  %v6386_v34 = vrot.slane %v10649_v44, 4 }
 0x3a1   : > { %5034 = vst [vmem:[#allocation4 + $0x38] sm:$0x11] %v5030_v2  ;;  %v5490_v40 = vrot.slane %v5487_v42, 4  ;;  %4451 = vst [vmem:[#allocation4 + $0x8] sm:$0x88] %v4447_v25  ;;  %v4674_v27 = vrot.slane %v4671_v53, 4 }
 0x3a2   : > { %v6847_v53 = vrot.slane %v10658_v22, 4 }
 0x3a3   : > { %v5494_v41 = vsel %vm614_vm2, %v5489_v58, %v5490_v40  ;;  %v4678_v37 = vsel %vm614_vm2, %v4673_v50, %v4674_v27 }
 0x3a4   : > { %v5495_v7 = vsel %vm11069_vm12, %v10485_v52, %v5494_v41  ;;  %v5955_v5 = vpop.permute.xlu0 %5954  ;;  %v4679_v33 = vsel %vm4676_vm7, %v10587_v10, %v4678_v37  ;;  %v4907_v35 = vpop.permute.xlu1 %4906  ;;  %vm7185_vm12 = vcmask 1042432  }
 0x3a5   : > { %5499 = vst [vmem:[#allocation4 + $0x50] sm:$0x11] %v5495_v7  ;;  %v5958_v13 = vrot.slane %v5955_v5, 4  ;;  %4683 = vst [vmem:[#allocation4 + $0x20] sm:$0x22] %v4679_v33  ;;  %v4910_v11 = vrot.slane %v4907_v35, 4 }
 0x3a7   : > { %v5962_v58 = vsel %vm614_vm2, %v5957_v60, %v5958_v13  ;;  %v4914_v50 = vsel %vm614_vm2, %v4909_v12, %v4910_v11 }
 0x3a8   : > { %v5963_v52 = vsel %vm5960_vm14, %v10501_v9, %v5962_v58  ;;  %v4322_v31 = vpop.permute.xlu0 %4321  ;;  %v4915_v10 = vsel %vm4912_vm4, %v10605_v6, %v4914_v50  ;;  %v5139_v59 = vpop.permute.xlu1 %5138  ;;  %vm11070_vm14 = vcmask 523264  }
 0x3a9   : > { %5967 = vst [vmem:[#allocation4 + $0x68] sm:$0x11] %v5963_v52  ;;  %v4325_v16 = vrot.slane %v4322_v31, 4  ;;  %4919 = vst [vmem:[#allocation4 + $0x20] sm:$0x88] %v4915_v10  ;;  %v5142_v28 = vrot.slane %v5139_v59, 4 }
 0x3ab   : > { %v4329_v60 = vsel %vm614_vm2, %v4324_v61, %v4325_v16  ;;  %v5145_v12 = vsel %vm614_vm2, %v5141_v30, %v5142_v28 }
 0x3ac   : > { %v4330_v9 = vsel %vm4327_vm9, %v10569_v26, %v4329_v60  ;;  %v4789_v38 = vpop.permute.xlu0 %4788  ;;  %v5146_v6 = vsel %vm11070_vm14, %v10612_v0, %v5145_v12  ;;  %v5373_v63 = vpop.permute.xlu1 %5372 }
 0x3ad   : > { %4334 = vst [vmem:[#allocation4 + $0x8] sm:$0x44] %v4330_v9  ;;  %v4792_v47 = vrot.slane %v4789_v38, 4  ;;  %5150 = vst [vmem:[#allocation4 + $0x38] sm:$0x22] %v5146_v6  ;;  %v5376_v49 = vrot.slane %v5373_v63, 4 }
 0x3af   : > { %v4796_v61 = vsel %vm614_vm2, %v4791_v57, %v4792_v47  ;;  %v5380_v30 = vsel %vm614_vm2, %v5375_v3, %v5376_v49 }
 0x3b0   : > { %v4797_v26 = vsel %vm4794_vm13, %v10595_v56, %v4796_v61  ;;  %v5255_v48 = vpop.permute.xlu0 %5254  ;;  %v5381_v0 = vsel %vm5378_vm5, %v10626_v51, %v5380_v30  ;;  %v5604_v55 = vpop.permute.xlu1 %5603  ;;  %vm11073_vm5 = vmmov %vm11067_vm1 }
 0x3b1   : > { %4801 = vst [vmem:[#allocation4 + $0x20] sm:$0x44] %v4797_v26  ;;  %v5258_v20 = vrot.slane %v5255_v48, 4  ;;  %5385 = vst [vmem:[#allocation4 + $0x38] sm:$0x88] %v5381_v0  ;;  %v5607_v29 = vrot.slane %v5604_v55, 4 }
 0x3b3   : > { %v5262_v57 = vsel %vm614_vm2, %v5257_v4, %v5258_v20  ;;  %v5611_v3 = vsel %vm614_vm2, %v5606_v54, %v5607_v29 }
 0x3b4   : > { %v5263_v56 = vsel %vm11071_vm8, %v10619_v24, %v5262_v57  ;;  %v5722_v39 = vpop.permute.xlu0 %5721  ;;  %v5612_v51 = vsel %vm11072_vm6, %v10633_v23, %v5611_v3  ;;  %v5840_v32 = vpop.permute.xlu1 %5839 }
 0x3b5   : > { %5267 = vst [vmem:[#allocation4 + $0x38] sm:$0x44] %v5263_v56  ;;  %v5725_v14 = vrot.slane %v5722_v39, 4  ;;  %5616 = vst [vmem:[#allocation4 + $0x50] sm:$0x22] %v5612_v51  ;;  %v5843_v8 = vrot.slane %v5840_v32, 4 }
 0x3b7   : > { %v5729_v4 = vsel %vm614_vm2, %v5724_v21, %v5725_v14  ;;  %v5847_v54 = vsel %vm614_vm2, %v5842_v17, %v5843_v8 }
 0x3b8   : > { %v5730_v24 = vsel %vm5727_vm0, %v10640_v18, %v5729_v4  ;;  %v10743_v45 = vpop.permute.xlu0 %6382  ;;  %v5848_v23 = vsel %vm5845_vm10, %v10647_v43, %v5847_v54  ;;  %v6073_v62 = vpop.permute.xlu1 %6072  ;;  %vm11074_vm10 = vmmov %vm11068_vm3 }
 0x3b9   : > { %5734 = vst [vmem:[#allocation4 + $0x50] sm:$0x44] %v5730_v24  ;;  %v6387_v15 = vrot.slane %v10743_v45, 4  ;;  %5852 = vst [vmem:[#allocation4 + $0x50] sm:$0x88] %v5848_v23  ;;  %v6076_v21 = vrot.slane %v6073_v62, 4 }
 0x3bb   : > { %v6389_v2 = vsel %vm614_vm2, %v6386_v34, %v6387_v15  ;;  %v6080_v17 = vsel %vm614_vm2, %v6075_v19, %v6076_v21 }
 0x3bc   : > { %v6390_v18 = vsel %vm4327_vm9, %v10649_v44, %v6389_v2  ;;  %v6081_v43 = vsel %vm6078_vm15, %v10656_v36, %v6080_v17  ;;  %v6268_v25 = vpop.permute.xlu1 %6267  ;;  %vm11075_vm15 = vcmask 973824  }
 0x3bd   : > { %6395 = vst [vmem:[#allocation4 + $0x78] sm:$0x11] %v6390_v18  ;;  %6085 = vst [vmem:[#allocation4 + $0x68] sm:$0x22] %v6081_v43  ;;  %v6273_v19 = vrot.slane %v6268_v25, 4 }
 0x3be   : > { %vm11076_vm3 = vmmov %vm11075_vm15 }
 0x3c0   : > { %v6497_v37 = vpop.permute.xlu1 %6496 }
 0x3c1   : > { %v6502_v5 = vrot.slane %v6497_v37, 4 }
 0x3c6   : > { %v10755_v42 = vpop.permute.xlu0 %6843 }
 0x3c7   : > { %v6848_v40 = vrot.slane %v10755_v42, 4 }
 0x3c9   : > { %v6850_v27 = vsel %vm614_vm2, %v6847_v53, %v6848_v40 }
 0x3ca   : > { %v6851_v44 = vsel %vm4794_vm13, %v10658_v22, %v6850_v27  ;;  %v6270_v41 = vpop.permute.xlu0 %6269 }
 0x3cb   : > { %6856 = vst [vmem:[#allocation4 + $0x90] sm:$0x11] %v6851_v44  ;;  %v6274_v7 = vrot.slane %v6270_v41, 4 }
 0x3cd   : > { %v6276_v36 = vsel %vm614_vm2, %v6273_v19, %v6274_v7  ;;  %v6613_v13 = vpop.permute.xlu1 %6612 }
 0x3ce   : > { %v6277_v33 = vsel %vm11073_vm5, %v6268_v25, %v6276_v36  ;;  %v6499_v35 = vpop.permute.xlu0 %6498  ;;  %v6618_v50 = vrot.slane %v6613_v13, 4 }
 0x3cf   : > { %6282 = vst [vmem:[#allocation4 + $0x60] sm:$0x88] %v6277_v33  ;;  %v6503_v11 = vrot.slane %v6499_v35, 4  ;;  %v7972_v33 = vld [vmem:[#allocation4 + $0xc] ss:$24 sps:$4 sm:$0xff]  }
 0x3d1   : > { %v6505_v58 = vsel %vm614_vm2, %v6502_v5, %v6503_v11 }
 0x3d2   : > { %v6506_v52 = vsel %vm11074_vm10, %v6497_v37, %v6505_v58  ;;  %v6615_v31 = vpop.permute.xlu0 %6614  ;;  %v6729_v22 = vpop.permute.xlu1 %6728 }
 0x3d3   : > { %6511 = vst [vmem:[#allocation4 + $0x78] sm:$0x22] %v6506_v52  ;;  %v6619_v10 = vrot.slane %v6615_v31, 4  ;;  %v6734_v16 = vrot.slane %v6729_v22, 4 }
 0x3d5   : > { %v6621_v59 = vsel %vm614_vm2, %v6618_v50, %v6619_v10  ;;  %v7970_v50 = vld [vmem:[#allocation4 + $0x8] ss:$24 sps:$4 sm:$0xff]  }
 0x3d6   : > { %v6622_v28 = vsel %vm11075_vm15, %v6613_v13, %v6621_v59  ;;  %v10772_v60 = vpop.permute.xlu0 %6730  ;;  %v6958_v12 = vpop.permute.xlu1 %6957 }
 0x3d7   : > { %6627 = vst [vmem:[#allocation4 + $0x78] sm:$0x44] %v6622_v28  ;;  %v6735_v9 = vrot.slane %v10772_v60, 4  ;;  %v6963_v6 = vrot.slane %v6958_v12, 4 }
 0x3d9   : > { %v6737_v38 = vsel %vm614_vm2, %v6734_v16, %v6735_v9 }
 0x3da   : > { %v6738_v63 = vsel %vm4676_vm7, %v6729_v22, %v6737_v38  ;;  %v10777_v47 = vpop.permute.xlu0 %6959  ;;  %v7074_v49 = vpop.permute.xlu1 %7073 }
 0x3db   : > { %6743 = vst [vmem:[#allocation4 + $0x78] sm:$0x88] %v6738_v63  ;;  %v6964_v61 = vrot.slane %v10777_v47, 4  ;;  %v7079_v26 = vrot.slane %v7074_v49, 4 }
 0x3dd   : > { %v6966_v30 = vsel %vm614_vm2, %v6963_v6, %v6964_v61 }
 0x3de   : > { %v6967_v48 = vsel %vm4912_vm4, %v6958_v12, %v6966_v30  ;;  %v7076_v0 = vpop.permute.xlu0 %7075  ;;  %v6385_v55 = vpop.permute.xlu1 %6384 }
 0x3df   : > { %6972 = vst [vmem:[#allocation4 + $0x90] sm:$0x22] %v6967_v48  ;;  %v7080_v20 = vrot.slane %v7076_v0, 4  ;;  %v6388_v29 = vrot.slane %v6385_v55, 4 }
 0x3e1   : > { %v7082_v57 = vsel %vm614_vm2, %v7079_v26, %v7080_v20  ;;  %v6391_v3 = vsel %vm614_vm2, %v6387_v15, %v6388_v29 }
 0x3e2   : > { %v7083_v56 = vsel %vm5027_vm11, %v7074_v49, %v7082_v57  ;;  %v6272_v39 = vpop.permute.xlu0 %6271  ;;  %v6392_v51 = vsel %vm4327_vm9, %v10743_v45, %v6391_v3  ;;  %v7965_v32 = vld [vmem:[#allocation4 + $0x60] ss:$24 sps:$4 sm:$0xff]   ;;  %v7967_v14 = vld [vmem:[#allocation4 + $0x64] ss:$24 sps:$4 sm:$0xff]   ;;  %v6617_v8 = vpop.permute.xlu1 %6616  ;;  %vm11077_vm9 = vmmov %vm11074_vm10 }
 0x3e3   : > { %7088 = vst [vmem:[#allocation4 + $0x90] sm:$0x44] %v7083_v56  ;;  %v6275_v4 = vrot.slane %v6272_v39, 4  ;;  %6396 = vst [vmem:[#allocation4 + $0x80] sm:$0x11] %v6392_v51  ;;  %v6620_v54 = vrot.slane %v6617_v8, 4  ;;  %7202 = vmatprep.subr.bf16.mxu1 %v7967_v14 }
 0x3e4   : > { %7203 = vmatpush1.bf16.msra.mxu1 %v7965_v32 }
 0x3e5   : > { %v6278_v24 = vsel %vm614_vm2, %v6274_v7, %v6275_v4  ;;  %v6623_v23 = vsel %vm614_vm2, %v6619_v10, %v6620_v54  ;;  %v7973_v10 = vld [vmem:[#allocation4 + $0x38] ss:$24 sps:$4 sm:$0xff]  }
 0x3e6   : > { %v6279_v62 = vsel %vm11067_vm1, %v6270_v41, %v6278_v24  ;;  %v6501_v34 = vpop.permute.xlu0 %6500  ;;  %v6624_v15 = vsel %vm11076_vm3, %v6615_v31, %v6623_v23  ;;  %v6846_v21 = vpop.permute.xlu1 %6845  ;;  %v7975_v31 = vld [vmem:[#allocation4 + $0x3c] ss:$24 sps:$4 sm:$0xff]  }
 0x3e7   : > { %6283 = vst [vmem:[#allocation4 + $0x68] sm:$0x88] %v6279_v62  ;;  %v6504_v45 = vrot.slane %v6501_v34, 4  ;;  %6628 = vst [vmem:[#allocation4 + $0x80] sm:$0x44] %v6624_v15  ;;  %v6849_v2 = vrot.slane %v6846_v21, 4 }
 0x3e9   : > { %v6507_v17 = vsel %vm614_vm2, %v6503_v11, %v6504_v45  ;;  %v6852_v18 = vsel %vm614_vm2, %v6848_v40, %v6849_v2  ;;  %v7090_v11 = vld [vmem:[%s10837_s8] sm:$0x1] }
 0x3ea   : > { %v6508_v43 = vsel %vm11077_vm9, %v6499_v35, %v6507_v17  ;;  %v6733_v25 = vpop.permute.xlu0 %6732  ;;  %v6853_v53 = vsel %vm4794_vm13, %v10755_v42, %v6852_v18  ;;  %v7103_v27 = vld [vmem:[#allocation4 + $0x90] sm:$0x77]  ;;  %v7078_v19 = vpop.permute.xlu1 %7077 }
 0x3eb   : > { %6512 = vst [vmem:[#allocation4 + $0x80] sm:$0x22] %v6508_v43  ;;  %v6736_v44 = vrot.slane %v6733_v25, 4  ;;  %6857 = vst [vmem:[#allocation4 + $0x98] sm:$0x11] %v6853_v53  ;;  %v7671_v41 = vcombine.high %v7103_v27, %v7103_v27  ;;  %v7081_v37 = vrot.slane %v7078_v19, 4  ;;  %v7670_v7 = vcombine.low %v7103_v27, %v7103_v27 }
 0x3ed   : > { %v6739_v36 = vsel %vm614_vm2, %v6735_v9, %v6736_v44  ;;  %7674 = vmatprep.subr.msk.bf16.mxu1 %vm7185_vm12, %v7671_v41  ;;  %v7084_v40 = vsel %vm614_vm2, %v7080_v20, %v7081_v37  ;;  %v7187_v5 = vsel %vm7185_vm12, %v7670_v7, 0 }
 0x3ee   : > { %v6740_v42 = vsel %vm4676_vm7, %v10772_v60, %v6739_v36  ;;  %v6962_v35 = vpop.permute.xlu0 %6961  ;;  %v7085_v13 = vsel %vm5027_vm11, %v7076_v0, %v7084_v40  ;;  %7205 = vmatpush1.bf16.msra.mxu1 %v7187_v5 }
 0x3ef   : > { %6744 = vst [vmem:[#allocation4 + $0x80] sm:$0x88] %v6740_v42  ;;  %v6965_v58 = vrot.slane %v6962_v35, 4  ;;  %7089 = vst [vmem:[#allocation4 + $0x98] sm:$0x44] %v7085_v13  ;;  %7239 = vmatprep.subr.bf16.mxu1 %v7972_v33 }
 0x3f1   : > { %v6968_v52 = vsel %vm614_vm2, %v6964_v61, %v6965_v58  ;;  %7675 = vmatmul.mubr.msk.bf16.vlgmr.msra.gmra.mrb[4].mxu1 %vm5727_vm0, %v7090_v11 }
 0x3f2   : > { %v6969_v22 = vsel %vm4912_vm4, %v10777_v47, %v6968_v52  ;;  %7240 = vmatpush1.bf16.msra.mxu1 %v7970_v50  ;;  %7271 = vmatprep.mubr.bf16.mxu1 %v11003_v46 }
 0x3f3   : > { %6973 = vst [vmem:[#allocation4 + $0x98] sm:$0x22] %v6969_v22  ;;  %7241 = vmatprep.subr.bf16.mxu1 %v7975_v31 }
 0x3f6   : > { %7242 = vmatpush1.bf16.msra.mxu1 %v7973_v10  ;;  %v7978_v59 = vld [vmem:[#allocation4 + $0x6c] ss:$24 sps:$4 sm:$0xff]   ;;  %v7976_v16 = vld [vmem:[#allocation4 + $0x68] ss:$24 sps:$4 sm:$0xff]  }
 0x3f7   : > { %7243 = vmatprep.subr.bf16.mxu1 %v7978_v59 }
 0x3fa   : > { %7244 = vmatpush1.bf16.msra.mxu1 %v7976_v16  ;;  %v7104_v28 = vld [vmem:[#allocation4 + $0x98] sm:$0x77] }
 0x3fb   : > { %v7673_v60 = vcombine.high %v7104_v28, %v7104_v28  ;;  %v7672_v12 = vcombine.low %v7104_v28, %v7104_v28 }
 0x3fd   : > { %7676 = vmatprep.subr.msk.bf16.mxu1 %vm7185_vm12, %v7673_v60  ;;  %v7193_v9 = vsel %vm7185_vm12, %v7672_v12, 0 }
 0x3fe   : > { %7246 = vmatpush1.bf16.msra.mxu1 %v7193_v9 }
 0x3ff   : > { %v7109_v38 = vpop.permute.xlu0 %7108 }
 0x401   : > { %7677 = vmatmul.mubr.msk.bf16.vlgmr.msra.gmra.mrb[8].mxu1 %vm5727_vm0, %v7090_v11 }
 0x4c4   : > { %v7232_v46 = vpop.f32.mrb[4].mxu1 }
 0x4c5   : > { %v7234_v6 = vpop.f32.mrb[5].mxu1  ;;  %v7233_v63 = vadd.f32 %v7232_v46, %v7109_v38 }
 0x4c6   : > { %v7235_v47 = vadd.f32 %v7234_v6, %v7109_v38  ;;  %v7236_v49 = vpop.f32.mrb[6].mxu1 }
 0x4c7   : > { %v7280_v61 = vmax.f32 %v7233_v63, 0.0  ;;  %v7237_v30 = vpop.f32.mrb[7].mxu1 }
 0x4c8   : > { %v7281_v26 = vmax.f32 %v7235_v47, 0.0 }
 0x4ca   : > { %v7288_v48 = vcombine.low %v7280_v61, %v7281_v26 }
 0x4cc   : > { %v7296_v32 = vrot.slane %v7288_v48, %v9436_v1 }
 0x4d4   : > { %v7273_v0 = vpop.f32.mrb[8].mxu1 }
 0x4d5   : > { %v7274_v55 = vadd.f32 %v7273_v0, %v7109_v38  ;;  %v7275_v20 = vpop.f32.mrb[9].mxu1 }
 0x4d6   : > { %v7276_v29 = vadd.f32 %v7275_v20, %v7109_v38  ;;  %v7277_v57 = vpop.f32.mrb[10].mxu1 }
 0x4d7   : > { %v7282_v3 = vmax.f32 %v7274_v55, 0.0  ;;  %v7278_v56 = vpop.f32.mrb[11].mxu1 }
 0x4d8   : > { %v7283_v39 = vmax.f32 %v7276_v29, 0.0 }
 0x4da   : > { %v7289_v51 = vcombine.low %v7282_v3, %v7283_v39 }
 0x4dc   : > { %v7303_v14 = vrot.slane %v7289_v51, %v9436_v1 }
 0x4de   : > { %v7304_v8 = vcombine.low %v7296_v32, %v7303_v14 }
 0x4e0   : > { %7306 = vst [vmem:[%s546_s19] sm:$0xff] %v7304_v8 }
 0x4e1 PF: > { %s20_s13 = sadd.s32 1, %s7993_s13  }
 0x4e2   : > { %p17_p8 = scmp.ge.s32.totalorder %s20_s13, 4  }
 0x4e4   :  { %19 = sbr.rel (!%p17_p8) target bundleno = 1 (0x1), region = 105 }

</bundles_post_ra>
